<compile_context>
chip_gen: v7x
topology: tpu7x:2x2x1
jax: 0.10.0
libtpu: 0.0.40
codegen_flags: <defaults>
</compile_context>

<pallas_src>
import jax
import jax.numpy as jnp
from jax.experimental import pallas as pl
from jax.experimental.pallas import tpu as pltpu


# ---------------------------------------------------------------------------
# Model dimensions (x_dim=784 is forced by `x.view(-1, 784)` in the PyTorch
# forward).
# ---------------------------------------------------------------------------
X_DIM = 784
H_DIM1 = 256
H_DIM2 = 128
Z_DIM = 16
CLASS_SIZE = 10
MAX_TILE_B = 512     # per-step row cap; ~5 MB/step << 32 MiB scoped VMEM


def _cvae_kernel(
    x_ref, c_ref, eps_ref,
    w1x_ref, wc_ref, b1_ref,          # wc = fc1_c || fc4_c  -> (10, 384)
    w2_ref, b2_ref,
    w3_ref, b3_ref,                   # fused fc31 || fc32   -> (128, 32)
    w4z_ref, b4_ref,
    w5_ref, b5_ref,
    w6_ref, b6_ref,
    recon_ref, ml_ref,
):
    cdt = jnp.bfloat16  # MXU input dtype; accumulation stays f32

    x = x_ref[...].astype(cdt)                 # (TB, 784)  (no-op if bf16 in)
    c = c_ref[...].astype(cdt)                 # (TB, 10)
    eps = eps_ref[...].astype(jnp.float32)     # (TB, Z)

    # Shared class-conditioning projection: one (TB,10)x(10,384) dot feeds
    # both fc1 (lanes 0:256) and fc4 (lanes 256:384).
    cc = jnp.dot(c, wc_ref[...], preferred_element_type=jnp.float32)

    # ---------------- encoder ----------------
    # fc1 on concat([x, c]) == x @ W1x + c @ W1c   (no in-kernel concat)
    h = (jnp.dot(x, w1x_ref[...], preferred_element_type=jnp.float32)
         + cc[:, :H_DIM1] + b1_ref[...])
    h = jnp.maximum(h, 0.0)                                   # ReLU

    h = (jnp.dot(h.astype(cdt), w2_ref[...],
                 preferred_element_type=jnp.float32) + b2_ref[...])
    h = jnp.maximum(h, 0.0)                                   # ReLU

    # fused fc31 || fc32 -> (TB, 2*Z_DIM) = mu || logvar
    ml = (jnp.dot(h.astype(cdt), w3_ref[...],
                  preferred_element_type=jnp.float32) + b3_ref[...])
    mu = ml[:, :Z_DIM]
    logvar = ml[:, Z_DIM:]

    # ---------------- sampling (reparameterization) ----------------
    std = jnp.exp(0.5 * logvar)
    z = eps * std + mu

    # ---------------- decoder ----------------
    # fc4 on concat([z, c]) == z @ W4z + c @ W4c
    h = (jnp.dot(z.astype(cdt), w4z_ref[...],
                 preferred_element_type=jnp.float32)
         + cc[:, H_DIM1:] + b4_ref[...])
    h = jnp.maximum(h, 0.0)                                   # ReLU

    h = (jnp.dot(h.astype(cdt), w5_ref[...],
                 preferred_element_type=jnp.float32) + b5_ref[...])
    h = jnp.maximum(h, 0.0)                                   # ReLU

    logits = (jnp.dot(h.astype(cdt), w6_ref[...],
                      preferred_element_type=jnp.float32) + b6_ref[...])

    # sigmoid(x) = 1 / (1 + exp(-x)); exp and recip both ride the EUP slot.
    recon = pl.reciprocal(1.0 + jnp.exp(-logits), approx=True)
    recon_ref[...] = recon.astype(recon_ref.dtype)
    ml_ref[...] = ml.astype(ml_ref.dtype)


def _init_params(key):
    """Deterministic Linear-style init; weights stored as (in, out), bf16."""
    # TODO(synk): not bit-identical to PyTorch's kaiming_uniform_(a=sqrt(5))
    # default init; load real checkpoint weights (transposed) for exact match.

    def linear(key, fan_in, fan_out):
        k_w, k_b = jax.random.split(key)
        bound = 1.0 / jnp.sqrt(fan_in)
        w = jax.random.uniform(k_w, (fan_in, fan_out), jnp.float32, -bound, bound)
        b = jax.random.uniform(k_b, (1, fan_out), jnp.float32, -bound, bound)
        return w, b

    keys = jax.random.split(key, 7)
    w1, b1 = linear(keys[0], X_DIM + CLASS_SIZE, H_DIM1)   # fc1
    w2, b2 = linear(keys[1], H_DIM1, H_DIM2)               # fc2
    w31, b31 = linear(keys[2], H_DIM2, Z_DIM)              # fc31
    w32, b32 = linear(keys[3], H_DIM2, Z_DIM)              # fc32
    w4, b4 = linear(keys[4], Z_DIM + CLASS_SIZE, H_DIM2)   # fc4
    w5, b5 = linear(keys[5], H_DIM2, H_DIM1)               # fc5
    w6, b6 = linear(keys[6], H_DIM1, X_DIM)                # fc6

    bf16 = jnp.bfloat16
    params = dict(
        # Split concat-facing weights; weights bf16, biases f32.
        w1x=w1[:X_DIM].astype(bf16), b1=b1,
        # fc1_c (10,256) and fc4_c (10,128) merged into one (10, 384) weight.
        wc=jnp.concatenate([w1[X_DIM:], w4[Z_DIM:]], axis=1).astype(bf16),
        w2=w2.astype(bf16), b2=b2,
        # fc31/fc32 fused into one lane-dense (128, 32) projection.
        w3=jnp.concatenate([w31, w32], axis=1).astype(bf16),
        b3=jnp.concatenate([b31, b32], axis=1),
        w4z=w4[:Z_DIM].astype(bf16), b4=b4,
        w5=w5.astype(bf16), b5=b5,
        w6=w6.astype(bf16), b6=b6,
    )
    return params


_WEIGHT_ORDER = ["w1x", "wc", "b1", "w2", "b2", "w3", "b3",
                 "w4z", "b4", "w5", "b5", "w6", "b6"]


def _round_up(n, m):
    return ((n + m - 1) // m) * m


def _num_tensorcores():
    """Best-effort TensorCores-per-chip detection (2 on v7x, else 1)."""
    try:
        kind = jax.devices()[0].device_kind.lower()
        if "v7" in kind or "tpu7" in kind:
            return 2
    except Exception:
        pass
    return 1


def _pallas_cvae(x_flat, c_onehot, eps, weights, *, tile_b, b_pad,
                 recon_dtype, semantics, use_buffered):
    grid = (b_pad // tile_b,)

    def batch_spec(ncols):
        return pl.BlockSpec((tile_b, ncols), lambda i: (i, 0))

    def resident_spec(arr):
        # Full-shape block, constant index map -> loaded once, kept resident
        # in VMEM across grid steps. Buffered(1): no second buffer needed for
        # inputs whose block index never changes.
        if use_buffered:
            return pl.BlockSpec(arr.shape, lambda i: (0, 0),
                                pipeline_mode=pl.Buffered(1))
        return pl.BlockSpec(arr.shape, lambda i: (0, 0))

    in_specs = ([batch_spec(X_DIM), batch_spec(CLASS_SIZE), batch_spec(Z_DIM)]
                + [resident_spec(w) for w in weights])
    out_specs = (batch_spec(X_DIM), batch_spec(2 * Z_DIM))

    # Advisory cost estimate (helps XLA schedule around the custom call).
    flops_per_row = 2 * (X_DIM * H_DIM1 + CLASS_SIZE * (H_DIM1 + H_DIM2)
                         + H_DIM1 * H_DIM2 + H_DIM2 * 2 * Z_DIM
                         + Z_DIM * H_DIM2 + H_DIM2 * H_DIM1 + H_DIM1 * X_DIM)
    weight_bytes = sum(int(w.size) * w.dtype.itemsize for w in weights)
    act_bytes = (x_flat.dtype.itemsize * b_pad * X_DIM
                 + 4 * b_pad * (CLASS_SIZE + Z_DIM + 2 * Z_DIM)
                 + jnp.dtype(recon_dtype).itemsize * b_pad * X_DIM)
    cost = pl.CostEstimate(
        flops=int(flops_per_row * b_pad),
        transcendentals=int(b_pad * (Z_DIM + 2 * X_DIM)),  # exp(std)+sigmoid
        bytes_accessed=int(weight_bytes + act_bytes),
    )

    return pl.pallas_call(
        _cvae_kernel,
        out_shape=(
            jax.ShapeDtypeStruct((b_pad, X_DIM), recon_dtype),
            jax.ShapeDtypeStruct((b_pad, 2 * Z_DIM), jnp.float32),
        ),
        grid=grid,
        in_specs=in_specs,
        out_specs=out_specs,
        compiler_params=pltpu.CompilerParams(dimension_semantics=semantics),
        cost_estimate=cost,
    )(x_flat, c_onehot, eps, *weights)


def cvae_forward(x_img, c_onehot, eps, params, *, recon_dtype=jnp.float32):
    """x_img: (B, 1, 28, 28) NCHW; c_onehot: (B, 10); eps: (B, Z_DIM).

    Returns (recon, mu, logvar), matching PyTorch's
    (decoder(z, c), mu, log_var) with z = eps * exp(0.5*logvar) + mu.
    """
    x_flat = x_img.reshape(-1, X_DIM)   # == x.view(-1, 784)
    B = x_flat.shape[0]

    # Per-generation tiling: one full-batch tile on single-TC chips (v5e/v6e),
    # one tile per core on v7x, capped at MAX_TILE_B rows for huge batches.
    # Block (tile_b, 784) is legal: sublane dim divisible by 8, lane dim is
    # the full array dim.
    n_cores = _num_tensorcores()
    n_steps = _round_up(max(n_cores, pl.cdiv(B, MAX_TILE_B)), n_cores)
    tile_b = _round_up(pl.cdiv(B, n_steps), 8)
    b_pad = _round_up(B, tile_b)

    if b_pad != B:
        pad = b_pad - B
        x_flat = jnp.pad(x_flat, ((0, pad), (0, 0)))
        c_onehot = jnp.pad(c_onehot, ((0, pad), (0, 0)))
        eps = jnp.pad(eps, ((0, pad), (0, 0)))

    weights = [params[k] for k in _WEIGHT_ORDER]
    n_grid = b_pad // tile_b

    # Preferred config first (true core-sharding on v7x, single-buffered
    # resident weights); fall back to plain parallel / double-buffered specs
    # if a given generation's compiler rejects it.
    configs = []
    if n_cores >= 2 and n_grid >= 2:
        configs.append(((pltpu.CORE_PARALLEL,), True))
    configs.append(((pltpu.PARALLEL,), True))
    configs.append((("parallel",), False))

    last_err = None
    for semantics, use_buffered in configs:
        try:
            recon, ml = _pallas_cvae(
                x_flat, c_onehot, eps, weights,
                tile_b=tile_b, b_pad=b_pad, recon_dtype=recon_dtype,
                semantics=semantics, use_buffered=use_buffered)
            jax.block_until_ready((recon, ml))
            break
        except Exception as e:   # lowering rejection -> try safer config
            last_err = e
    else:
        raise last_err

    recon = recon[:B]
    mu = ml[:B, :Z_DIM]
    logvar = ml[:B, Z_DIM:]
    return recon, mu, logvar


def _cvae_reference(x_flat, c, eps, params):
    """Pure-JAX reference mirroring the kernel's bf16-weight / f32-acc math."""
    bf = jnp.bfloat16
    f32 = jnp.float32

    def dot(a, w):
        return jnp.dot(a.astype(bf), w, preferred_element_type=f32)

    cc = dot(c, params["wc"])
    h = jax.nn.relu(dot(x_flat, params["w1x"]) + cc[:, :H_DIM1] + params["b1"])
    h = jax.nn.relu(dot(h, params["w2"]) + params["b2"])
    ml = dot(h, params["w3"]) + params["b3"]
    mu, logvar = ml[:, :Z_DIM], ml[:, Z_DIM:]
    z = eps * jnp.exp(0.5 * logvar) + mu
    h = jax.nn.relu(dot(z, params["w4z"]) + cc[:, H_DIM1:] + params["b4"])
    h = jax.nn.relu(dot(h, params["w5"]) + params["b5"])
    logits = dot(h, params["w6"]) + params["b6"]
    return jax.nn.sigmoid(logits), mu, logvar


if __name__ == "__main__":
    key = jax.random.PRNGKey(0)
    k_params, k_x, k_c, k_eps = jax.random.split(key, 4)

    params = _init_params(k_params)

    # Small deterministic example: MNIST-like images in [0, 1], one-hot labels.
    BATCH = 16
    x_img = jax.random.uniform(k_x, (BATCH, 1, 28, 28), jnp.float32)
    labels = jax.random.randint(k_c, (BATCH,), 0, CLASS_SIZE)
    c_onehot = jax.nn.one_hot(labels, CLASS_SIZE, dtype=jnp.float32)
    # eps plays the role of torch.randn_like(std) in `sampling`.
    eps = jax.random.normal(k_eps, (BATCH, Z_DIM), jnp.float32)

    recon, mu, logvar = cvae_forward(x_img, c_onehot, eps, params)
    jax.block_until_ready((recon, mu, logvar))

    assert recon.shape == (BATCH, X_DIM)
    assert mu.shape == (BATCH, Z_DIM)
    assert logvar.shape == (BATCH, Z_DIM)
    assert bool(jnp.isfinite(recon).all())
    assert bool(jnp.isfinite(mu).all())
    assert bool(jnp.isfinite(logvar).all())

    # Tolerance check vs. a pure-JAX reference using the same bf16 weights
    # (drift comes from MXU accumulation order + approx-reciprocal sigmoid).
    ref_recon, ref_mu, ref_logvar = _cvae_reference(
        x_img.reshape(-1, X_DIM), c_onehot, eps, params)
    assert float(jnp.max(jnp.abs(recon - ref_recon))) < 2e-2
    assert float(jnp.max(jnp.abs(mu - ref_mu))) < 2e-2
    assert float(jnp.max(jnp.abs(logvar - ref_logvar))) < 2e-2

    print("KERNEL_OK")
</pallas_src>

<mosaic_0001>
module attributes {stable_mosaic.version = 11 : i64} {
  func.func @_cvae_kernel(%arg0: i32, %arg1: memref<16x784xf32, #tpu.memory_space<vmem>>, %arg2: memref<16x10xf32, #tpu.memory_space<vmem>>, %arg3: memref<16x16xf32, #tpu.memory_space<vmem>>, %arg4: memref<784x256xbf16, #tpu.memory_space<vmem>>, %arg5: memref<10x384xbf16, #tpu.memory_space<vmem>>, %arg6: memref<1x256xf32, #tpu.memory_space<vmem>>, %arg7: memref<256x128xbf16, #tpu.memory_space<vmem>>, %arg8: memref<1x128xf32, #tpu.memory_space<vmem>>, %arg9: memref<128x32xbf16, #tpu.memory_space<vmem>>, %arg10: memref<1x32xf32, #tpu.memory_space<vmem>>, %arg11: memref<16x128xbf16, #tpu.memory_space<vmem>>, %arg12: memref<1x128xf32, #tpu.memory_space<vmem>>, %arg13: memref<128x256xbf16, #tpu.memory_space<vmem>>, %arg14: memref<1x256xf32, #tpu.memory_space<vmem>>, %arg15: memref<256x784xbf16, #tpu.memory_space<vmem>>, %arg16: memref<1x784xf32, #tpu.memory_space<vmem>>, %arg17: memref<16x784xf32, #tpu.memory_space<vmem>>, %arg18: memref<16x32xf32, #tpu.memory_space<vmem>>) attributes {dimension_semantics = [#tpu.dimension_semantics<parallel>], iteration_bounds = array<i64: 1>, scalar_prefetch = 0 : i64, scratch_operands = 0 : i64, tpu.core_type = #tpu.core_type<tc>, window_params = [{transform_indices = @transform_0, window_bounds = array<i64: 16, 784>}, {transform_indices = @transform_1, window_bounds = array<i64: 16, 10>}, {transform_indices = @transform_2, window_bounds = array<i64: 16, 16>}, {pipeline_mode = #tpu.pipeline_mode<synchronous>, transform_indices = @transform_3, window_bounds = array<i64: 784, 256>}, {pipeline_mode = #tpu.pipeline_mode<synchronous>, transform_indices = @transform_4, window_bounds = array<i64: 10, 384>}, {pipeline_mode = #tpu.pipeline_mode<synchronous>, transform_indices = @transform_5, window_bounds = array<i64: 1, 256>}, {pipeline_mode = #tpu.pipeline_mode<synchronous>, transform_indices = @transform_6, window_bounds = array<i64: 256, 128>}, {pipeline_mode = #tpu.pipeline_mode<synchronous>, transform_indices = @transform_7, window_bounds = array<i64: 1, 128>}, {pipeline_mode = #tpu.pipeline_mode<synchronous>, transform_indices = @transform_8, window_bounds = array<i64: 128, 32>}, {pipeline_mode = #tpu.pipeline_mode<synchronous>, transform_indices = @transform_9, window_bounds = array<i64: 1, 32>}, {pipeline_mode = #tpu.pipeline_mode<synchronous>, transform_indices = @transform_10, window_bounds = array<i64: 16, 128>}, {pipeline_mode = #tpu.pipeline_mode<synchronous>, transform_indices = @transform_11, window_bounds = array<i64: 1, 128>}, {pipeline_mode = #tpu.pipeline_mode<synchronous>, transform_indices = @transform_12, window_bounds = array<i64: 128, 256>}, {pipeline_mode = #tpu.pipeline_mode<synchronous>, transform_indices = @transform_13, window_bounds = array<i64: 1, 256>}, {pipeline_mode = #tpu.pipeline_mode<synchronous>, transform_indices = @transform_14, window_bounds = array<i64: 256, 784>}, {pipeline_mode = #tpu.pipeline_mode<synchronous>, transform_indices = @transform_15, window_bounds = array<i64: 1, 784>}, {transform_indices = @transform_16, window_bounds = array<i64: 16, 784>}, {transform_indices = @transform_17, window_bounds = array<i64: 16, 32>}]} {
    %c0 = arith.constant 0 : index
    %c0_0 = arith.constant 0 : index
    %0 = vector.load %arg1[%c0, %c0_0] : memref<16x784xf32, #tpu.memory_space<vmem>>, vector<16x784xf32>
    %1 = arith.truncf %0 : vector<16x784xf32> to vector<16x784xbf16>
    %c0_1 = arith.constant 0 : index
    %c0_2 = arith.constant 0 : index
    %2 = vector.load %arg2[%c0_1, %c0_2] : memref<16x10xf32, #tpu.memory_space<vmem>>, vector<16x10xf32>
    %3 = arith.truncf %2 : vector<16x10xf32> to vector<16x10xbf16>
    %c0_3 = arith.constant 0 : index
    %c0_4 = arith.constant 0 : index
    %4 = vector.load %arg3[%c0_3, %c0_4] : memref<16x16xf32, #tpu.memory_space<vmem>>, vector<16x16xf32>
    %c0_5 = arith.constant 0 : index
    %c0_6 = arith.constant 0 : index
    %5 = vector.load %arg5[%c0_5, %c0_6] : memref<10x384xbf16, #tpu.memory_space<vmem>>, vector<10x384xbf16>
    %cst = arith.constant dense<0.000000e+00> : vector<16x384xf32>
    %6 = tpu.matmul %3, %5, %cst {dimension_numbers = #tpu.dot_dimension_numbers<[1], [0], [0], [1], [0, 0, 1, 1], [], []>} : vector<16x10xbf16>, vector<10x384xbf16>, vector<16x384xf32> -> vector<16x384xf32>
    %c0_7 = arith.constant 0 : index
    %c0_8 = arith.constant 0 : index
    %7 = vector.load %arg4[%c0_7, %c0_8] : memref<784x256xbf16, #tpu.memory_space<vmem>>, vector<784x256xbf16>
    %cst_9 = arith.constant dense<0.000000e+00> : vector<16x256xf32>
    %8 = tpu.matmul %1, %7, %cst_9 {dimension_numbers = #tpu.dot_dimension_numbers<[1], [0], [0], [1], [0, 0, 1, 1], [], []>} : vector<16x784xbf16>, vector<784x256xbf16>, vector<16x256xf32> -> vector<16x256xf32>
    %9 = vector.extract_strided_slice %6 {offsets = [0, 0], sizes = [16, 256], strides = [1, 1]} : vector<16x384xf32> to vector<16x256xf32>
    %10 = arith.addf %8, %9 : vector<16x256xf32>
    %c0_10 = arith.constant 0 : index
    %c0_11 = arith.constant 0 : index
    %11 = vector.load %arg6[%c0_10, %c0_11] : memref<1x256xf32, #tpu.memory_space<vmem>>, vector<1x256xf32>
    %12 = vector.broadcast %11 : vector<1x256xf32> to vector<16x256xf32>
    %13 = arith.addf %10, %12 : vector<16x256xf32>
    %cst_12 = arith.constant 0.000000e+00 : f32
    %14 = vector.broadcast %cst_12 : f32 to vector<16x256xf32>
    %15 = arith.maximumf %13, %14 : vector<16x256xf32>
    %16 = arith.truncf %15 : vector<16x256xf32> to vector<16x256xbf16>
    %c0_13 = arith.constant 0 : index
    %c0_14 = arith.constant 0 : index
    %17 = vector.load %arg7[%c0_13, %c0_14] : memref<256x128xbf16, #tpu.memory_space<vmem>>, vector<256x128xbf16>
    %cst_15 = arith.constant dense<0.000000e+00> : vector<16x128xf32>
    %18 = tpu.matmul %16, %17, %cst_15 {dimension_numbers = #tpu.dot_dimension_numbers<[1], [0], [0], [1], [0, 0, 1, 1], [], []>} : vector<16x256xbf16>, vector<256x128xbf16>, vector<16x128xf32> -> vector<16x128xf32>
    %c0_16 = arith.constant 0 : index
    %c0_17 = arith.constant 0 : index
    %19 = vector.load %arg8[%c0_16, %c0_17] : memref<1x128xf32, #tpu.memory_space<vmem>>, vector<1x128xf32>
    %20 = vector.broadcast %19 : vector<1x128xf32> to vector<16x128xf32>
    %21 = arith.addf %18, %20 : vector<16x128xf32>
    %cst_18 = arith.constant 0.000000e+00 : f32
    %22 = vector.broadcast %cst_18 : f32 to vector<16x128xf32>
    %23 = arith.maximumf %21, %22 : vector<16x128xf32>
    %24 = arith.truncf %23 : vector<16x128xf32> to vector<16x128xbf16>
    %c0_19 = arith.constant 0 : index
    %c0_20 = arith.constant 0 : index
    %25 = vector.load %arg9[%c0_19, %c0_20] : memref<128x32xbf16, #tpu.memory_space<vmem>>, vector<128x32xbf16>
    %cst_21 = arith.constant dense<0.000000e+00> : vector<16x32xf32>
    %26 = tpu.matmul %24, %25, %cst_21 {dimension_numbers = #tpu.dot_dimension_numbers<[1], [0], [0], [1], [0, 0, 1, 1], [], []>} : vector<16x128xbf16>, vector<128x32xbf16>, vector<16x32xf32> -> vector<16x32xf32>
    %c0_22 = arith.constant 0 : index
    %c0_23 = arith.constant 0 : index
    %27 = vector.load %arg10[%c0_22, %c0_23] : memref<1x32xf32, #tpu.memory_space<vmem>>, vector<1x32xf32>
    %28 = vector.broadcast %27 : vector<1x32xf32> to vector<16x32xf32>
    %29 = arith.addf %26, %28 : vector<16x32xf32>
    %30 = vector.extract_strided_slice %29 {offsets = [0, 0], sizes = [16, 16], strides = [1, 1]} : vector<16x32xf32> to vector<16x16xf32>
    %31 = vector.extract_strided_slice %29 {offsets = [0, 16], sizes = [16, 16], strides = [1, 1]} : vector<16x32xf32> to vector<16x16xf32>
    %cst_24 = arith.constant 5.000000e-01 : f32
    %32 = vector.broadcast %cst_24 : f32 to vector<16x16xf32>
    %33 = arith.mulf %32, %31 : vector<16x16xf32>
    %34 = math.exp %33 : vector<16x16xf32>
    %35 = arith.mulf %4, %34 : vector<16x16xf32>
    %36 = arith.addf %35, %30 : vector<16x16xf32>
    %37 = arith.truncf %36 : vector<16x16xf32> to vector<16x16xbf16>
    %c0_25 = arith.constant 0 : index
    %c0_26 = arith.constant 0 : index
    %38 = vector.load %arg11[%c0_25, %c0_26] : memref<16x128xbf16, #tpu.memory_space<vmem>>, vector<16x128xbf16>
    %cst_27 = arith.constant dense<0.000000e+00> : vector<16x128xf32>
    %39 = tpu.matmul %37, %38, %cst_27 {dimension_numbers = #tpu.dot_dimension_numbers<[1], [0], [0], [1], [0, 0, 1, 1], [], []>} : vector<16x16xbf16>, vector<16x128xbf16>, vector<16x128xf32> -> vector<16x128xf32>
    %40 = vector.extract_strided_slice %6 {offsets = [0, 256], sizes = [16, 128], strides = [1, 1]} : vector<16x384xf32> to vector<16x128xf32>
    %41 = arith.addf %39, %40 : vector<16x128xf32>
    %c0_28 = arith.constant 0 : index
    %c0_29 = arith.constant 0 : index
    %42 = vector.load %arg12[%c0_28, %c0_29] : memref<1x128xf32, #tpu.memory_space<vmem>>, vector<1x128xf32>
    %43 = vector.broadcast %42 : vector<1x128xf32> to vector<16x128xf32>
    %44 = arith.addf %41, %43 : vector<16x128xf32>
    %cst_30 = arith.constant 0.000000e+00 : f32
    %45 = vector.broadcast %cst_30 : f32 to vector<16x128xf32>
    %46 = arith.maximumf %44, %45 : vector<16x128xf32>
    %47 = arith.truncf %46 : vector<16x128xf32> to vector<16x128xbf16>
    %c0_31 = arith.constant 0 : index
    %c0_32 = arith.constant 0 : index
    %48 = vector.load %arg13[%c0_31, %c0_32] : memref<128x256xbf16, #tpu.memory_space<vmem>>, vector<128x256xbf16>
    %cst_33 = arith.constant dense<0.000000e+00> : vector<16x256xf32>
    %49 = tpu.matmul %47, %48, %cst_33 {dimension_numbers = #tpu.dot_dimension_numbers<[1], [0], [0], [1], [0, 0, 1, 1], [], []>} : vector<16x128xbf16>, vector<128x256xbf16>, vector<16x256xf32> -> vector<16x256xf32>
    %c0_34 = arith.constant 0 : index
    %c0_35 = arith.constant 0 : index
    %50 = vector.load %arg14[%c0_34, %c0_35] : memref<1x256xf32, #tpu.memory_space<vmem>>, vector<1x256xf32>
    %51 = vector.broadcast %50 : vector<1x256xf32> to vector<16x256xf32>
    %52 = arith.addf %49, %51 : vector<16x256xf32>
    %cst_36 = arith.constant 0.000000e+00 : f32
    %53 = vector.broadcast %cst_36 : f32 to vector<16x256xf32>
    %54 = arith.maximumf %52, %53 : vector<16x256xf32>
    %55 = arith.truncf %54 : vector<16x256xf32> to vector<16x256xbf16>
    %c0_37 = arith.constant 0 : index
    %c0_38 = arith.constant 0 : index
    %56 = vector.load %arg15[%c0_37, %c0_38] : memref<256x784xbf16, #tpu.memory_space<vmem>>, vector<256x784xbf16>
    %cst_39 = arith.constant dense<0.000000e+00> : vector<16x784xf32>
    %57 = tpu.matmul %55, %56, %cst_39 {dimension_numbers = #tpu.dot_dimension_numbers<[1], [0], [0], [1], [0, 0, 1, 1], [], []>} : vector<16x256xbf16>, vector<256x784xbf16>, vector<16x784xf32> -> vector<16x784xf32>
    %c0_40 = arith.constant 0 : index
    %c0_41 = arith.constant 0 : index
    %58 = vector.load %arg16[%c0_40, %c0_41] : memref<1x784xf32, #tpu.memory_space<vmem>>, vector<1x784xf32>
    %59 = vector.broadcast %58 : vector<1x784xf32> to vector<16x784xf32>
    %60 = arith.addf %57, %59 : vector<16x784xf32>
    %cst_42 = arith.constant 0.000000e+00 : f32
    %61 = vector.broadcast %cst_42 : f32 to vector<16x784xf32>
    %62 = arith.subf %61, %60 : vector<16x784xf32>
    %63 = math.exp %62 : vector<16x784xf32>
    %cst_43 = arith.constant 1.000000e+00 : f32
    %64 = vector.broadcast %cst_43 : f32 to vector<16x784xf32>
    %65 = arith.addf %64, %63 : vector<16x784xf32>
    %66 = tpu.reciprocal %65 {approx = true} : vector<16x784xf32> -> vector<16x784xf32>
    %c0_44 = arith.constant 0 : index
    %c0_45 = arith.constant 0 : index
    %67 = vector.load %arg17[%c0_44, %c0_45] : memref<16x784xf32, #tpu.memory_space<vmem>>, vector<16x784xf32>
    tpu.vector_store %arg17[%c0_44, %c0_45], %66 {strides = array<i32>} : memref<16x784xf32, #tpu.memory_space<vmem>>, vector<16x784xf32>,
    %c0_46 = arith.constant 0 : index
    %c0_47 = arith.constant 0 : index
    %68 = vector.load %arg18[%c0_46, %c0_47] : memref<16x32xf32, #tpu.memory_space<vmem>>, vector<16x32xf32>
    tpu.vector_store %arg18[%c0_46, %c0_47], %29 {strides = array<i32>} : memref<16x32xf32, #tpu.memory_space<vmem>>, vector<16x32xf32>,
    return
  }
  func.func @transform_0(%arg0: i32) -> (i32, i32) {
    %c0_i32 = arith.constant 0 : i32
    %c0_i32_0 = arith.constant 0 : i32
    return %arg0, %c0_i32 : i32, i32
  }
  func.func @transform_1(%arg0: i32) -> (i32, i32) {
    %c0_i32 = arith.constant 0 : i32
    %c0_i32_0 = arith.constant 0 : i32
    return %arg0, %c0_i32 : i32, i32
  }
  func.func @transform_2(%arg0: i32) -> (i32, i32) {
    %c0_i32 = arith.constant 0 : i32
    %c0_i32_0 = arith.constant 0 : i32
    return %arg0, %c0_i32 : i32, i32
  }
  func.func @transform_3(%arg0: i32) -> (i32, i32) {
    %c0_i32 = arith.constant 0 : i32
    %c0_i32_0 = arith.constant 0 : i32
    %c0_i32_1 = arith.constant 0 : i32
    return %c0_i32, %c0_i32_0 : i32, i32
  }
  func.func @transform_4(%arg0: i32) -> (i32, i32) {
    %c0_i32 = arith.constant 0 : i32
    %c0_i32_0 = arith.constant 0 : i32
    %c0_i32_1 = arith.constant 0 : i32
    return %c0_i32, %c0_i32_0 : i32, i32
  }
  func.func @transform_5(%arg0: i32) -> (i32, i32) {
    %c0_i32 = arith.constant 0 : i32
    %c0_i32_0 = arith.constant 0 : i32
    %c0_i32_1 = arith.constant 0 : i32
    return %c0_i32, %c0_i32_0 : i32, i32
  }
  func.func @transform_6(%arg0: i32) -> (i32, i32) {
    %c0_i32 = arith.constant 0 : i32
    %c0_i32_0 = arith.constant 0 : i32
    %c0_i32_1 = arith.constant 0 : i32
    return %c0_i32, %c0_i32_0 : i32, i32
  }
  func.func @transform_7(%arg0: i32) -> (i32, i32) {
    %c0_i32 = arith.constant 0 : i32
    %c0_i32_0 = arith.constant 0 : i32
    %c0_i32_1 = arith.constant 0 : i32
    return %c0_i32, %c0_i32_0 : i32, i32
  }
  func.func @transform_8(%arg0: i32) -> (i32, i32) {
    %c0_i32 = arith.constant 0 : i32
    %c0_i32_0 = arith.constant 0 : i32
    %c0_i32_1 = arith.constant 0 : i32
    return %c0_i32, %c0_i32_0 : i32, i32
  }
  func.func @transform_9(%arg0: i32) -> (i32, i32) {
    %c0_i32 = arith.constant 0 : i32
    %c0_i32_0 = arith.constant 0 : i32
    %c0_i32_1 = arith.constant 0 : i32
    return %c0_i32, %c0_i32_0 : i32, i32
  }
  func.func @transform_10(%arg0: i32) -> (i32, i32) {
    %c0_i32 = arith.constant 0 : i32
    %c0_i32_0 = arith.constant 0 : i32
    %c0_i32_1 = arith.constant 0 : i32
    return %c0_i32, %c0_i32_0 : i32, i32
  }
  func.func @transform_11(%arg0: i32) -> (i32, i32) {
    %c0_i32 = arith.constant 0 : i32
    %c0_i32_0 = arith.constant 0 : i32
    %c0_i32_1 = arith.constant 0 : i32
    return %c0_i32, %c0_i32_0 : i32, i32
  }
  func.func @transform_12(%arg0: i32) -> (i32, i32) {
    %c0_i32 = arith.constant 0 : i32
    %c0_i32_0 = arith.constant 0 : i32
    %c0_i32_1 = arith.constant 0 : i32
    return %c0_i32, %c0_i32_0 : i32, i32
  }
  func.func @transform_13(%arg0: i32) -> (i32, i32) {
    %c0_i32 = arith.constant 0 : i32
    %c0_i32_0 = arith.constant 0 : i32
    %c0_i32_1 = arith.constant 0 : i32
    return %c0_i32, %c0_i32_0 : i32, i32
  }
  func.func @transform_14(%arg0: i32) -> (i32, i32) {
    %c0_i32 = arith.constant 0 : i32
    %c0_i32_0 = arith.constant 0 : i32
    %c0_i32_1 = arith.constant 0 : i32
    return %c0_i32, %c0_i32_0 : i32, i32
  }
  func.func @transform_15(%arg0: i32) -> (i32, i32) {
    %c0_i32 = arith.constant 0 : i32
    %c0_i32_0 = arith.constant 0 : i32
    %c0_i32_1 = arith.constant 0 : i32
    return %c0_i32, %c0_i32_0 : i32, i32
  }
  func.func @transform_16(%arg0: i32) -> (i32, i32) {
    %c0_i32 = arith.constant 0 : i32
    %c0_i32_0 = arith.constant 0 : i32
    return %arg0, %c0_i32 : i32, i32
  }
  func.func @transform_17(%arg0: i32) -> (i32, i32) {
    %c0_i32 = arith.constant 0 : i32
    %c0_i32_0 = arith.constant 0 : i32
    return %arg0, %c0_i32 : i32, i32
  }
}

module attributes {stable_mosaic.version = 11 : i64} {
  func.func @_cvae_kernel(%arg0: i32, %arg1: memref<16x784xf32, #tpu.memory_space<vmem>>, %arg2: memref<16x10xf32, #tpu.memory_space<vmem>>, %arg3: memref<16x16xf32, #tpu.memory_space<vmem>>, %arg4: memref<784x256xbf16, #tpu.memory_space<vmem>>, %arg5: memref<10x384xbf16, #tpu.memory_space<vmem>>, %arg6: memref<1x256xf32, #tpu.memory_space<vmem>>, %arg7: memref<256x128xbf16, #tpu.memory_space<vmem>>, %arg8: memref<1x128xf32, #tpu.memory_space<vmem>>, %arg9: memref<128x32xbf16, #tpu.memory_space<vmem>>, %arg10: memref<1x32xf32, #tpu.memory_space<vmem>>, %arg11: memref<16x128xbf16, #tpu.memory_space<vmem>>, %arg12: memref<1x128xf32, #tpu.memory_space<vmem>>, %arg13: memref<128x256xbf16, #tpu.memory_space<vmem>>, %arg14: memref<1x256xf32, #tpu.memory_space<vmem>>, %arg15: memref<256x784xbf16, #tpu.memory_space<vmem>>, %arg16: memref<1x784xf32, #tpu.memory_space<vmem>>, %arg17: memref<16x784xf32, #tpu.memory_space<vmem>>, %arg18: memref<16x32xf32, #tpu.memory_space<vmem>>) attributes {dimension_semantics = [#tpu.dimension_semantics<parallel>], iteration_bounds = array<i64: 1>, scalar_prefetch = 0 : i64, scratch_operands = 0 : i64, tpu.core_type = #tpu.core_type<tc>, window_params = [{transform_indices = @transform_0, window_bounds = array<i64: 16, 784>}, {transform_indices = @transform_1, window_bounds = array<i64: 16, 10>}, {transform_indices = @transform_2, window_bounds = array<i64: 16, 16>}, {pipeline_mode = #tpu.pipeline_mode<synchronous>, transform_indices = @transform_3, window_bounds = array<i64: 784, 256>}, {pipeline_mode = #tpu.pipeline_mode<synchronous>, transform_indices = @transform_4, window_bounds = array<i64: 10, 384>}, {pipeline_mode = #tpu.pipeline_mode<synchronous>, transform_indices = @transform_5, window_bounds = array<i64: 1, 256>}, {pipeline_mode = #tpu.pipeline_mode<synchronous>, transform_indices = @transform_6, window_bounds = array<i64: 256, 128>}, {pipeline_mode = #tpu.pipeline_mode<synchronous>, transform_indices = @transform_7, window_bounds = array<i64: 1, 128>}, {pipeline_mode = #tpu.pipeline_mode<synchronous>, transform_indices = @transform_8, window_bounds = array<i64: 128, 32>}, {pipeline_mode = #tpu.pipeline_mode<synchronous>, transform_indices = @transform_9, window_bounds = array<i64: 1, 32>}, {pipeline_mode = #tpu.pipeline_mode<synchronous>, transform_indices = @transform_10, window_bounds = array<i64: 16, 128>}, {pipeline_mode = #tpu.pipeline_mode<synchronous>, transform_indices = @transform_11, window_bounds = array<i64: 1, 128>}, {pipeline_mode = #tpu.pipeline_mode<synchronous>, transform_indices = @transform_12, window_bounds = array<i64: 128, 256>}, {pipeline_mode = #tpu.pipeline_mode<synchronous>, transform_indices = @transform_13, window_bounds = array<i64: 1, 256>}, {pipeline_mode = #tpu.pipeline_mode<synchronous>, transform_indices = @transform_14, window_bounds = array<i64: 256, 784>}, {pipeline_mode = #tpu.pipeline_mode<synchronous>, transform_indices = @transform_15, window_bounds = array<i64: 1, 784>}, {transform_indices = @transform_16, window_bounds = array<i64: 16, 784>}, {transform_indices = @transform_17, window_bounds = array<i64: 16, 32>}]} {
    %c0 = arith.constant 0 : index
    %c0_0 = arith.constant 0 : index
    %0 = vector.load %arg1[%c0, %c0_0] : memref<16x784xf32, #tpu.memory_space<vmem>>, vector<16x784xf32>
    %1 = arith.truncf %0 : vector<16x784xf32> to vector<16x784xbf16>
    %c0_1 = arith.constant 0 : index
    %c0_2 = arith.constant 0 : index
    %2 = vector.load %arg2[%c0_1, %c0_2] : memref<16x10xf32, #tpu.memory_space<vmem>>, vector<16x10xf32>
    %3 = arith.truncf %2 : vector<16x10xf32> to vector<16x10xbf16>
    %c0_3 = arith.constant 0 : index
    %c0_4 = arith.constant 0 : index
    %4 = vector.load %arg3[%c0_3, %c0_4] : memref<16x16xf32, #tpu.memory_space<vmem>>, vector<16x16xf32>
    %c0_5 = arith.constant 0 : index
    %c0_6 = arith.constant 0 : index
    %5 = vector.load %arg5[%c0_5, %c0_6] : memref<10x384xbf16, #tpu.memory_space<vmem>>, vector<10x384xbf16>
    %cst = arith.constant dense<0.000000e+00> : vector<16x384xf32>
    %6 = tpu.matmul %3, %5, %cst {dimension_numbers = #tpu.dot_dimension_numbers<[1], [0], [0], [1], [0, 0, 1, 1], [], []>} : vector<16x10xbf16>, vector<10x384xbf16>, vector<16x384xf32> -> vector<16x384xf32>
    %c0_7 = arith.constant 0 : index
    %c0_8 = arith.constant 0 : index
    %7 = vector.load %arg4[%c0_7, %c0_8] : memref<784x256xbf16, #tpu.memory_space<vmem>>, vector<784x256xbf16>
    %cst_9 = arith.constant dense<0.000000e+00> : vector<16x256xf32>
    %8 = tpu.matmul %1, %7, %cst_9 {dimension_numbers = #tpu.dot_dimension_numbers<[1], [0], [0], [1], [0, 0, 1, 1], [], []>} : vector<16x784xbf16>, vector<784x256xbf16>, vector<16x256xf32> -> vector<16x256xf32>
    %9 = vector.extract_strided_slice %6 {offsets = [0, 0], sizes = [16, 256], strides = [1, 1]} : vector<16x384xf32> to vector<16x256xf32>
    %10 = arith.addf %8, %9 : vector<16x256xf32>
    %c0_10 = arith.constant 0 : index
    %c0_11 = arith.constant 0 : index
    %11 = vector.load %arg6[%c0_10, %c0_11] : memref<1x256xf32, #tpu.memory_space<vmem>>, vector<1x256xf32>
    %12 = vector.broadcast %11 : vector<1x256xf32> to vector<16x256xf32>
    %13 = arith.addf %10, %12 : vector<16x256xf32>
    %cst_12 = arith.constant 0.000000e+00 : f32
    %14 = vector.broadcast %cst_12 : f32 to vector<16x256xf32>
    %15 = arith.maximumf %13, %14 : vector<16x256xf32>
    %16 = arith.truncf %15 : vector<16x256xf32> to vector<16x256xbf16>
    %c0_13 = arith.constant 0 : index
    %c0_14 = arith.constant 0 : index
    %17 = vector.load %arg7[%c0_13, %c0_14] : memref<256x128xbf16, #tpu.memory_space<vmem>>, vector<256x128xbf16>
    %cst_15 = arith.constant dense<0.000000e+00> : vector<16x128xf32>
    %18 = tpu.matmul %16, %17, %cst_15 {dimension_numbers = #tpu.dot_dimension_numbers<[1], [0], [0], [1], [0, 0, 1, 1], [], []>} : vector<16x256xbf16>, vector<256x128xbf16>, vector<16x128xf32> -> vector<16x128xf32>
    %c0_16 = arith.constant 0 : index
    %c0_17 = arith.constant 0 : index
    %19 = vector.load %arg8[%c0_16, %c0_17] : memref<1x128xf32, #tpu.memory_space<vmem>>, vector<1x128xf32>
    %20 = vector.broadcast %19 : vector<1x128xf32> to vector<16x128xf32>
    %21 = arith.addf %18, %20 : vector<16x128xf32>
    %cst_18 = arith.constant 0.000000e+00 : f32
    %22 = vector.broadcast %cst_18 : f32 to vector<16x128xf32>
    %23 = arith.maximumf %21, %22 : vector<16x128xf32>
    %24 = arith.truncf %23 : vector<16x128xf32> to vector<16x128xbf16>
    %c0_19 = arith.constant 0 : index
    %c0_20 = arith.constant 0 : index
    %25 = vector.load %arg9[%c0_19, %c0_20] : memref<128x32xbf16, #tpu.memory_space<vmem>>, vector<128x32xbf16>
    %cst_21 = arith.constant dense<0.000000e+00> : vector<16x32xf32>
    %26 = tpu.matmul %24, %25, %cst_21 {dimension_numbers = #tpu.dot_dimension_numbers<[1], [0], [0], [1], [0, 0, 1, 1], [], []>} : vector<16x128xbf16>, vector<128x32xbf16>, vector<16x32xf32> -> vector<16x32xf32>
    %c0_22 = arith.constant 0 : index
    %c0_23 = arith.constant 0 : index
    %27 = vector.load %arg10[%c0_22, %c0_23] : memref<1x32xf32, #tpu.memory_space<vmem>>, vector<1x32xf32>
    %28 = vector.broadcast %27 : vector<1x32xf32> to vector<16x32xf32>
    %29 = arith.addf %26, %28 : vector<16x32xf32>
    %30 = vector.extract_strided_slice %29 {offsets = [0, 0], sizes = [16, 16], strides = [1, 1]} : vector<16x32xf32> to vector<16x16xf32>
    %31 = vector.extract_strided_slice %29 {offsets = [0, 16], sizes = [16, 16], strides = [1, 1]} : vector<16x32xf32> to vector<16x16xf32>
    %cst_24 = arith.constant 5.000000e-01 : f32
    %32 = vector.broadcast %cst_24 : f32 to vector<16x16xf32>
    %33 = arith.mulf %32, %31 : vector<16x16xf32>
    %34 = math.exp %33 : vector<16x16xf32>
    %35 = arith.mulf %4, %34 : vector<16x16xf32>
    %36 = arith.addf %35, %30 : vector<16x16xf32>
    %37 = arith.truncf %36 : vector<16x16xf32> to vector<16x16xbf16>
    %c0_25 = arith.constant 0 : index
    %c0_26 = arith.constant 0 : index
    %38 = vector.load %arg11[%c0_25, %c0_26] : memref<16x128xbf16, #tpu.memory_space<vmem>>, vector<16x128xbf16>
    %cst_27 = arith.constant dense<0.000000e+00> : vector<16x128xf32>
    %39 = tpu.matmul %37, %38, %cst_27 {dimension_numbers = #tpu.dot_dimension_numbers<[1], [0], [0], [1], [0, 0, 1, 1], [], []>} : vector<16x16xbf16>, vector<16x128xbf16>, vector<16x128xf32> -> vector<16x128xf32>
    %40 = vector.extract_strided_slice %6 {offsets = [0, 256], sizes = [16, 128], strides = [1, 1]} : vector<16x384xf32> to vector<16x128xf32>
    %41 = arith.addf %39, %40 : vector<16x128xf32>
    %c0_28 = arith.constant 0 : index
    %c0_29 = arith.constant 0 : index
    %42 = vector.load %arg12[%c0_28, %c0_29] : memref<1x128xf32, #tpu.memory_space<vmem>>, vector<1x128xf32>
    %43 = vector.broadcast %42 : vector<1x128xf32> to vector<16x128xf32>
    %44 = arith.addf %41, %43 : vector<16x128xf32>
    %cst_30 = arith.constant 0.000000e+00 : f32
    %45 = vector.broadcast %cst_30 : f32 to vector<16x128xf32>
    %46 = arith.maximumf %44, %45 : vector<16x128xf32>
    %47 = arith.truncf %46 : vector<16x128xf32> to vector<16x128xbf16>
    %c0_31 = arith.constant 0 : index
    %c0_32 = arith.constant 0 : index
    %48 = vector.load %arg13[%c0_31, %c0_32] : memref<128x256xbf16, #tpu.memory_space<vmem>>, vector<128x256xbf16>
    %cst_33 = arith.constant dense<0.000000e+00> : vector<16x256xf32>
    %49 = tpu.matmul %47, %48, %cst_33 {dimension_numbers = #tpu.dot_dimension_numbers<[1], [0], [0], [1], [0, 0, 1, 1], [], []>} : vector<16x128xbf16>, vector<128x256xbf16>, vector<16x256xf32> -> vector<16x256xf32>
    %c0_34 = arith.constant 0 : index
    %c0_35 = arith.constant 0 : index
    %50 = vector.load %arg14[%c0_34, %c0_35] : memref<1x256xf32, #tpu.memory_space<vmem>>, vector<1x256xf32>
    %51 = vector.broadcast %50 : vector<1x256xf32> to vector<16x256xf32>
    %52 = arith.addf %49, %51 : vector<16x256xf32>
    %cst_36 = arith.constant 0.000000e+00 : f32
    %53 = vector.broadcast %cst_36 : f32 to vector<16x256xf32>
    %54 = arith.maximumf %52, %53 : vector<16x256xf32>
    %55 = arith.truncf %54 : vector<16x256xf32> to vector<16x256xbf16>
    %c0_37 = arith.constant 0 : index
    %c0_38 = arith.constant 0 : index
    %56 = vector.load %arg15[%c0_37, %c0_38] : memref<256x784xbf16, #tpu.memory_space<vmem>>, vector<256x784xbf16>
    %cst_39 = arith.constant dense<0.000000e+00> : vector<16x784xf32>
    %57 = tpu.matmul %55, %56, %cst_39 {dimension_numbers = #tpu.dot_dimension_numbers<[1], [0], [0], [1], [0, 0, 1, 1], [], []>} : vector<16x256xbf16>, vector<256x784xbf16>, vector<16x784xf32> -> vector<16x784xf32>
    %c0_40 = arith.constant 0 : index
    %c0_41 = arith.constant 0 : index
    %58 = vector.load %arg16[%c0_40, %c0_41] : memref<1x784xf32, #tpu.memory_space<vmem>>, vector<1x784xf32>
    %59 = vector.broadcast %58 : vector<1x784xf32> to vector<16x784xf32>
    %60 = arith.addf %57, %59 : vector<16x784xf32>
    %cst_42 = arith.constant 0.000000e+00 : f32
    %61 = vector.broadcast %cst_42 : f32 to vector<16x784xf32>
    %62 = arith.subf %61, %60 : vector<16x784xf32>
    %63 = math.exp %62 : vector<16x784xf32>
    %cst_43 = arith.constant 1.000000e+00 : f32
    %64 = vector.broadcast %cst_43 : f32 to vector<16x784xf32>
    %65 = arith.addf %64, %63 : vector<16x784xf32>
    %66 = tpu.reciprocal %65 {approx = true} : vector<16x784xf32> -> vector<16x784xf32>
    %c0_44 = arith.constant 0 : index
    %c0_45 = arith.constant 0 : index
    %67 = vector.load %arg17[%c0_44, %c0_45] : memref<16x784xf32, #tpu.memory_space<vmem>>, vector<16x784xf32>
    tpu.vector_store %arg17[%c0_44, %c0_45], %66 {strides = array<i32>} : memref<16x784xf32, #tpu.memory_space<vmem>>, vector<16x784xf32>,
    %c0_46 = arith.constant 0 : index
    %c0_47 = arith.constant 0 : index
    %68 = vector.load %arg18[%c0_46, %c0_47] : memref<16x32xf32, #tpu.memory_space<vmem>>, vector<16x32xf32>
    tpu.vector_store %arg18[%c0_46, %c0_47], %29 {strides = array<i32>} : memref<16x32xf32, #tpu.memory_space<vmem>>, vector<16x32xf32>,
    return
  }
  func.func @transform_0(%arg0: i32) -> (i32, i32) {
    %c0_i32 = arith.constant 0 : i32
    %c0_i32_0 = arith.constant 0 : i32
    return %arg0, %c0_i32 : i32, i32
  }
  func.func @transform_1(%arg0: i32) -> (i32, i32) {
    %c0_i32 = arith.constant 0 : i32
    %c0_i32_0 = arith.constant 0 : i32
    return %arg0, %c0_i32 : i32, i32
  }
  func.func @transform_2(%arg0: i32) -> (i32, i32) {
    %c0_i32 = arith.constant 0 : i32
    %c0_i32_0 = arith.constant 0 : i32
    return %arg0, %c0_i32 : i32, i32
  }
  func.func @transform_3(%arg0: i32) -> (i32, i32) {
    %c0_i32 = arith.constant 0 : i32
    %c0_i32_0 = arith.constant 0 : i32
    %c0_i32_1 = arith.constant 0 : i32
    return %c0_i32, %c0_i32_0 : i32, i32
  }
  func.func @transform_4(%arg0: i32) -> (i32, i32) {
    %c0_i32 = arith.constant 0 : i32
    %c0_i32_0 = arith.constant 0 : i32
    %c0_i32_1 = arith.constant 0 : i32
    return %c0_i32, %c0_i32_0 : i32, i32
  }
  func.func @transform_5(%arg0: i32) -> (i32, i32) {
    %c0_i32 = arith.constant 0 : i32
    %c0_i32_0 = arith.constant 0 : i32
    %c0_i32_1 = arith.constant 0 : i32
    return %c0_i32, %c0_i32_0 : i32, i32
  }
  func.func @transform_6(%arg0: i32) -> (i32, i32) {
    %c0_i32 = arith.constant 0 : i32
    %c0_i32_0 = arith.constant 0 : i32
    %c0_i32_1 = arith.constant 0 : i32
    return %c0_i32, %c0_i32_0 : i32, i32
  }
  func.func @transform_7(%arg0: i32) -> (i32, i32) {
    %c0_i32 = arith.constant 0 : i32
    %c0_i32_0 = arith.constant 0 : i32
    %c0_i32_1 = arith.constant 0 : i32
    return %c0_i32, %c0_i32_0 : i32, i32
  }
  func.func @transform_8(%arg0: i32) -> (i32, i32) {
    %c0_i32 = arith.constant 0 : i32
    %c0_i32_0 = arith.constant 0 : i32
    %c0_i32_1 = arith.constant 0 : i32
    return %c0_i32, %c0_i32_0 : i32, i32
  }
  func.func @transform_9(%arg0: i32) -> (i32, i32) {
    %c0_i32 = arith.constant 0 : i32
    %c0_i32_0 = arith.constant 0 : i32
    %c0_i32_1 = arith.constant 0 : i32
    return %c0_i32, %c0_i32_0 : i32, i32
  }
  func.func @transform_10(%arg0: i32) -> (i32, i32) {
    %c0_i32 = arith.constant 0 : i32
    %c0_i32_0 = arith.constant 0 : i32
    %c0_i32_1 = arith.constant 0 : i32
    return %c0_i32, %c0_i32_0 : i32, i32
  }
  func.func @transform_11(%arg0: i32) -> (i32, i32) {
    %c0_i32 = arith.constant 0 : i32
    %c0_i32_0 = arith.constant 0 : i32
    %c0_i32_1 = arith.constant 0 : i32
    return %c0_i32, %c0_i32_0 : i32, i32
  }
  func.func @transform_12(%arg0: i32) -> (i32, i32) {
    %c0_i32 = arith.constant 0 : i32
    %c0_i32_0 = arith.constant 0 : i32
    %c0_i32_1 = arith.constant 0 : i32
    return %c0_i32, %c0_i32_0 : i32, i32
  }
  func.func @transform_13(%arg0: i32) -> (i32, i32) {
    %c0_i32 = arith.constant 0 : i32
    %c0_i32_0 = arith.constant 0 : i32
    %c0_i32_1 = arith.constant 0 : i32
    return %c0_i32, %c0_i32_0 : i32, i32
  }
  func.func @transform_14(%arg0: i32) -> (i32, i32) {
    %c0_i32 = arith.constant 0 : i32
    %c0_i32_0 = arith.constant 0 : i32
    %c0_i32_1 = arith.constant 0 : i32
    return %c0_i32, %c0_i32_0 : i32, i32
  }
  func.func @transform_15(%arg0: i32) -> (i32, i32) {
    %c0_i32 = arith.constant 0 : i32
    %c0_i32_0 = arith.constant 0 : i32
    %c0_i32_1 = arith.constant 0 : i32
    return %c0_i32, %c0_i32_0 : i32, i32
  }
  func.func @transform_16(%arg0: i32) -> (i32, i32) {
    %c0_i32 = arith.constant 0 : i32
    %c0_i32_0 = arith.constant 0 : i32
    return %arg0, %c0_i32 : i32, i32
  }
  func.func @transform_17(%arg0: i32) -> (i32, i32) {
    %c0_i32 = arith.constant 0 : i32
    %c0_i32_0 = arith.constant 0 : i32
    return %arg0, %c0_i32 : i32, i32
  }
}

</mosaic_0001>

<bundles_post_ra>
// kernel: tpu_custom_call.1
= control target key start
LH: loop header
LB: loop body
LE: loop exit
PB: predicated region body
PF: predicated region fallthrough
CT: control target
= control target key end

     0   :  { %s4427_s0 = inlined_call_operand.vmem [shape: f32[16,784], index: 0, kind: input, shape index: {}]   ;;  %s4428_s1 = inlined_call_operand.vmem [shape: f32[16,10], index: 1, kind: input, shape index: {}]   ;;  %s4429_s2 = inlined_call_operand.vmem [shape: f32[16,16], index: 2, kind: input, shape index: {}]   ;;  %s4430_s3 = inlined_call_operand.vmem [shape: bf16[784,256], index: 3, kind: input, shape index: {}]   ;;  %s4431_s4 = inlined_call_operand.vmem [shape: bf16[10,384], index: 4, kind: input, shape index: {}]   ;;  %s4432_s5 = inlined_call_operand.vmem [shape: f32[1,256], index: 5, kind: input, shape index: {}]   ;;  %s4433_s6 = inlined_call_operand.vmem [shape: bf16[256,128], index: 6, kind: input, shape index: {}]   ;;  %s4434_s7 = inlined_call_operand.vmem [shape: f32[1,128], index: 7, kind: input, shape index: {}]   ;;  %s4435_s8 = inlined_call_operand.vmem [shape: bf16[128,32], index: 8, kind: input, shape index: {}]   ;;  %s4436_s9 = inlined_call_operand.vmem [shape: f32[1,32], index: 9, kind: input, shape index: {}]   ;;  %s4437_s10 = inlined_call_operand.vmem [shape: bf16[16,128], index: 10, kind: input, shape index: {}]   ;;  %s4438_s11 = inlined_call_operand.vmem [shape: f32[1,128], index: 11, kind: input, shape index: {}]   ;;  %s4439_s12 = inlined_call_operand.vmem [shape: bf16[128,256], index: 12, kind: input, shape index: {}]   ;;  %s4440_s13 = inlined_call_operand.vmem [shape: f32[1,256], index: 13, kind: input, shape index: {}]   ;;  %s4441_s14 = inlined_call_operand.vmem [shape: bf16[256,784], index: 14, kind: input, shape index: {}]   ;;  %s4442_s15 = inlined_call_operand.vmem [shape: f32[1,784], index: 15, kind: input, shape index: {}]   ;;  %s4443_s16 = inlined_call_operand.hbm [shape: f32[16,784], index: 16, kind: output, shape index: {0}]   ;;  %s4444_s17 = inlined_call_operand.hbm [shape: f32[16,32], index: 17, kind: output, shape index: {1}]  }
   0x1   :  { %4447 = sst [smem:[#allocation8_spill]] %s4427_s0 }
   0x2   :  { %4448 = sst [smem:[#allocation9_spill]] %s4428_s1 }
   0x3   :  { %23 = vsyncpa [#allocation3], 0  ;;  %v2923_v0 = vld [vmem:[%s4431_s4 + $0x4] ss:$12 sps:$4 sm:$0x1f]   ;;  %vm105_vm0 = vcmask 1044480  }
   0x4   :  { %v2925_v1 = vld [vmem:[%s4431_s4] ss:$12 sps:$4 sm:$0x1f]   ;;  %2549 = vmatprep.subr.msk.bf16.mxu0 %vm105_vm0, %v2923_v0  ;;  %v3391_v2 = vmov 0   ;;  %s4449_s18 = sld [smem:[#allocation9_spill]]  ;;  %vm101_vm1 = vcmask 80896  }
   0x5   :  { %147 = vmatprep.mubr.bf16.mxu0 %v3391_v2  ;;  %v2928_v3 = vld [vmem:[%s4430_s3 + $0x4] ss:$8 sps:$4 sm:$0xff]   ;;  %v107_v4 = vsel %vm105_vm0, %v2925_v1, 0  ;;  %v2926_v7 = vld [vmem:[%s4430_s3] ss:$8 sps:$4 sm:$0xff]   ;;  %s4450_s29 = sld [smem:[#allocation8_spill]] }
   0x6   :  { %116 = vmatpush1.bf16.msra.mxu0 %v107_v4  ;;  %v2931_v9 = vld [vmem:[%s4430_s3 + $0x14] ss:$8 sps:$4 sm:$0xff]   ;;  %v2929_v10 = vld [vmem:[%s4430_s3 + $0x10] ss:$8 sps:$4 sm:$0xff]   ;;  %v2934_v11 = vld [vmem:[%s4430_s3 + $0x24] ss:$8 sps:$4 sm:$0xff]  }
   0x7   :  { %791 = vmatprep.subr.bf16.mxu0 %v2928_v3  ;;  %v2932_v12 = vld [vmem:[%s4430_s3 + $0x20] ss:$8 sps:$4 sm:$0xff]   ;;  %v2937_v13 = vld [vmem:[%s4430_s3 + $0x34] ss:$8 sps:$4 sm:$0xff]   ;;  %v2935_v14 = vld [vmem:[%s4430_s3 + $0x30] ss:$8 sps:$4 sm:$0xff]  }
   0x8   :  { %v2940_v15 = vld [vmem:[%s4430_s3 + $0x44] ss:$8 sps:$4 sm:$0xff]   ;;  %v2938_v16 = vld [vmem:[%s4430_s3 + $0x40] ss:$8 sps:$4 sm:$0xff]   ;;  %v2943_v17 = vld [vmem:[%s4430_s3 + $0x54] ss:$8 sps:$4 sm:$0xff]  }
   0x9   :  { %v2941_v18 = vld [vmem:[%s4430_s3 + $0x50] ss:$8 sps:$4 sm:$0xff]   ;;  %v2946_v21 = vld [vmem:[%s4430_s3 + $0x64] ss:$8 sps:$4 sm:$0xff]   ;;  %v2944_v23 = vld [vmem:[%s4430_s3 + $0x60] ss:$8 sps:$4 sm:$0xff]  }
   0xa   :  { %v79_v5 = vld [vmem:[%s4449_s18] sm:$0xff]  ;;  %v80_v6 = vld [vmem:[%s4449_s18 + $0x8] sm:$0xff]  ;;  %v2949_v24 = vld [vmem:[%s4430_s3 + $0x74] ss:$8 sps:$4 sm:$0xff]   ;;  %v3392_v60 = vmov 0.0   ;;  %vm3393_vm2 = vmmov 0  }
   0xb   :  { %v3512_v8 = vpack.c.bf16 %v80_v6, %v79_v5  ;;  %v59_v19 = vld [vmem:[%s4450_s29 + $0x8] sm:$0xff]  ;;  %v66_v20 = vld [vmem:[%s4450_s29 + $0x40] sm:$0xff]  ;;  %v2947_v25 = vld [vmem:[%s4430_s3 + $0x70] ss:$8 sps:$4 sm:$0xff]   ;;  %2865 = vmatprep.subr.bf16.mxu1 %v3392_v60  ;;  %2867 = vmatprep.mubr.msk.bf16.mxu1 %vm3393_vm2, %v3392_v60 }
   0xc   :  { %v73_v22 = vpack.c.bf16 %v66_v20, %v59_v19  ;;  %v2952_v26 = vld [vmem:[%s4430_s3 + $0x84] ss:$8 sps:$4 sm:$0xff]   ;;  %v2950_v27 = vld [vmem:[%s4430_s3 + $0x80] ss:$8 sps:$4 sm:$0xff]   ;;  %v2955_v28 = vld [vmem:[%s4430_s3 + $0x94] ss:$8 sps:$4 sm:$0xff]  }
   0xd   :  { %2550 = vmatmul.mubr.msk.bf16.vlgmr.msra.gmra.mrb[0].mxu0 %vm101_vm1, %v3512_v8  ;;  %v2953_v29 = vld [vmem:[%s4430_s3 + $0x90] ss:$8 sps:$4 sm:$0xff]   ;;  %v2958_v30 = vld [vmem:[%s4430_s3 + $0xa4] ss:$8 sps:$4 sm:$0xff]   ;;  %v2956_v31 = vld [vmem:[%s4430_s3 + $0xa0] ss:$8 sps:$4 sm:$0xff]  }
   0xe   :  { %792 = vmatpush1.bf16.msra.mxu0 %v2926_v7  ;;  %823 = vmatprep.mubr.bf16.mxu0 %v73_v22  ;;  %v2961_v32 = vld [vmem:[%s4430_s3 + $0xb4] ss:$8 sps:$4 sm:$0xff]   ;;  %v2959_v33 = vld [vmem:[%s4430_s3 + $0xb0] ss:$8 sps:$4 sm:$0xff]   ;;  %v2964_v34 = vld [vmem:[%s4430_s3 + $0xc4] ss:$8 sps:$4 sm:$0xff]  }
   0xf   :  { %793 = vmatprep.subr.bf16.mxu0 %v2931_v9  ;;  %v2962_v35 = vld [vmem:[%s4430_s3 + $0xc0] ss:$8 sps:$4 sm:$0xff]   ;;  %v2967_v36 = vld [vmem:[%s4430_s3 + $0xd4] ss:$8 sps:$4 sm:$0xff]   ;;  %v2965_v37 = vld [vmem:[%s4430_s3 + $0xd0] ss:$8 sps:$4 sm:$0xff]  }
  0x10   :  { %v2970_v38 = vld [vmem:[%s4430_s3 + $0xe4] ss:$8 sps:$4 sm:$0xff]   ;;  %v2968_v39 = vld [vmem:[%s4430_s3 + $0xe0] ss:$8 sps:$4 sm:$0xff]   ;;  %v2973_v40 = vld [vmem:[%s4430_s3 + $0xf4] ss:$8 sps:$4 sm:$0xff]  }
  0x11   :  { %v2971_v41 = vld [vmem:[%s4430_s3 + $0xf0] ss:$8 sps:$4 sm:$0xff]   ;;  %v2976_v42 = vld [vmem:[%s4430_s3 + $0x104] ss:$8 sps:$4 sm:$0xff]   ;;  %v2974_v48 = vld [vmem:[%s4430_s3 + $0x100] ss:$8 sps:$4 sm:$0xff]  }
  0x12   :  { %794 = vmatpush1.bf16.msra.mxu0 %v2929_v10  ;;  %v58_v43 = vld [vmem:[%s4450_s29] sm:$0xff]  ;;  %v65_v44 = vld [vmem:[%s4450_s29 + $0x38] sm:$0xff]  ;;  %v68_v46 = vld [vmem:[%s4450_s29 + $0x50] sm:$0xff] }
  0x13   :  { %795 = vmatprep.subr.bf16.mxu0 %v2934_v11  ;;  %v61_v45 = vld [vmem:[%s4450_s29 + $0x18] sm:$0xff]  ;;  %v72_v47 = vpack.c.bf16 %v65_v44, %v58_v43  ;;  %v2982_v52 = vld [vmem:[%s4430_s3 + $0x124] ss:$8 sps:$4 sm:$0xff]   ;;  %v2980_v53 = vld [vmem:[%s4430_s3 + $0x120] ss:$8 sps:$4 sm:$0xff]  }
  0x14   :  { %v75_v49 = vpack.c.bf16 %v68_v46, %v61_v45  ;;  %v2979_v50 = vld [vmem:[%s4430_s3 + $0x114] ss:$8 sps:$4 sm:$0xff]   ;;  %v2977_v51 = vld [vmem:[%s4430_s3 + $0x110] ss:$8 sps:$4 sm:$0xff]   ;;  %v2988_v56 = vld [vmem:[%s4430_s3 + $0x144] ss:$8 sps:$4 sm:$0xff]  }
  0x15   :  { %v2985_v54 = vld [vmem:[%s4430_s3 + $0x134] ss:$8 sps:$4 sm:$0xff]   ;;  %v2983_v55 = vld [vmem:[%s4430_s3 + $0x130] ss:$8 sps:$4 sm:$0xff]   ;;  %v3074_v58 = vld [vmem:[%s4433_s6 + $0x40] sm:$0xff]  }
  0x16   :  { %796 = vmatpush1.bf16.msra.mxu0 %v2932_v12  ;;  %v3073_v57 = vld [vmem:[%s4431_s4 + $0x8] ss:$12 sps:$4 sm:$0x1f]   ;;  %v2989_v63 = vld [vmem:[%s4430_s3 + $0x150] ss:$8 sps:$4 sm:$0xff]   ;;  %v3075_v0 = vld [vmem:[%s4433_s6] sm:$0xff]  }
  0x17   :  { %797 = vmatprep.subr.bf16.mxu0 %v2937_v13  ;;  %v2986_v59 = vld [vmem:[%s4430_s3 + $0x140] ss:$8 sps:$4 sm:$0xff]   ;;  %v2991_v61 = vld [vmem:[%s4430_s3 + $0x154] ss:$8 sps:$4 sm:$0xff]   ;;  %v113_v62 = vsel %vm105_vm0, %v3073_v57, 0 }
  0x18   :  { %2866 = vmatpush3.bf16.msra.mxu1 %v113_v62  ;;  %v2994_v1 = vld [vmem:[%s4430_s3 + $0x164] ss:$8 sps:$4 sm:$0xff]   ;;  %v3078_v5 = vld [vmem:[%s4433_s6 + $0x50] sm:$0xff]   ;;  %v2992_v6 = vld [vmem:[%s4430_s3 + $0x160] ss:$8 sps:$4 sm:$0xff]  }
  0x19   :  { %2810 = vmatprep.subr.bf16.mxu1 %v3074_v58  ;;  %v3076_v3 = vld [vmem:[%s4433_s6 + $0x48] sm:$0xff]   ;;  %v2997_v7 = vld [vmem:[%s4430_s3 + $0x174] ss:$8 sps:$4 sm:$0xff]   ;;  %v2995_v10 = vld [vmem:[%s4430_s3 + $0x170] ss:$8 sps:$4 sm:$0xff]  }
  0x1a   :  { %798 = vmatpush1.bf16.msra.mxu0 %v2935_v14  ;;  %v3077_v4 = vld [vmem:[%s4433_s6 + $0x8] sm:$0xff]   ;;  %v3079_v9 = vld [vmem:[%s4433_s6 + $0x10] sm:$0xff]   ;;  %v3081_v12 = vld [vmem:[%s4433_s6 + $0x18] sm:$0xff]  }
  0x1b   :  { %799 = vmatprep.subr.bf16.mxu0 %v2940_v15  ;;  %2868 = vmatmul.mubr.msk.bf16.vlgmr.msra.gmra.mrb[0].mxu1 %vm101_vm1, %v3512_v8  ;;  %v3080_v8 = vld [vmem:[%s4433_s6 + $0x58] sm:$0xff]   ;;  %v3000_v11 = vld [vmem:[%s4430_s3 + $0x184] ss:$8 sps:$4 sm:$0xff]   ;;  %v2998_v14 = vld [vmem:[%s4430_s3 + $0x180] ss:$8 sps:$4 sm:$0xff]  }
  0x1c   :  { %2811 = vmatpush3.bf16.msra.mxu1 %v3075_v0  ;;  %v3082_v13 = vld [vmem:[%s4433_s6 + $0x60] sm:$0xff]   ;;  %v3003_v15 = vld [vmem:[%s4430_s3 + $0x194] ss:$8 sps:$4 sm:$0xff]   ;;  %v3007_v22 = vld [vmem:[%s4430_s3 + $0x1b0] ss:$8 sps:$4 sm:$0xff]  }
  0x1d   :  { %2812 = vmatprep.subr.bf16.mxu1 %v3076_v3  ;;  %v3006_v19 = vld [vmem:[%s4430_s3 + $0x1a4] ss:$8 sps:$4 sm:$0xff]   ;;  %v3004_v20 = vld [vmem:[%s4430_s3 + $0x1a0] ss:$8 sps:$4 sm:$0xff]   ;;  %v3033_v43 = vld [vmem:[%s4430_s3 + $0x234] ss:$8 sps:$4 sm:$0xff]  }
  0x1e   :  { %800 = vmatpush1.bf16.msra.mxu0 %v2938_v16  ;;  %v3083_v16 = vld [vmem:[%s4433_s6 + $0x20] sm:$0xff]  }
  0x1f   :  { %801 = vmatprep.subr.bf16.mxu0 %v2943_v17  ;;  %v3084_v17 = vld [vmem:[%s4433_s6 + $0x68] sm:$0xff]  }
  0x20   :  { %2813 = vmatpush3.bf16.msra.mxu1 %v3077_v4 }
  0x21   :  { %2814 = vmatprep.subr.bf16.mxu1 %v3078_v5 }
  0x22   :  { %802 = vmatpush1.bf16.msra.mxu0 %v2941_v18  ;;  %v3001_v18 = vld [vmem:[%s4430_s3 + $0x190] ss:$8 sps:$4 sm:$0xff]  }
  0x23   :  { %803 = vmatprep.subr.bf16.mxu0 %v2946_v21  ;;  %v3009_v21 = vld [vmem:[%s4430_s3 + $0x1b4] ss:$8 sps:$4 sm:$0xff]  }
  0x24   :  { %2815 = vmatpush3.bf16.msra.mxu1 %v3079_v9 }
  0x25   :  { %2816 = vmatprep.subr.bf16.mxu1 %v3080_v8 }
  0x26   :  { %804 = vmatpush1.bf16.msra.mxu0 %v2944_v23  ;;  %v3012_v23 = vld [vmem:[%s4430_s3 + $0x1c4] ss:$8 sps:$4 sm:$0xff]  }
  0x27   :  { %805 = vmatprep.subr.bf16.mxu0 %v2949_v24  ;;  %v3010_v24 = vld [vmem:[%s4430_s3 + $0x1c0] ss:$8 sps:$4 sm:$0xff]  }
  0x28   :  { %2817 = vmatpush3.bf16.msra.mxu1 %v3081_v12 }
  0x29   :  { %2818 = vmatprep.subr.bf16.mxu1 %v3082_v13 }
  0x2a   :  { %806 = vmatpush1.bf16.msra.mxu0 %v2947_v25  ;;  %v3015_v25 = vld [vmem:[%s4430_s3 + $0x1d4] ss:$8 sps:$4 sm:$0xff]  }
  0x2b   :  { %807 = vmatprep.subr.bf16.mxu0 %v2952_v26  ;;  %v3013_v26 = vld [vmem:[%s4430_s3 + $0x1d0] ss:$8 sps:$4 sm:$0xff]  }
  0x2c   :  { %2819 = vmatpush3.bf16.msra.mxu1 %v3083_v16 }
  0x2d   :  { %2820 = vmatprep.subr.bf16.mxu1 %v3084_v17 }
  0x2e   :  { %808 = vmatpush1.bf16.msra.mxu0 %v2950_v27  ;;  %v3018_v27 = vld [vmem:[%s4430_s3 + $0x1e4] ss:$8 sps:$4 sm:$0xff]  }
  0x2f   :  { %809 = vmatprep.subr.bf16.mxu0 %v2955_v28  ;;  %v3016_v28 = vld [vmem:[%s4430_s3 + $0x1e0] ss:$8 sps:$4 sm:$0xff]  }
  0x32   :  { %810 = vmatpush1.bf16.msra.mxu0 %v2953_v29  ;;  %v3021_v29 = vld [vmem:[%s4430_s3 + $0x1f4] ss:$8 sps:$4 sm:$0xff]  }
  0x33   :  { %811 = vmatprep.subr.bf16.mxu0 %v2958_v30  ;;  %v3019_v30 = vld [vmem:[%s4430_s3 + $0x1f0] ss:$8 sps:$4 sm:$0xff]  }
  0x36   :  { %812 = vmatpush1.bf16.msra.mxu0 %v2956_v31  ;;  %v60_v31 = vld [vmem:[%s4450_s29 + $0x10] sm:$0xff] }
  0x37   :  { %813 = vmatprep.subr.bf16.mxu0 %v2961_v32  ;;  %v67_v32 = vld [vmem:[%s4450_s29 + $0x48] sm:$0xff] }
  0x3a   :  { %814 = vmatpush1.bf16.msra.mxu0 %v2959_v33  ;;  %v3024_v33 = vld [vmem:[%s4430_s3 + $0x204] ss:$8 sps:$4 sm:$0xff]  }
  0x3b   :  { %815 = vmatprep.subr.bf16.mxu0 %v2964_v34  ;;  %v63_v34 = vld [vmem:[%s4450_s29 + $0x28] sm:$0xff] }
  0x3e   :  { %816 = vmatpush1.bf16.msra.mxu0 %v2962_v35  ;;  %v70_v35 = vld [vmem:[%s4450_s29 + $0x60] sm:$0xff] }
  0x3f   :  { %817 = vmatprep.subr.bf16.mxu0 %v2967_v36  ;;  %v3022_v36 = vld [vmem:[%s4430_s3 + $0x200] ss:$8 sps:$4 sm:$0xff]  }
  0x42   :  { %818 = vmatpush1.bf16.msra.mxu0 %v2965_v37  ;;  %v74_v37 = vpack.c.bf16 %v67_v32, %v60_v31 }
  0x43   :  { %819 = vmatprep.subr.bf16.mxu0 %v2970_v38  ;;  %v3027_v38 = vld [vmem:[%s4430_s3 + $0x214] ss:$8 sps:$4 sm:$0xff]  }
  0x46   :  { %820 = vmatpush1.bf16.msra.mxu0 %v2968_v39  ;;  %v77_v39 = vpack.c.bf16 %v70_v35, %v63_v34 }
  0x47   :  { %821 = vmatprep.subr.bf16.mxu0 %v2973_v40  ;;  %v3025_v40 = vld [vmem:[%s4430_s3 + $0x210] ss:$8 sps:$4 sm:$0xff]  }
  0x4a   :  { %822 = vmatpush1.bf16.msra.mxu0 %v2971_v41  ;;  %v3030_v41 = vld [vmem:[%s4430_s3 + $0x224] ss:$8 sps:$4 sm:$0xff]  }
  0x4b   :  { %834 = vmatprep.subr.bf16.mxu0 %v2976_v42  ;;  %v3028_v42 = vld [vmem:[%s4430_s3 + $0x220] ss:$8 sps:$4 sm:$0xff]  }
  0x4d   :  { %824 = vmatmul.mubr.bf16.vlgmr.msra.gmra.mrb[0].mxu0 %v72_v47 }
  0x4e   :  { %835 = vmatpush1.bf16.msra.mxu0 %v2974_v48  ;;  %866 = vmatprep.mubr.bf16.mxu0 %v75_v49 }
  0x4f   :  { %836 = vmatprep.subr.bf16.mxu0 %v2979_v50 }
  0x52   :  { %837 = vmatpush1.bf16.msra.mxu0 %v2977_v51 }
  0x53   :  { %838 = vmatprep.subr.bf16.mxu0 %v2982_v52 }
  0x56   :  { %839 = vmatpush1.bf16.msra.mxu0 %v2980_v53 }
  0x57   :  { %840 = vmatprep.subr.bf16.mxu0 %v2985_v54 }
  0x5a   :  { %841 = vmatpush1.bf16.msra.mxu0 %v2983_v55 }
  0x5b   :  { %842 = vmatprep.subr.bf16.mxu0 %v2988_v56 }
  0x5e   :  { %843 = vmatpush1.bf16.msra.mxu0 %v2986_v59 }
  0x5f   :  { %844 = vmatprep.subr.bf16.mxu0 %v2991_v61 }
  0x62   :  { %845 = vmatpush1.bf16.msra.mxu0 %v2989_v63 }
  0x63   :  { %846 = vmatprep.subr.bf16.mxu0 %v2994_v1 }
  0x66   :  { %847 = vmatpush1.bf16.msra.mxu0 %v2992_v6 }
  0x67   :  { %848 = vmatprep.subr.bf16.mxu0 %v2997_v7 }
  0x6a   :  { %849 = vmatpush1.bf16.msra.mxu0 %v2995_v10 }
  0x6b   :  { %850 = vmatprep.subr.bf16.mxu0 %v3000_v11 }
  0x6e   :  { %851 = vmatpush1.bf16.msra.mxu0 %v2998_v14 }
  0x6f   :  { %852 = vmatprep.subr.bf16.mxu0 %v3003_v15 }
  0x72   :  { %853 = vmatpush1.bf16.msra.mxu0 %v3001_v18 }
  0x73   :  { %854 = vmatprep.subr.bf16.mxu0 %v3006_v19 }
  0x76   :  { %855 = vmatpush1.bf16.msra.mxu0 %v3004_v20 }
  0x77   :  { %856 = vmatprep.subr.bf16.mxu0 %v3009_v21 }
  0x7a   :  { %857 = vmatpush1.bf16.msra.mxu0 %v3007_v22 }
  0x7b   :  { %858 = vmatprep.subr.bf16.mxu0 %v3012_v23 }
  0x7e   :  { %859 = vmatpush1.bf16.msra.mxu0 %v3010_v24 }
  0x7f   :  { %860 = vmatprep.subr.bf16.mxu0 %v3015_v25 }
  0x82   :  { %861 = vmatpush1.bf16.msra.mxu0 %v3013_v26 }
  0x83   :  { %862 = vmatprep.subr.bf16.mxu0 %v3018_v27 }
  0x86   :  { %863 = vmatpush1.bf16.msra.mxu0 %v3016_v28 }
  0x87   :  { %864 = vmatprep.subr.bf16.mxu0 %v3021_v29 }
  0x8a   :  { %865 = vmatpush1.bf16.msra.mxu0 %v3019_v30 }
  0x8b   :  { %877 = vmatprep.subr.bf16.mxu0 %v3024_v33 }
  0x8d   :  { %867 = vmatmul.mubr.bf16.vlgmr.msra.gmra.mrb[0].mxu0 %v74_v37 }
  0x8e   :  { %878 = vmatpush1.bf16.msra.mxu0 %v3022_v36  ;;  %909 = vmatprep.mubr.bf16.mxu0 %v77_v39 }
  0x8f   :  { %879 = vmatprep.subr.bf16.mxu0 %v3027_v38 }
  0x92   :  { %880 = vmatpush1.bf16.msra.mxu0 %v3025_v40 }
  0x93   :  { %881 = vmatprep.subr.bf16.mxu0 %v3030_v41 }
  0x94   :  { %24 = vsyncpa [#allocation5], 0  ;;  %v3031_v44 = vld [vmem:[%s4430_s3 + $0x230] ss:$8 sps:$4 sm:$0xff]   ;;  %v3036_v45 = vld [vmem:[%s4430_s3 + $0x244] ss:$8 sps:$4 sm:$0xff]   ;;  %v965_v24 = vlaneseq }
  0x95   :  { %v3034_v46 = vld [vmem:[%s4430_s3 + $0x240] ss:$8 sps:$4 sm:$0xff]   ;;  %v3039_v47 = vld [vmem:[%s4430_s3 + $0x254] ss:$8 sps:$4 sm:$0xff]   ;;  %v3037_v48 = vld [vmem:[%s4430_s3 + $0x250] ss:$8 sps:$4 sm:$0xff]  }
  0x96   :  { %882 = vmatpush1.bf16.msra.mxu0 %v3028_v42  ;;  %v3042_v49 = vld [vmem:[%s4430_s3 + $0x264] ss:$8 sps:$4 sm:$0xff]   ;;  %v3040_v50 = vld [vmem:[%s4430_s3 + $0x260] ss:$8 sps:$4 sm:$0xff]   ;;  %v3045_v51 = vld [vmem:[%s4430_s3 + $0x274] ss:$8 sps:$4 sm:$0xff]  }
  0x97   :  { %883 = vmatprep.subr.bf16.mxu0 %v3033_v43  ;;  %v3043_v52 = vld [vmem:[%s4430_s3 + $0x270] ss:$8 sps:$4 sm:$0xff]   ;;  %v3048_v53 = vld [vmem:[%s4430_s3 + $0x284] ss:$8 sps:$4 sm:$0xff]   ;;  %v3046_v54 = vld [vmem:[%s4430_s3 + $0x280] ss:$8 sps:$4 sm:$0xff]  }
  0x98   :  { %v3051_v55 = vld [vmem:[%s4430_s3 + $0x294] ss:$8 sps:$4 sm:$0xff]   ;;  %v3049_v56 = vld [vmem:[%s4430_s3 + $0x290] ss:$8 sps:$4 sm:$0xff]   ;;  %v3054_v57 = vld [vmem:[%s4430_s3 + $0x2a4] ss:$8 sps:$4 sm:$0xff]  }
  0x99   :  { %v3052_v58 = vld [vmem:[%s4430_s3 + $0x2a0] ss:$8 sps:$4 sm:$0xff]   ;;  %v3057_v59 = vld [vmem:[%s4430_s3 + $0x2b4] ss:$8 sps:$4 sm:$0xff]   ;;  %v3055_v61 = vld [vmem:[%s4430_s3 + $0x2b0] ss:$8 sps:$4 sm:$0xff]  }
  0x9a   :  { %884 = vmatpush1.bf16.msra.mxu0 %v3031_v44  ;;  %v3060_v62 = vld [vmem:[%s4430_s3 + $0x2c4] ss:$8 sps:$4 sm:$0xff]   ;;  %v3058_v63 = vld [vmem:[%s4430_s3 + $0x2c0] ss:$8 sps:$4 sm:$0xff]   ;;  %v3063_v0 = vld [vmem:[%s4430_s3 + $0x2d4] ss:$8 sps:$4 sm:$0xff]  }
  0x9b   :  { %885 = vmatprep.subr.bf16.mxu0 %v3036_v45  ;;  %v3061_v1 = vld [vmem:[%s4430_s3 + $0x2d0] ss:$8 sps:$4 sm:$0xff]   ;;  %v3066_v3 = vld [vmem:[%s4430_s3 + $0x2e4] ss:$8 sps:$4 sm:$0xff]   ;;  %v3064_v4 = vld [vmem:[%s4430_s3 + $0x2e0] ss:$8 sps:$4 sm:$0xff]  }
  0x9c   :  { %v3069_v5 = vld [vmem:[%s4430_s3 + $0x2f4] ss:$8 sps:$4 sm:$0xff]   ;;  %v3067_v6 = vld [vmem:[%s4430_s3 + $0x2f0] ss:$8 sps:$4 sm:$0xff]   ;;  %v62_v7 = vld [vmem:[%s4450_s29 + $0x20] sm:$0xff]  ;;  %vm787_vm3 = vcmask 130048  }
  0x9d   :  { %v69_v9 = vld [vmem:[%s4450_s29 + $0x58] sm:$0xff]  ;;  %v3072_v8 = vld [vmem:[%s4430_s3 + $0x304] ss:$8 sps:$4 sm:$0xff]   ;;  %v3070_v11 = vld [vmem:[%s4430_s3 + $0x300] ss:$8 sps:$4 sm:$0xff]   ;;  %v3910_v25 = vshrl.u32 %v965_v24, 7 }
  0x9e   :  { %886 = vmatpush1.bf16.msra.mxu0 %v3034_v46  ;;  %v76_v10 = vpack.c.bf16 %v69_v9, %v62_v7  ;;  %v64_v12 = vld [vmem:[%s4450_s29 + $0x30] sm:$0xff]  ;;  %v71_v13 = vld [vmem:[%s4450_s29 + $0x68] sm:$0xff]  ;;  %v3088_v18 = vld [vmem:[%s4433_s6 + $0x78] sm:$0xff]   ;;  %vm2511_vm4 = vcmask 261120   ;;  %s3394_s26 = smov 112  }
  0x9f   :  { %887 = vmatprep.subr.bf16.mxu0 %v3039_v47  ;;  %v78_v14 = vpack.c.bf16 %v71_v13, %v64_v12  ;;  %v3085_v15 = vld [vmem:[%s4433_s6 + $0x28] sm:$0xff]   ;;  %v3086_v16 = vld [vmem:[%s4433_s6 + $0x70] sm:$0xff]   ;;  %v3089_v19 = vld [vmem:[%s4433_s6 + $0x38] sm:$0xff]   ;;  %v3913_v26 = vsub.s32 0, %v3910_v25  ;;  %v3919_v28 = vsub.s32 1, %v3910_v25 }
  0xa0   :  { %2821 = vmatpush3.bf16.msra.mxu1 %v3085_v15  ;;  %v3087_v17 = vld [vmem:[%s4433_s6 + $0x30] sm:$0xff]   ;;  %v963_v27 = vld [vmem:[%s4432_s5] sm:$0x3]  ;;  %v3091_v46 = vld [vmem:[%s4435_s8 + $0x8] sm:$0xff]  }
  0xa1   :  { %2822 = vmatprep.subr.bf16.mxu1 %v3086_v16  ;;  %v968_v29 = vrot.slane %v963_v27, %v3913_v26  ;;  %v972_v30 = vrot.slane %v963_v27, %v3919_v28  ;;  %v3090_v45 = vld [vmem:[%s4435_s8] sm:$0xff]   ;;  %v3092_v47 = vld [vmem:[%s4435_s8 + $0x10] sm:$0xff]  }
  0xa2   :  { %888 = vmatpush1.bf16.msra.mxu0 %v3037_v48  ;;  %v3093_v48 = vld [vmem:[%s4435_s8 + $0x18] sm:$0xff]  }
  0xa3   :  { %889 = vmatprep.subr.bf16.mxu0 %v3042_v49  ;;  %v3094_v49 = vld [vmem:[%s4435_s8 + $0x20] sm:$0xff]  }
  0xa4   :  { %2823 = vmatpush3.bf16.msra.mxu1 %v3087_v17  ;;  %v82_v17 = vld [vmem:[%s4429_s2] sm:$0xff] }
  0xa5   :  { %2824 = vmatprep.subr.bf16.mxu1 %v3088_v18 }
  0xa6   :  { %890 = vmatpush1.bf16.msra.mxu0 %v3040_v50  ;;  %v3095_v50 = vld [vmem:[%s4435_s8 + $0x28] sm:$0xff]  }
  0xa7   :  { %891 = vmatprep.subr.bf16.mxu0 %v3045_v51  ;;  %v3096_v51 = vld [vmem:[%s4435_s8 + $0x30] sm:$0xff]  }
  0xa8   :  { %2825 = vmatpush3.bf16.msra.mxu1 %v3089_v19  ;;  %v83_v19 = vld [vmem:[%s4429_s2 + $0x8] sm:$0xff] }
  0xa9   :  { %2871 = vmatprep.subr.bf16.mxu1 %v3392_v60 }
  0xaa   :  { %892 = vmatpush1.bf16.msra.mxu0 %v3043_v52  ;;  %v3097_v52 = vld [vmem:[%s4435_s8 + $0x38] sm:$0xff]  }
  0xab   :  { %893 = vmatprep.subr.bf16.mxu0 %v3048_v53 }
  0xae   :  { %894 = vmatpush1.bf16.msra.mxu0 %v3046_v54  ;;  %v2651_v54 = vld [vmem:[%s4434_s7] ss:$0 sm:$0xff] }
  0xaf   :  { %895 = vmatprep.subr.bf16.mxu0 %v3051_v55 }
  0xb2   :  { %896 = vmatpush1.bf16.msra.mxu0 %v3049_v56 }
  0xb3   :  { %897 = vmatprep.subr.bf16.mxu0 %v3054_v57 }
  0xb6   :  { %898 = vmatpush1.bf16.msra.mxu0 %v3052_v58 }
  0xb7   :  { %899 = vmatprep.subr.bf16.mxu0 %v3057_v59 }
  0xba   :  { %900 = vmatpush1.bf16.msra.mxu0 %v3055_v61 }
  0xbb   :  { %901 = vmatprep.subr.bf16.mxu0 %v3060_v62 }
  0xbe   :  { %902 = vmatpush1.bf16.msra.mxu0 %v3058_v63 }
  0xbf   :  { %903 = vmatprep.subr.bf16.mxu0 %v3063_v0 }
  0xc2   :  { %904 = vmatpush1.bf16.msra.mxu0 %v3061_v1 }
  0xc3   :  { %905 = vmatprep.subr.bf16.mxu0 %v3066_v3  ;;  %v2668_v3 = vld [vmem:[%s4436_s9] ss:$0 sm:$0xff] }
  0xc6   :  { %906 = vmatpush1.bf16.msra.mxu0 %v3064_v4 }
  0xc7   :  { %907 = vmatprep.subr.bf16.mxu0 %v3069_v5 }
  0xca   :  { %908 = vmatpush1.bf16.msra.mxu0 %v3067_v6 }
  0xcb   :  { %920 = vmatprep.subr.bf16.mxu0 %v3072_v8 }
  0xcd   :  { %910 = vmatmul.mubr.bf16.vlgmr.msra.gmra.mrb[0].mxu0 %v76_v10 }
  0xce   :  { %921 = vmatpush1.bf16.msra.mxu0 %v3070_v11  ;;  %952 = vmatprep.mubr.bf16.mxu0 %v3391_v2 }
  0xd9   :  { %2650 = vmatmul.mubr.msk.bf16.vlgmr.msra.gmra.mrb[0].mxu0 %vm787_vm3, %v78_v14  ;;  %v3101_v14 = vld [vmem:[%s4439_s12 + $0x4] ss:$8 sps:$4 sm:$0xff]  }
  0xee   :  { %v3906_v20 = vpop.f32.mrb[0].mxu1 }
  0xef   :  { %v2869_v21 = vpop.f32.mrb[1].mxu1 }
  0xf0   :  { %v3908_v22 = vpop.f32.mrb[2].mxu1 }
  0xf1   :  { %v2870_v23 = vpop.f32.mrb[3].mxu1 }
 0x1ac   :  { %v954_v31 = vpop.f32.mrb[0].mxu0 }
 0x1ad   :  { %v975_v32 = vadd.f32 %v968_v29, %v954_v31  ;;  %v956_v33 = vpop.f32.mrb[1].mxu0 }
 0x1ae   :  { %v976_v34 = vadd.f32 %v972_v30, %v956_v33  ;;  %v958_v35 = vpop.f32.mrb[2].mxu0  ;;  %v3102_v33 = vld [vmem:[%s4439_s12 + $0x10] ss:$8 sps:$4 sm:$0xff]  }
 0x1af   :  { %v977_v36 = vadd.f32 %v968_v29, %v958_v35  ;;  %v960_v37 = vpop.f32.mrb[3].mxu0  ;;  %v979_v39 = vmax.f32 %v975_v32, 0.0  ;;  %v3104_v32 = vld [vmem:[%s4439_s12 + $0x14] ss:$8 sps:$4 sm:$0xff]   ;;  %v3105_v35 = vld [vmem:[%s4439_s12 + $0x20] ss:$8 sps:$4 sm:$0xff]  }
 0x1b0   :  { %v978_v38 = vadd.f32 %v972_v30, %v960_v37  ;;  %v980_v41 = vmax.f32 %v976_v34, 0.0  ;;  %v3099_v30 = vld [vmem:[%s4439_s12] ss:$8 sps:$4 sm:$0xff]   ;;  %v3107_v34 = vld [vmem:[%s4439_s12 + $0x24] ss:$8 sps:$4 sm:$0xff]  }
 0x1b1   :  { %v981_v40 = vmax.f32 %v977_v36, 0.0  ;;  %v3110_v36 = vld [vmem:[%s4439_s12 + $0x34] ss:$8 sps:$4 sm:$0xff]   ;;  %v3113_v37 = vld [vmem:[%s4439_s12 + $0x44] ss:$8 sps:$4 sm:$0xff]  }
 0x1b2   :  { %v982_v42 = vmax.f32 %v978_v38, 0.0  ;;  %v3111_v38 = vld [vmem:[%s4439_s12 + $0x40] ss:$8 sps:$4 sm:$0xff]  }
 0x1b3   :  { %v983_v43 = vpack.c.bf16 %v981_v40, %v979_v39  ;;  %v3116_v39 = vld [vmem:[%s4439_s12 + $0x54] ss:$8 sps:$4 sm:$0xff]   ;;  %v3114_v40 = vld [vmem:[%s4439_s12 + $0x50] ss:$8 sps:$4 sm:$0xff]  }
 0x1b4   :  { %v984_v44 = vpack.c.bf16 %v982_v42, %v980_v41  ;;  %v3119_v41 = vld [vmem:[%s4439_s12 + $0x64] ss:$8 sps:$4 sm:$0xff]   ;;  %v3117_v42 = vld [vmem:[%s4439_s12 + $0x60] ss:$8 sps:$4 sm:$0xff]  }
 0x1b6   :  { %1152 = vmatprep.mubr.bf16.mxu1 %v984_v44  ;;  %v3120_v44 = vld [vmem:[%s4439_s12 + $0x70] ss:$8 sps:$4 sm:$0xff]  }
 0x1b7   :  { %1153 = vmatmul.mubr.bf16.vlgmr.msra.gmra.mrb[4].mxu1 %v983_v43  ;;  %v3122_v43 = vld [vmem:[%s4439_s12 + $0x74] ss:$8 sps:$4 sm:$0xff]  }
 0x1b8   :  { %2872 = vmatpush3.bf16.msra.mxu1 %v3090_v45  ;;  %2887 = vmatprep.mubr.msk.bf16.mxu1 %vm3393_vm2, %v3392_v60  ;;  %v3125_v45 = vld [vmem:[%s4441_s14 + $0x4] ss:$28 sps:$4 sm:$0xff]  }
 0x1b9   :  { %2873 = vmatprep.subr.bf16.mxu1 %v3392_v60 }
 0x1bc   :  { %2874 = vmatpush3.bf16.msra.mxu1 %v3091_v46  ;;  %v3126_v46 = vld [vmem:[%s4441_s14 + $0x10] ss:$28 sps:$4 sm:$0xff]  }
 0x1bd   :  { %2875 = vmatprep.subr.bf16.mxu1 %v3392_v60 }
 0x1c0   :  { %2876 = vmatpush3.bf16.msra.mxu1 %v3092_v47  ;;  %v3128_v47 = vld [vmem:[%s4441_s14 + $0x14] ss:$28 sps:$4 sm:$0xff]  }
 0x1c1   :  { %2877 = vmatprep.subr.bf16.mxu1 %v3392_v60  ;;  %2343 = vmatprep.subr.bf16.mxu0 %v3128_v47  ;;  %v3189_v47 = vld [vmem:[%s4441_s14 + $0x268] ss:$28 sps:$4 sm:$0xff]  }
 0x1c2   :  { %2344 = vmatpush1.bf16.msra.mxu0 %v3126_v46  ;;  %v3191_v46 = vld [vmem:[%s4441_s14 + $0x26c] ss:$28 sps:$4 sm:$0xff]  }
 0x1c4   :  { %2878 = vmatpush3.bf16.msra.mxu1 %v3093_v48  ;;  %v3132_v48 = vld [vmem:[%s4441_s14 + $0x48] ss:$28 sps:$4 sm:$0xff]  }
 0x1c5   :  { %2879 = vmatprep.subr.bf16.mxu1 %v3392_v60 }
 0x1c8   :  { %2880 = vmatpush3.bf16.msra.mxu1 %v3094_v49  ;;  %v3134_v49 = vld [vmem:[%s4441_s14 + $0x4c] ss:$28 sps:$4 sm:$0xff]  }
 0x1c9   :  { %2881 = vmatprep.subr.bf16.mxu1 %v3392_v60  ;;  %2345 = vmatprep.subr.bf16.mxu0 %v3134_v49  ;;  %v3195_v49 = vld [vmem:[%s4441_s14 + $0x2a0] ss:$28 sps:$4 sm:$0xff]  }
 0x1ca   :  { %2346 = vmatpush1.bf16.msra.mxu0 %v3132_v48  ;;  %v3197_v48 = vld [vmem:[%s4441_s14 + $0x2a4] ss:$28 sps:$4 sm:$0xff]  }
 0x1cc   :  { %2882 = vmatpush3.bf16.msra.mxu1 %v3095_v50  ;;  %v3138_v50 = vld [vmem:[%s4441_s14 + $0x80] ss:$28 sps:$4 sm:$0xff]  }
 0x1cd   :  { %2883 = vmatprep.subr.bf16.mxu1 %v3392_v60 }
 0x1d0   :  { %2884 = vmatpush3.bf16.msra.mxu1 %v3096_v51  ;;  %v3140_v51 = vld [vmem:[%s4441_s14 + $0x84] ss:$28 sps:$4 sm:$0xff]  }
 0x1d1   :  { %2885 = vmatprep.subr.bf16.mxu1 %v3392_v60  ;;  %2347 = vmatprep.subr.bf16.mxu0 %v3140_v51  ;;  %v3201_v51 = vld [vmem:[%s4441_s14 + $0x2d8] ss:$28 sps:$4 sm:$0xff]  }
 0x1d2   :  { %2348 = vmatpush1.bf16.msra.mxu0 %v3138_v50  ;;  %v3203_v50 = vld [vmem:[%s4441_s14 + $0x2dc] ss:$28 sps:$4 sm:$0xff]  }
 0x1d4   :  { %2886 = vmatpush3.bf16.msra.mxu1 %v3097_v52  ;;  %v3144_v52 = vld [vmem:[%s4441_s14 + $0xb8] ss:$28 sps:$4 sm:$0xff]  }
 0x1d5   :  { %2891 = vmatprep.subr.bf16.mxu1 %v3392_v60 }
 0x28a   :  { %v2826_v53 = vpop.f32.mrb[4].mxu1 }
 0x28b   :  { %v2827_v55 = vpop.f32.mrb[5].mxu1 }
 0x28c   :  { %v2828_v56 = vadd.f32 %v2827_v55, %v2826_v53  ;;  %v2829_v57 = vpop.f32.mrb[6].mxu1  ;;  %v3146_v53 = vld [vmem:[%s4441_s14 + $0xbc] ss:$28 sps:$4 sm:$0xff]   ;;  %v3152_v55 = vld [vmem:[%s4441_s14 + $0xf4] ss:$28 sps:$4 sm:$0xff]  }
 0x28d   :  { %v2830_v58 = vpop.f32.mrb[7].mxu1  ;;  %2349 = vmatprep.subr.bf16.mxu0 %v3146_v53  ;;  %v3207_v53 = vld [vmem:[%s4441_s14 + $0x310] ss:$28 sps:$4 sm:$0xff]  }
 0x28e   :  { %v1155_v59 = vadd.f32 %v2828_v56, %v2651_v54  ;;  %v2831_v61 = vadd.f32 %v2830_v58, %v2829_v57  ;;  %2350 = vmatpush1.bf16.msra.mxu0 %v3144_v52  ;;  %v3156_v56 = vld [vmem:[%s4441_s14 + $0x128] ss:$28 sps:$4 sm:$0xff]   ;;  %v3162_v58 = vld [vmem:[%s4441_s14 + $0x160] ss:$28 sps:$4 sm:$0xff]   ;;  %v3209_v52 = vld [vmem:[%s4441_s14 + $0x314] ss:$28 sps:$4 sm:$0xff]  }
 0x28f   :  { %2351 = vmatprep.subr.bf16.mxu0 %v3152_v55  ;;  %v3158_v57 = vld [vmem:[%s4441_s14 + $0x12c] ss:$28 sps:$4 sm:$0xff]   ;;  %v3210_v55 = vld [vmem:[%s4441_s14 + $0x320] ss:$28 sps:$4 sm:$0xff]  }
 0x290   :  { %v1158_v62 = vadd.f32 %v2831_v61, %v2651_v54  ;;  %v1161_v63 = vmax.f32 %v1155_v59, 0.0  ;;  %v3150_v54 = vld [vmem:[%s4441_s14 + $0xf0] ss:$28 sps:$4 sm:$0xff]   ;;  %v3164_v59 = vld [vmem:[%s4441_s14 + $0x164] ss:$28 sps:$4 sm:$0xff]  }
 0x291   :  { %v3168_v61 = vld [vmem:[%s4441_s14 + $0x198] ss:$28 sps:$4 sm:$0xff]  }
 0x292   :  { %v1162_v0 = vmax.f32 %v1158_v62, 0.0  ;;  %2352 = vmatpush1.bf16.msra.mxu0 %v3150_v54  ;;  %v3170_v62 = vld [vmem:[%s4441_s14 + $0x19c] ss:$28 sps:$4 sm:$0xff]   ;;  %v3212_v54 = vld [vmem:[%s4441_s14 + $0x324] ss:$28 sps:$4 sm:$0xff]  }
 0x293   :  { %2353 = vmatprep.subr.bf16.mxu0 %v3158_v57  ;;  %v3213_v57 = vld [vmem:[%s4441_s14 + $0x348] ss:$28 sps:$4 sm:$0xff]  }
 0x294   :  { %v1163_v1 = vpack.c.bf16 %v1162_v0, %v1161_v63  ;;  %v3174_v63 = vld [vmem:[%s4441_s14 + $0x1d0] ss:$28 sps:$4 sm:$0xff]  }
 0x295   :  { %v3176_v0 = vld [vmem:[%s4441_s14 + $0x1d4] ss:$28 sps:$4 sm:$0xff]  }
 0x296   :  { %2888 = vmatmul.mubr.bf16.vlgmr.msra.gmra.mrb[8].mxu1 %v1163_v1  ;;  %2354 = vmatpush1.bf16.msra.mxu0 %v3156_v56  ;;  %v3180_v1 = vld [vmem:[%s4441_s14 + $0x208] ss:$28 sps:$4 sm:$0xff]  }
 0x297   :  { %2893 = vmatprep.mubr.msk.bf16.mxu1 %vm3393_vm2, %v3392_v60  ;;  %v3098_v60 = vld [vmem:[%s4437_s10] sm:$0xff]   ;;  %2355 = vmatprep.subr.bf16.mxu0 %v3164_v59  ;;  %v3215_v56 = vld [vmem:[%s4441_s14 + $0x34c] ss:$28 sps:$4 sm:$0xff]   ;;  %v3216_v59 = vld [vmem:[%s4441_s14 + $0x358] ss:$28 sps:$4 sm:$0xff]  }
 0x298   :  { %2892 = vmatpush3.bf16.msra.mxu1 %v3098_v60 }
 0x299   :  { %1467 = vmatprep.subr.bf16.mxu1 %v3101_v14 }
 0x29a   :  { %2356 = vmatpush1.bf16.msra.mxu0 %v3162_v58  ;;  %v3218_v58 = vld [vmem:[%s4441_s14 + $0x35c] ss:$28 sps:$4 sm:$0xff]  }
 0x29b   :  { %2357 = vmatprep.subr.bf16.mxu0 %v3170_v62  ;;  %v1375_v62 = vld [vmem:[%s4440_s13] sm:$0x3] }
 0x29e   :  { %2358 = vmatpush1.bf16.msra.mxu0 %v3168_v61  ;;  %v3221_v61 = vld [vmem:[%s4441_s14 + $0xc] ss:$28 sps:$4 sm:$0xff]  }
 0x29f   :  { %2359 = vmatprep.subr.bf16.mxu0 %v3176_v0  ;;  %v1384_v0 = vrot.slane %v1375_v62, %v3919_v28 }
 0x2a2   :  { %2360 = vmatpush1.bf16.msra.mxu0 %v3174_v63  ;;  %v1380_v63 = vrot.slane %v1375_v62, %v3913_v26  ;;  %v3280_v62 = vld [vmem:[%s4441_s14 + $0x168] ss:$28 sps:$4 sm:$0xff]  }
 0x369   :  { %v1269_v4 = vpop.f32.mrb[8].mxu1 }
 0x36a   :  { %v1270_v5 = vadd.f32 %v2668_v3, %v1269_v4  ;;  %v2889_v6 = vpop.f32.mrb[9].mxu1  ;;  %v3186_v4 = vld [vmem:[%s4441_s14 + $0x240] ss:$28 sps:$4 sm:$0xff]  }
 0x36b   :  { %v1272_v7 = vpop.f32.mrb[10].mxu1  ;;  %v3192_v6 = vld [vmem:[%s4441_s14 + $0x278] ss:$28 sps:$4 sm:$0xff]  }
 0x36c   :  { %v1276_v9 = vmul.f32 0.5, %v1270_v5  ;;  %2512 = vst.msk [vmem:[#allocation4] sm:$0xff] %vm2511_vm4, %v1270_v5  ;;  %v1273_v8 = vadd.f32 %v2668_v3, %v1272_v7  ;;  %v2890_v10 = vpop.f32.mrb[11].mxu1  ;;  %v3182_v3 = vld [vmem:[%s4441_s14 + $0x20c] ss:$28 sps:$4 sm:$0xff]  }
 0x36d   :  { %2361 = vmatprep.subr.bf16.mxu0 %v3182_v3  ;;  %v3194_v7 = vld [vmem:[%s4441_s14 + $0x27c] ss:$28 sps:$4 sm:$0xff]   ;;  %v3204_v10 = vld [vmem:[%s4441_s14 + $0x2e8] ss:$28 sps:$4 sm:$0xff]  }
 0x36e   :  { %v1278_v11 = vmul.f32 1.442695, %v1276_v9  ;;  %v1277_v12 = vmul.f32 0.5, %v1273_v8  ;;  %2513 = vst.msk [vmem:[#allocation4 + $0x8] sm:$0xff] %vm2511_vm4, %v1273_v8  ;;  %2362 = vmatpush1.bf16.msra.mxu0 %v3180_v1  ;;  %v3198_v9 = vld [vmem:[%s4441_s14 + $0x2b0] ss:$28 sps:$4 sm:$0xff]  }
 0x370   :  { %3283 = vpow2.f32 %v1278_v11  ;;  %v1280_v13 = vmul.f32 1.442695, %v1277_v12  ;;  %v3206_v11 = vld [vmem:[%s4441_s14 + $0x2ec] ss:$28 sps:$4 sm:$0xff]  }
 0x372   :  { %3285 = vpow2.f32 %v1280_v13  ;;  %v2679_v13 = vld [vmem:[%s4438_s11] ss:$0 sm:$0xff] }
 0x37a   :  { %v3284_v15 = vpop.eup %3283 }
 0x37b   :  { %1284 = vrot.lane.b32.xlu0 %v3284_v15, %s3394_s26 }
 0x37c   :  { %v3286_v16 = vpop.eup %3285 }
 0x37f   :  { %1286 = vrot.lane.b32.xlu0 %v3286_v16, %s3394_s26 }
 0x3ed   :  { %v1285_v18 = vpop.permute.xlu0 %1284 }
 0x3ee   :  { %v1290_v21 = vmul.f32 %v1285_v18, %v82_v17 }
 0x3f0   :  { %v1292_v27 = vadd.f32 %v1290_v21, %v1270_v5  ;;  %v3188_v5 = vld [vmem:[%s4441_s14 + $0x244] ss:$28 sps:$4 sm:$0xff]  }
 0x3f1   :  { %v1287_v23 = vpop.permute.xlu0 %1286  ;;  %2363 = vmatprep.subr.bf16.mxu0 %v3188_v5 }
 0x3f2   :  { %v1291_v24 = vmul.f32 %v1287_v23, %v83_v19  ;;  %2364 = vmatpush1.bf16.msra.mxu0 %v3186_v4 }
 0x3f3   :  { %2365 = vmatprep.subr.bf16.mxu0 %v3194_v7 }
 0x3f4   :  { %v1293_v29 = vadd.f32 %v1291_v24, %v1273_v8  ;;  %v3200_v8 = vld [vmem:[%s4441_s14 + $0x2b4] ss:$28 sps:$4 sm:$0xff]   ;;  %v3123_v24 = vld [vmem:[%s4441_s14] ss:$28 sps:$4 sm:$0xff]  }
 0x3f6   :  { %v1294_v31 = vpack.c.bf16 %v1293_v29, %v1292_v27  ;;  %2366 = vmatpush1.bf16.msra.mxu0 %v3192_v6  ;;  %v3131_v29 = vld [vmem:[%s4441_s14 + $0x3c] ss:$28 sps:$4 sm:$0xff]  }
 0x3f7   :  { %2367 = vmatprep.subr.bf16.mxu0 %v3200_v8 }
 0x3f8   :  { %2894 = vmatmul.mubr.msk.bf16.vlgmr.msra.gmra.mrb[12].mxu1 %vm787_vm3, %v1294_v31  ;;  %v3143_v31 = vld [vmem:[%s4441_s14 + $0xac] ss:$28 sps:$4 sm:$0xff]  }
 0x3f9   :  { %1468 = vmatpush1.bf16.msra.mxu1 %v3099_v30  ;;  %1499 = vmatprep.mubr.bf16.mxu1 %v3391_v2  ;;  %v3108_v2 = vld [vmem:[%s4439_s12 + $0x30] ss:$8 sps:$4 sm:$0xff]  }
 0x3fa   :  { %1469 = vmatprep.subr.bf16.mxu1 %v3104_v32  ;;  %2368 = vmatpush1.bf16.msra.mxu0 %v3198_v9  ;;  %v3135_v30 = vld [vmem:[%s4441_s14 + $0x70] ss:$28 sps:$4 sm:$0xff]   ;;  %v3141_v32 = vld [vmem:[%s4441_s14 + $0xa8] ss:$28 sps:$4 sm:$0xff]  }
 0x3fb   :  { %2369 = vmatprep.subr.bf16.mxu0 %v3206_v11 }
 0x3fd   :  { %1470 = vmatpush1.bf16.msra.mxu1 %v3102_v33  ;;  %v3149_v33 = vld [vmem:[%s4441_s14 + $0xe4] ss:$28 sps:$4 sm:$0xff]  }
 0x3fe   :  { %1471 = vmatprep.subr.bf16.mxu1 %v3107_v34  ;;  %2370 = vmatpush1.bf16.msra.mxu0 %v3204_v10  ;;  %v3147_v34 = vld [vmem:[%s4441_s14 + $0xe0] ss:$28 sps:$4 sm:$0xff]  }
 0x3ff   :  { %2371 = vmatprep.subr.bf16.mxu0 %v3212_v54  ;;  %v3273_v54 = vld [vmem:[%s4441_s14 + $0x280] ss:$28 sps:$4 sm:$0xff]  }
 0x401   :  { %1472 = vmatpush1.bf16.msra.mxu1 %v3105_v35  ;;  %v3155_v35 = vld [vmem:[%s4441_s14 + $0x11c] ss:$28 sps:$4 sm:$0xff]  }
 0x402   :  { %1473 = vmatprep.subr.bf16.mxu1 %v3110_v36  ;;  %v3153_v36 = vld [vmem:[%s4441_s14 + $0x118] ss:$28 sps:$4 sm:$0xff]   ;;  %2372 = vmatpush1.bf16.msra.mxu0 %v3210_v55  ;;  %v3274_v55 = vld [vmem:[%s4441_s14 + $0xc0] ss:$28 sps:$4 sm:$0xff]  }
 0x403   :  { %2373 = vmatprep.subr.bf16.mxu0 %v3218_v58  ;;  %v3277_v58 = vld [vmem:[%s4441_s14 + $0x2f0] ss:$28 sps:$4 sm:$0xff]  }
 0x405   :  { %1474 = vmatpush1.bf16.msra.mxu1 %v3108_v2  ;;  %v3161_v2 = vld [vmem:[%s4441_s14 + $0x154] ss:$28 sps:$4 sm:$0xff]  }
 0x406   :  { %1475 = vmatprep.subr.bf16.mxu1 %v3113_v37  ;;  %v3159_v37 = vld [vmem:[%s4441_s14 + $0x150] ss:$28 sps:$4 sm:$0xff]   ;;  %2374 = vmatpush1.bf16.msra.mxu0 %v3216_v59 }
 0x407   :  { %v3278_v59 = vld [vmem:[%s4441_s14 + $0x130] ss:$28 sps:$4 sm:$0xff]  }
 0x409   :  { %1476 = vmatpush1.bf16.msra.mxu1 %v3111_v38  ;;  %v3167_v38 = vld [vmem:[%s4441_s14 + $0x18c] ss:$28 sps:$4 sm:$0xff]  }
 0x40a   :  { %1477 = vmatprep.subr.bf16.mxu1 %v3116_v39  ;;  %v3165_v39 = vld [vmem:[%s4441_s14 + $0x188] ss:$28 sps:$4 sm:$0xff]  }
 0x40d   :  { %1478 = vmatpush1.bf16.msra.mxu1 %v3114_v40  ;;  %v3173_v40 = vld [vmem:[%s4441_s14 + $0x1c4] ss:$28 sps:$4 sm:$0xff]  }
 0x40e   :  { %1479 = vmatprep.subr.bf16.mxu1 %v3119_v41  ;;  %v3171_v41 = vld [vmem:[%s4441_s14 + $0x1c0] ss:$28 sps:$4 sm:$0xff]  }
 0x411   :  { %1480 = vmatpush1.bf16.msra.mxu1 %v3117_v42  ;;  %v3179_v42 = vld [vmem:[%s4441_s14 + $0x1fc] ss:$28 sps:$4 sm:$0xff]  }
 0x412   :  { %1481 = vmatprep.subr.bf16.mxu1 %v3122_v43  ;;  %v3177_v43 = vld [vmem:[%s4441_s14 + $0x1f8] ss:$28 sps:$4 sm:$0xff]  }
 0x415   :  { %1482 = vmatpush1.bf16.msra.mxu1 %v3120_v44  ;;  %v3185_v44 = vld [vmem:[%s4441_s14 + $0x234] ss:$28 sps:$4 sm:$0xff]  }
 0x416   :  { %2257 = vmatprep.subr.bf16.mxu1 %v3125_v45  ;;  %v3183_v45 = vld [vmem:[%s4441_s14 + $0x230] ss:$28 sps:$4 sm:$0xff]  }
 0x4cb   :  { %v1340_v12 = vpop.f32.mrb[12].mxu1 }
 0x4cc   :  { %v1341_v60 = vadd.f32 %v1340_v12, %v3906_v20  ;;  %v2895_v14 = vpop.f32.mrb[13].mxu1  ;;  %v3129_v20 = vld [vmem:[%s4441_s14 + $0x38] ss:$28 sps:$4 sm:$0xff]  }
 0x4cd   :  { %v1343_v15 = vpop.f32.mrb[14].mxu1 }
 0x4ce   :  { %v1354_v16 = vadd.f32 %v2679_v13, %v1341_v60  ;;  %v1344_v17 = vadd.f32 %v1343_v15, %v3908_v22  ;;  %v2896_v18 = vpop.f32.mrb[15].mxu1  ;;  %v3137_v22 = vld [vmem:[%s4441_s14 + $0x74] ss:$28 sps:$4 sm:$0xff]   ;;  %v3219_v15 = vld [vmem:[%s4441_s14 + $0x8] ss:$28 sps:$4 sm:$0xff]  }
 0x4cf   :  { %v3227_v18 = vld [vmem:[%s4441_s14 + $0x7c] ss:$28 sps:$4 sm:$0xff]  }
 0x4d0   :  { %v1355_v19 = vadd.f32 %v2679_v13, %v1344_v17  ;;  %v1356_v21 = vmax.f32 %v1354_v16, 0.0  ;;  %v3224_v16 = vld [vmem:[%s4441_s14 + $0x44] ss:$28 sps:$4 sm:$0xff]  }
 0x4d1   :  { %v3222_v17 = vld [vmem:[%s4441_s14 + $0x40] ss:$28 sps:$4 sm:$0xff]  }
 0x4d2   :  { %v1357_v23 = vmax.f32 %v1355_v19, 0.0  ;;  %v3225_v19 = vld [vmem:[%s4441_s14 + $0x78] ss:$28 sps:$4 sm:$0xff]  }
 0x4d4   :  { %v1358_v27 = vpack.c.bf16 %v1357_v23, %v1356_v21  ;;  %v3230_v21 = vld [vmem:[%s4441_s14 + $0xb4] ss:$28 sps:$4 sm:$0xff]  }
 0x4d5   :  { %v3228_v23 = vld [vmem:[%s4441_s14 + $0xb0] ss:$28 sps:$4 sm:$0xff]  }
 0x4d6   :  { %1500 = vmatmul.mubr.bf16.vlgmr.msra.gmra.mrb[16].mxu1 %v1358_v27  ;;  %v3231_v27 = vld [vmem:[%s4441_s14 + $0xe8] ss:$28 sps:$4 sm:$0xff]  }
 0x4d7   :  { %2258 = vmatpush1.bf16.msra.mxu1 %v3123_v24  ;;  %v3233_v24 = vld [vmem:[%s4441_s14 + $0xec] ss:$28 sps:$4 sm:$0xff]  }
 0x4d8   :  { %2259 = vmatprep.subr.bf16.mxu1 %v3131_v29  ;;  %v3236_v29 = vld [vmem:[%s4441_s14 + $0x124] ss:$28 sps:$4 sm:$0xff]  }
 0x4db   :  { %2260 = vmatpush1.bf16.msra.mxu1 %v3129_v20  ;;  %v3234_v20 = vld [vmem:[%s4441_s14 + $0x120] ss:$28 sps:$4 sm:$0xff]  }
 0x4dc   :  { %2261 = vmatprep.subr.bf16.mxu1 %v3137_v22  ;;  %v3239_v22 = vld [vmem:[%s4441_s14 + $0x15c] ss:$28 sps:$4 sm:$0xff]  }
 0x4df   :  { %2262 = vmatpush1.bf16.msra.mxu1 %v3135_v30  ;;  %v3237_v30 = vld [vmem:[%s4441_s14 + $0x158] ss:$28 sps:$4 sm:$0xff]  }
 0x4e0   :  { %2263 = vmatprep.subr.bf16.mxu1 %v3143_v31  ;;  %v3242_v31 = vld [vmem:[%s4441_s14 + $0x194] ss:$28 sps:$4 sm:$0xff]  }
 0x4e3   :  { %2264 = vmatpush1.bf16.msra.mxu1 %v3141_v32  ;;  %v3240_v32 = vld [vmem:[%s4441_s14 + $0x190] ss:$28 sps:$4 sm:$0xff]  }
 0x4e4   :  { %2265 = vmatprep.subr.bf16.mxu1 %v3149_v33  ;;  %v3245_v33 = vld [vmem:[%s4441_s14 + $0x1cc] ss:$28 sps:$4 sm:$0xff]  }
 0x4e7   :  { %2266 = vmatpush1.bf16.msra.mxu1 %v3147_v34  ;;  %v3243_v34 = vld [vmem:[%s4441_s14 + $0x1c8] ss:$28 sps:$4 sm:$0xff]  }
 0x4e8   :  { %2267 = vmatprep.subr.bf16.mxu1 %v3155_v35  ;;  %v3248_v35 = vld [vmem:[%s4441_s14 + $0x204] ss:$28 sps:$4 sm:$0xff]  }
 0x4eb   :  { %2268 = vmatpush1.bf16.msra.mxu1 %v3153_v36  ;;  %v3246_v36 = vld [vmem:[%s4441_s14 + $0x200] ss:$28 sps:$4 sm:$0xff]  }
 0x4ec   :  { %2269 = vmatprep.subr.bf16.mxu1 %v3161_v2  ;;  %v3251_v2 = vld [vmem:[%s4441_s14 + $0x23c] ss:$28 sps:$4 sm:$0xff]  }
 0x4ef   :  { %2270 = vmatpush1.bf16.msra.mxu1 %v3159_v37  ;;  %v3249_v37 = vld [vmem:[%s4441_s14 + $0x238] ss:$28 sps:$4 sm:$0xff]  }
 0x4f0   :  { %2271 = vmatprep.subr.bf16.mxu1 %v3167_v38  ;;  %v3254_v38 = vld [vmem:[%s4441_s14 + $0x274] ss:$28 sps:$4 sm:$0xff]  }
 0x4f3   :  { %2272 = vmatpush1.bf16.msra.mxu1 %v3165_v39  ;;  %v3252_v39 = vld [vmem:[%s4441_s14 + $0x270] ss:$28 sps:$4 sm:$0xff]  }
 0x4f4   :  { %2273 = vmatprep.subr.bf16.mxu1 %v3173_v40  ;;  %v3257_v40 = vld [vmem:[%s4441_s14 + $0x2ac] ss:$28 sps:$4 sm:$0xff]  }
 0x4f7   :  { %2274 = vmatpush1.bf16.msra.mxu1 %v3171_v41  ;;  %v3255_v41 = vld [vmem:[%s4441_s14 + $0x2a8] ss:$28 sps:$4 sm:$0xff]  }
 0x4f8   :  { %2275 = vmatprep.subr.bf16.mxu1 %v3179_v42  ;;  %v3260_v42 = vld [vmem:[%s4441_s14 + $0x2e4] ss:$28 sps:$4 sm:$0xff]  }
 0x4fb   :  { %2276 = vmatpush1.bf16.msra.mxu1 %v3177_v43  ;;  %v3258_v43 = vld [vmem:[%s4441_s14 + $0x2e0] ss:$28 sps:$4 sm:$0xff]  }
 0x4fc   :  { %2277 = vmatprep.subr.bf16.mxu1 %v3185_v44  ;;  %v3263_v44 = vld [vmem:[%s4441_s14 + $0x31c] ss:$28 sps:$4 sm:$0xff]  }
 0x4ff   :  { %2278 = vmatpush1.bf16.msra.mxu1 %v3183_v45  ;;  %v3261_v45 = vld [vmem:[%s4441_s14 + $0x318] ss:$28 sps:$4 sm:$0xff]  }
 0x500   :  { %2279 = vmatprep.subr.bf16.mxu1 %v3191_v46  ;;  %v3266_v46 = vld [vmem:[%s4441_s14 + $0x354] ss:$28 sps:$4 sm:$0xff]  }
 0x503   :  { %2280 = vmatpush1.bf16.msra.mxu1 %v3189_v47  ;;  %v3264_v47 = vld [vmem:[%s4441_s14 + $0x350] ss:$28 sps:$4 sm:$0xff]  }
 0x504   :  { %2281 = vmatprep.subr.bf16.mxu1 %v3197_v48  ;;  %v3267_v48 = vld [vmem:[%s4441_s14 + $0x1d8] ss:$28 sps:$4 sm:$0xff]  }
 0x507   :  { %2282 = vmatpush1.bf16.msra.mxu1 %v3195_v49  ;;  %v3268_v49 = vld [vmem:[%s4441_s14 + $0x18] ss:$28 sps:$4 sm:$0xff]  }
 0x508   :  { %2283 = vmatprep.subr.bf16.mxu1 %v3203_v50  ;;  %v3269_v50 = vld [vmem:[%s4441_s14 + $0x210] ss:$28 sps:$4 sm:$0xff]  }
 0x50b   :  { %2284 = vmatpush1.bf16.msra.mxu1 %v3201_v51  ;;  %v3270_v51 = vld [vmem:[%s4441_s14 + $0x50] ss:$28 sps:$4 sm:$0xff]  }
 0x50c   :  { %2285 = vmatprep.subr.bf16.mxu1 %v3209_v52  ;;  %v3271_v52 = vld [vmem:[%s4441_s14 + $0x248] ss:$28 sps:$4 sm:$0xff]  }
 0x50f   :  { %2286 = vmatpush1.bf16.msra.mxu1 %v3207_v53  ;;  %v3272_v53 = vld [vmem:[%s4441_s14 + $0x88] ss:$28 sps:$4 sm:$0xff]  }
 0x510   :  { %2287 = vmatprep.subr.bf16.mxu1 %v3215_v56  ;;  %v3275_v56 = vld [vmem:[%s4441_s14 + $0x2b8] ss:$28 sps:$4 sm:$0xff]  }
 0x513   :  { %2288 = vmatpush1.bf16.msra.mxu1 %v3213_v57  ;;  %v3276_v57 = vld [vmem:[%s4441_s14 + $0xf8] ss:$28 sps:$4 sm:$0xff]  }
 0x514   :  { %2300 = vmatprep.subr.bf16.mxu1 %v3221_v61  ;;  %v3279_v61 = vld [vmem:[%s4441_s14 + $0x328] ss:$28 sps:$4 sm:$0xff]  }
 0x5a9   :  { %v1501_v1 = vpop.f32.mrb[16].mxu1 }
 0x5aa   :  { %v1502_v3 = vadd.f32 %v1501_v1, %v1380_v63  ;;  %v1503_v4 = vpop.f32.mrb[17].mxu1  ;;  %v1664_v1 = vsub.s32 4, %v3910_v25 }
 0x5ab   :  { %v1504_v5 = vadd.f32 %v1503_v4, %v1384_v0  ;;  %v1505_v6 = vpop.f32.mrb[18].mxu1  ;;  %v1668_v4 = vsub.s32 5, %v3910_v25 }
 0x5ac   :  { %v1506_v7 = vadd.f32 %v1505_v6, %v1380_v63  ;;  %v1507_v9 = vpop.f32.mrb[19].mxu1  ;;  %v1510_v10 = vmax.f32 %v1502_v3, 0.0  ;;  %v3281_v63 = vld [vmem:[%s4441_s14 + $0x360] ss:$28 sps:$4 sm:$0xff]  }
 0x5ad   :  { %v1508_v8 = vadd.f32 %v1507_v9, %v1384_v0  ;;  %v1511_v12 = vmax.f32 %v1504_v5, 0.0  ;;  %v3282_v0 = vld [vmem:[%s4441_s14 + $0x1a0] ss:$28 sps:$4 sm:$0xff]   ;;  %s3395_s14 = smov [#allocation4]  }
 0x5ae   :  { %v1512_v11 = vmax.f32 %v1506_v7, 0.0  ;;  %v4386_v3 = vld [vmem:[%s4442_s15] sm:$0x7f]  ;;  %s2531_s15 = sshll.u32 %s3395_s14, 4  ;;  %s2532_s15 = int_to_ptr.vmem [resolvable:$true] %s2531_s15 }
 0x5af   :  { %v1513_v13 = vmax.f32 %v1508_v8, 0.0  ;;  %v1649_v5 = vrot.slane %v4386_v3, %v3913_v26  ;;  %v1665_v6 = vrot.slane %v4386_v3, %v1664_v1  ;;  %v1653_v7 = vrot.slane %v4386_v3, %v3919_v28  ;;  %s3343_s10 = scalar_lea.vmem %s2532_s15, 256  ;;  %p3348_p1 = scmp.lt.s32.totalorder %s2532_s15, %s2532_s15 }
 0x5b0   :  { %v4229_v60 = vpack.c.bf16 %v1512_v11, %v1510_v10  ;;  %v1669_v9 = vrot.slane %v4386_v3, %v1668_v4  ;;  %p3344_p0 = scmp.ne.s32.totalorder %s2532_s15, %s3343_s10  ;;  %p3349_p2 = scmp.lt.s32.totalorder %s3343_s10, %s3343_s10 }
 0x5b1   :  { %v4231_v14 = vpack.c.bf16 %v1513_v13, %v1511_v12 }
 0x5b2   :  { %p3350_p3 = por %p3349_p2, %p3348_p1 }
 0x5b3   :  { %2289 = vmatprep.mubr.bf16.mxu1 %v4231_v14  ;;  %2375 = vmatprep.mubr.bf16.mxu0 %v4231_v14 }
 0x5b4   :  { %2290 = vmatmul.mubr.bf16.vlgmr.msra.gmra.mrb[20].mxu1 %v4229_v60  ;;  %2376 = vmatmul.mubr.bf16.vlgmr.msra.gmra.mrb[4].mxu0 %v4229_v60  ;;  %p3351_p4 = pnand %p3350_p3, %p3344_p0 }
 0x5b5   :  { %2301 = vmatpush1.bf16.msra.mxu1 %v3219_v15  ;;  %2332 = vmatprep.mubr.bf16.mxu1 %v4231_v14 }
 0x5b6   :  { %2302 = vmatprep.subr.bf16.mxu1 %v3224_v16 }
 0x5b9   :  { %2303 = vmatpush1.bf16.msra.mxu1 %v3222_v17 }
 0x5ba   :  { %2304 = vmatprep.subr.bf16.mxu1 %v3227_v18 }
 0x5bd   :  { %2305 = vmatpush1.bf16.msra.mxu1 %v3225_v19 }
 0x5be   :  { %2306 = vmatprep.subr.bf16.mxu1 %v3230_v21 }
 0x5c1   :  { %2307 = vmatpush1.bf16.msra.mxu1 %v3228_v23 }
 0x5c2   :  { %2308 = vmatprep.subr.bf16.mxu1 %v3233_v24 }
 0x5c5   :  { %2309 = vmatpush1.bf16.msra.mxu1 %v3231_v27 }
 0x5c6   :  { %2310 = vmatprep.subr.bf16.mxu1 %v3236_v29 }
 0x5c9   :  { %2311 = vmatpush1.bf16.msra.mxu1 %v3234_v20 }
 0x5ca   :  { %2312 = vmatprep.subr.bf16.mxu1 %v3239_v22 }
 0x5cd   :  { %2313 = vmatpush1.bf16.msra.mxu1 %v3237_v30 }
 0x5ce   :  { %2314 = vmatprep.subr.bf16.mxu1 %v3242_v31 }
 0x5d1   :  { %2315 = vmatpush1.bf16.msra.mxu1 %v3240_v32 }
 0x5d2   :  { %2316 = vmatprep.subr.bf16.mxu1 %v3245_v33 }
 0x5d5   :  { %2317 = vmatpush1.bf16.msra.mxu1 %v3243_v34 }
 0x5d6   :  { %2318 = vmatprep.subr.bf16.mxu1 %v3248_v35 }
 0x5d9   :  { %2319 = vmatpush1.bf16.msra.mxu1 %v3246_v36 }
 0x5da   :  { %2320 = vmatprep.subr.bf16.mxu1 %v3251_v2 }
 0x5dd   :  { %2321 = vmatpush1.bf16.msra.mxu1 %v3249_v37 }
 0x5de   :  { %2322 = vmatprep.subr.bf16.mxu1 %v3254_v38 }
 0x5e1   :  { %2323 = vmatpush1.bf16.msra.mxu1 %v3252_v39 }
 0x5e2   :  { %2324 = vmatprep.subr.bf16.mxu1 %v3257_v40 }
 0x5e5   :  { %2325 = vmatpush1.bf16.msra.mxu1 %v3255_v41 }
 0x5e6   :  { %2326 = vmatprep.subr.bf16.mxu1 %v3260_v42 }
 0x5e9   :  { %2327 = vmatpush1.bf16.msra.mxu1 %v3258_v43 }
 0x5ea   :  { %2328 = vmatprep.subr.bf16.mxu1 %v3263_v44 }
 0x5ed   :  { %2329 = vmatpush1.bf16.msra.mxu1 %v3261_v45 }
 0x5ee   :  { %2330 = vmatprep.subr.bf16.mxu1 %v3266_v46 }
 0x5f1   :  { %2331 = vmatpush1.bf16.msra.mxu1 %v3264_v47 }
 0x5f2   :  { %2843 = vmatprep.subr.bf16.mxu1 %v3267_v48 }
 0x5f4   :  { %2333 = vmatmul.mubr.bf16.vlgmr.msra.gmra.mrb[24].mxu1 %v4229_v60 }
 0x5f5   :  { %2844 = vmatpush3.bf16.msra.mxu1 %v3268_v49  ;;  %2418 = vmatprep.mubr.bf16.mxu1 %v4231_v14 }
 0x5f6   :  { %2845 = vmatprep.subr.bf16.mxu1 %v3269_v50 }
 0x5f9   :  { %2846 = vmatpush3.bf16.msra.mxu1 %v3270_v51 }
 0x5fa   :  { %2847 = vmatprep.subr.bf16.mxu1 %v3271_v52 }
 0x5fd   :  { %2848 = vmatpush3.bf16.msra.mxu1 %v3272_v53 }
 0x5fe   :  { %2849 = vmatprep.subr.bf16.mxu1 %v3273_v54 }
 0x601   :  { %2850 = vmatpush3.bf16.msra.mxu1 %v3274_v55 }
 0x602   :  { %2851 = vmatprep.subr.bf16.mxu1 %v3275_v56 }
 0x605   :  { %2852 = vmatpush3.bf16.msra.mxu1 %v3276_v57 }
 0x606   :  { %2853 = vmatprep.subr.bf16.mxu1 %v3277_v58 }
 0x609   :  { %2854 = vmatpush3.bf16.msra.mxu1 %v3278_v59 }
 0x60a   :  { %2855 = vmatprep.subr.bf16.mxu1 %v3279_v61 }
 0x60d   :  { %2856 = vmatpush3.bf16.msra.mxu1 %v3280_v62 }
 0x60e   :  { %2857 = vmatprep.subr.bf16.mxu1 %v3281_v63 }
 0x611   :  { %2858 = vmatpush3.bf16.msra.mxu1 %v3282_v0 }
 0x614   :  { %2419 = vmatmul.mubr.bf16.vlgmr.msra.gmra.mrb[28].mxu1 %v4229_v60 }
 0x687   :  { %v2291_v8 = vpop.f32.mrb[20].mxu1  ;;  %v2377_v10 = vpop.f32.mrb[4].mxu0 }
 0x688   :  { %v2292_v11 = vadd.f32 %v2291_v8, %v1649_v5  ;;  %v2378_v12 = vadd.f32 %v2377_v10, %v1665_v6  ;;  %v2293_v13 = vpop.f32.mrb[21].mxu1  ;;  %v2379_v60 = vpop.f32.mrb[5].mxu0 }
 0x689   :  { %v2294_v14 = vadd.f32 %v2293_v13, %v1653_v7  ;;  %v2380_v15 = vadd.f32 %v2379_v60, %v1669_v9  ;;  %v2295_v16 = vpop.f32.mrb[22].mxu1  ;;  %v2381_v17 = vpop.f32.mrb[6].mxu0 }
 0x68a   :  { %v2427_v18 = vsub.f32 0.0, %v2292_v11  ;;  %v2431_v19 = vsub.f32 0.0, %v2378_v12  ;;  %v2296_v26 = vadd.f32 %v2295_v16, %v1649_v5  ;;  %v2382_v21 = vadd.f32 %v2381_v17, %v1665_v6  ;;  %v2297_v23 = vpop.f32.mrb[23].mxu1  ;;  %v2383_v24 = vpop.f32.mrb[7].mxu0 }
 0x68b   :  { %v2428_v27 = vsub.f32 0.0, %v2294_v14  ;;  %v2432_v28 = vsub.f32 0.0, %v2380_v15  ;;  %v2298_v29 = vadd.f32 %v2297_v23, %v1653_v7  ;;  %v2384_v20 = vadd.f32 %v2383_v24, %v1669_v9 }
 0x68c   :  { %v2441_v22 = vmul.f32 1.442695, %v2427_v18  ;;  %v2449_v30 = vmul.f32 1.442695, %v2431_v19  ;;  %v2434_v31 = vsub.f32 0.0, %v2296_v26  ;;  %v2438_v32 = vsub.f32 0.0, %v2382_v21 }
 0x68d   :  { %v2443_v33 = vmul.f32 1.442695, %v2428_v27  ;;  %v2451_v34 = vmul.f32 1.442695, %v2432_v28  ;;  %v2435_v35 = vsub.f32 0.0, %v2298_v29  ;;  %v2439_v36 = vsub.f32 0.0, %v2384_v20 }
 0x68e   :  { %3287 = vpow2.f32 %v2441_v22  ;;  %v2455_v2 = vmul.f32 1.442695, %v2434_v31  ;;  %v2463_v37 = vmul.f32 1.442695, %v2438_v32 }
 0x68f   :  { %3289 = vpow2.f32 %v2449_v30  ;;  %v2457_v38 = vmul.f32 1.442695, %v2435_v35  ;;  %v2465_v39 = vmul.f32 1.442695, %v2439_v36 }
 0x690   :  { %3291 = vpow2.f32 %v2443_v33 }
 0x691   :  { %3293 = vpow2.f32 %v2451_v34 }
 0x692   :  { %3295 = vpow2.f32 %v2455_v2 }
 0x693   :  { %3354 = shalt.err (!%p3351_p4)
}
 0x694   :  { %s3355_s3 = scalar_lea.hbm %s4444_s17, 256 }
 0x695   :  { %p3356_p5 = scmp.ne.s32.totalorder %s4444_s17, %s3355_s3  ;;  %p3359_p6 = scmp.lt.u32.totalorder %s3355_s3, %s4444_s17 }
 0x697   :  { %p3361_p7 = pnand %p3359_p6, %p3356_p5 }
 0x699   :  { %3364 = shalt.err (!%p3361_p7)
}
 0x69a   :  { %s3396_s29 = smov 128   ;;  %s3397_s21 = smov 8   ;;  %3297 = vpow2.f32 %v2463_v37  ;;  %v3288_v40 = vpop.eup %3287  ;;  %v1656_v1 = vsub.s32 2, %v3910_v25  ;;  %v1660_v4 = vsub.s32 3, %v3910_v25  ;;  %v1672_v31 = vsub.s32 6, %v3910_v25 }
 0x69b   :  { %2537 = dma.vmem_to_hbm [thread:$0]  %s2532_s15, 256, %s4444_s17, [#allocation5], %s3396_s29, %s3396_s29, %s3397_s21   ;;  %3299 = vpow2.f32 %v2457_v38  ;;  %v3290_v41 = vpop.eup %3289  ;;  %v2469_v42 = vadd.f32 1.0, %v3288_v40 }
 0x69c   :  { %3301 = vpow2.f32 %v2465_v39  ;;  %v3292_v43 = vpop.eup %3291  ;;  %v2473_v44 = vadd.f32 1.0, %v3290_v41  ;;  %v1657_v5 = vrot.slane %v4386_v3, %v1656_v1  ;;  %v1661_v6 = vrot.slane %v4386_v3, %v1660_v4  ;;  %s3398_s17 = smov [#allocation2]  }
 0x69d   :  { %v3294_v45 = vpop.eup %3293  ;;  %3303 = vrcp.f32 %v2469_v42  ;;  %v2470_v46 = vadd.f32 1.0, %v3292_v43  ;;  %v1673_v36 = vrot.slane %v4386_v3, %v1672_v31  ;;  %s2519_s13 = sshll.u32 %s3398_s17, 4  ;;  %s2520_s13 = int_to_ptr.vmem [resolvable:$true] %s2519_s13 }
 0x69e   :  { %v3296_v47 = vpop.eup %3295  ;;  %3305 = vrcp.f32 %v2473_v44  ;;  %v2474_v48 = vadd.f32 1.0, %v3294_v45  ;;  %s3365_s24 = scalar_lea.vmem %s2520_s13, 1792  ;;  %p3370_p9 = scmp.lt.s32.totalorder %s2520_s13, %s2520_s13 }
 0x69f   :  { %3307 = vrcp.f32 %v2470_v46  ;;  %v2476_v50 = vadd.f32 1.0, %v3296_v47  ;;  %p3366_p8 = scmp.ne.s32.totalorder %s2520_s13, %s3365_s24  ;;  %p3371_p10 = scmp.lt.s32.totalorder %s3365_s24, %s3365_s24 }
 0x6a0   :  { %3309 = vrcp.f32 %v2474_v48 }
 0x6a1   :  { %3311 = vrcp.f32 %v2476_v50  ;;  %p3372_p11 = por %p3371_p10, %p3370_p9 }
 0x6a3   :  { %p3373_p12 = pnand %p3372_p11, %p3366_p8 }
 0x6a4   :  { %v3298_v49 = vpop.eup %3297 }
 0x6a5   :  { %v3300_v51 = vpop.eup %3299  ;;  %v2480_v52 = vadd.f32 1.0, %v3298_v49 }
 0x6a6   :  { %v3302_v53 = vpop.eup %3301  ;;  %v2477_v54 = vadd.f32 1.0, %v3300_v51 }
 0x6a7   :  { %3313 = vrcp.f32 %v2480_v52  ;;  %v2481_v55 = vadd.f32 1.0, %v3302_v53  ;;  %v3304_v56 = vpop.eup %3303 }
 0x6a8   :  { %3315 = vrcp.f32 %v2477_v54  ;;  %v3306_v57 = vpop.eup %3305  ;;  %2497 = vst [vmem:[#allocation2] sm:$0xff] %v3304_v56 }
 0x6a9   :  { %3317 = vrcp.f32 %v2481_v55  ;;  %v3308_v58 = vpop.eup %3307  ;;  %2501 = vst [vmem:[#allocation2 + $0x20] sm:$0xff] %v3306_v57 }
 0x6aa   :  { %v3310_v59 = vpop.eup %3309  ;;  %2498 = vst [vmem:[#allocation2 + $0x8] sm:$0xff] %v3308_v58 }
 0x6ab   :  { %v3312_v61 = vpop.eup %3311  ;;  %2502 = vst [vmem:[#allocation2 + $0x28] sm:$0xff] %v3310_v59 }
 0x6ac   :  { %2504 = vst [vmem:[#allocation2 + $0x38] sm:$0xff] %v3312_v61 }
 0x6b1   :  { %v3314_v62 = vpop.eup %3313 }
 0x6b2   :  { %v3316_v63 = vpop.eup %3315  ;;  %2508 = vst [vmem:[#allocation2 + $0x58] sm:$0xff] %v3314_v62 }
 0x6b3   :  { %v3318_v0 = vpop.eup %3317  ;;  %2505 = vst [vmem:[#allocation2 + $0x40] sm:$0xff] %v3316_v63 }
 0x6b4   :  { %2509 = vst [vmem:[#allocation2 + $0x60] sm:$0xff] %v3318_v0 }
 0x6c7   :  { %v2334_v7 = vpop.f32.mrb[24].mxu1 }
 0x6c8   :  { %v2335_v9 = vadd.f32 %v2334_v7, %v1657_v5  ;;  %v2336_v8 = vpop.f32.mrb[25].mxu1 }
 0x6c9   :  { %v2337_v10 = vadd.f32 %v2336_v8, %v1661_v6  ;;  %v2338_v11 = vpop.f32.mrb[26].mxu1 }
 0x6ca   :  { %v2429_v12 = vsub.f32 0.0, %v2335_v9  ;;  %v2339_v13 = vadd.f32 %v2338_v11, %v1657_v5  ;;  %v2340_v60 = vpop.f32.mrb[27].mxu1 }
 0x6cb   :  { %v2430_v14 = vsub.f32 0.0, %v2337_v10  ;;  %v2341_v15 = vadd.f32 %v2340_v60, %v1661_v6 }
 0x6cc   :  { %v2445_v16 = vmul.f32 1.442695, %v2429_v12  ;;  %v2436_v17 = vsub.f32 0.0, %v2339_v13 }
 0x6cd   :  { %v2447_v18 = vmul.f32 1.442695, %v2430_v14  ;;  %v2437_v19 = vsub.f32 0.0, %v2341_v15 }
 0x6ce   :  { %3319 = vpow2.f32 %v2445_v16  ;;  %v2459_v26 = vmul.f32 1.442695, %v2436_v17 }
 0x6cf   :  { %3321 = vpow2.f32 %v2447_v18  ;;  %v2461_v21 = vmul.f32 1.442695, %v2437_v19 }
 0x6d0   :  { %3323 = vpow2.f32 %v2459_v26 }
 0x6d1   :  { %3325 = vpow2.f32 %v2461_v21 }
 0x6d8   :  { %v3320_v23 = vpop.eup %3319 }
 0x6d9   :  { %v3322_v24 = vpop.eup %3321  ;;  %v2471_v27 = vadd.f32 1.0, %v3320_v23 }
 0x6da   :  { %v3324_v28 = vpop.eup %3323  ;;  %v2472_v29 = vadd.f32 1.0, %v3322_v24 }
 0x6db   :  { %v3326_v20 = vpop.eup %3325  ;;  %3327 = vrcp.f32 %v2471_v27  ;;  %v2478_v22 = vadd.f32 1.0, %v3324_v28 }
 0x6dc   :  { %3329 = vrcp.f32 %v2472_v29  ;;  %v2479_v30 = vadd.f32 1.0, %v3326_v20 }
 0x6dd   :  { %3331 = vrcp.f32 %v2478_v22 }
 0x6de   :  { %3333 = vrcp.f32 %v2479_v30 }
 0x6e5   :  { %v3328_v32 = vpop.eup %3327 }
 0x6e6   :  { %v3330_v33 = vpop.eup %3329  ;;  %2499 = vst [vmem:[#allocation2 + $0x10] sm:$0xff] %v3328_v32 }
 0x6e7   :  { %v3332_v34 = vpop.eup %3331  ;;  %2500 = vst [vmem:[#allocation2 + $0x18] sm:$0xff] %v3330_v33  ;;  %v2859_v35 = vpop.f32.mrb[28].mxu1 }
 0x6e8   :  { %v3334_v2 = vpop.eup %3333  ;;  %2506 = vst [vmem:[#allocation2 + $0x48] sm:$0xff] %v3332_v34  ;;  %v2860_v37 = vpop.f32.mrb[29].mxu1 }
 0x6e9   :  { %2507 = vst [vmem:[#allocation2 + $0x50] sm:$0xff] %v3334_v2  ;;  %v2861_v38 = vadd.f32 %v2860_v37, %v2859_v35  ;;  %v2862_v39 = vpop.f32.mrb[30].mxu1 }
 0x6ea   :  { %v2863_v40 = vpop.f32.mrb[31].mxu1 }
 0x6eb   :  { %v2421_v41 = vadd.f32 %v2861_v38, %v1673_v36  ;;  %v2864_v42 = vadd.f32 %v2863_v40, %v2862_v39 }
 0x6ed   :  { %v2433_v43 = vsub.f32 0.0, %v2421_v41  ;;  %v2424_v44 = vadd.f32 %v2864_v42, %v1673_v36 }
 0x6ef   :  { %v2453_v25 = vmul.f32 1.442695, %v2433_v43  ;;  %v2440_v45 = vsub.f32 0.0, %v2424_v44 }
 0x6f1   :  { %3335 = vpow2.f32 %v2453_v25  ;;  %v2467_v46 = vmul.f32 1.442695, %v2440_v45 }
 0x6f3   :  { %3337 = vpow2.f32 %v2467_v46 }
 0x6fb   :  { %v3336_v47 = vpop.eup %3335 }
 0x6fc   :  { %v2475_v48 = vadd.f32 1.0, %v3336_v47 }
 0x6fd   :  { %v3338_v49 = vpop.eup %3337 }
 0x6fe   :  { %3339 = vrcp.f32 %v2475_v48  ;;  %v2482_v3 = vadd.f32 1.0, %v3338_v49 }
 0x700   :  { %3341 = vrcp.f32 %v2482_v3 }
 0x708   :  { %v3340_v50 = vpop.eup %3339 }
 0x709   :  { %2503 = vst.msk [vmem:[#allocation2 + $0x30] sm:$0xff] %vm787_vm3, %v3340_v50 }
 0x70a   :  { %v3342_v51 = vpop.eup %3341 }
 0x70b   :  { %2510 = vst.msk [vmem:[#allocation2 + $0x68] sm:$0xff] %vm787_vm3, %v3342_v51 }
 0x70c   :  { %3376 = shalt.err (!%p3373_p12)
}
 0x70d   :  { %s3377_s25 = scalar_lea.hbm %s4443_s16, 1792 }
 0x70e   :  { %p3378_p13 = scmp.ne.s32.totalorder %s4443_s16, %s3377_s25  ;;  %p3381_p0 = scmp.lt.u32.totalorder %s3377_s25, %s4443_s16 }
 0x710   :  { %p3383_p1 = pnand %p3381_p0, %p3378_p13 }
 0x712   :  { %3386 = shalt.err (!%p3383_p1)
}
 0x713   :  { %s3399_s11 = smov 896   ;;  %s3400_s26 = smov 56  }
 0x714   :  { %2525 = dma.vmem_to_hbm [thread:$0]  %s2520_s13, 1792, %s4443_s16, [#allocation3], %s3399_s11, %s3399_s11, %s3400_s26  }
 0x715   :  { %3387 = dma.done.wait [#allocation3], 1792  }
 0x716   :  { %3388 = vsyncadd [#allocation3], 4294965504 }
 0x717   :  { %3389 = dma.done.wait [#allocation5], 256  }
 0x718   :  { %3390 = vsyncadd [#allocation5], 4294967040 }
 0x719   :  { %2544 = vsyncpa [#allocation3], 1 }
 0x71a   :  { %2545 = vsyncpa [#allocation5], 1 }

// kernel: tpu_custom_call.1
= control target key start
LH: loop header
LB: loop body
LE: loop exit
PB: predicated region body
PF: predicated region fallthrough
CT: control target
= control target key end

     0   :  { %s4427_s0 = inlined_call_operand.vmem [shape: f32[16,784], index: 0, kind: input, shape index: {}]   ;;  %s4428_s1 = inlined_call_operand.vmem [shape: f32[16,10], index: 1, kind: input, shape index: {}]   ;;  %s4429_s2 = inlined_call_operand.vmem [shape: f32[16,16], index: 2, kind: input, shape index: {}]   ;;  %s4430_s3 = inlined_call_operand.vmem [shape: bf16[784,256], index: 3, kind: input, shape index: {}]   ;;  %s4431_s4 = inlined_call_operand.vmem [shape: bf16[10,384], index: 4, kind: input, shape index: {}]   ;;  %s4432_s5 = inlined_call_operand.vmem [shape: f32[1,256], index: 5, kind: input, shape index: {}]   ;;  %s4433_s6 = inlined_call_operand.vmem [shape: bf16[256,128], index: 6, kind: input, shape index: {}]   ;;  %s4434_s7 = inlined_call_operand.vmem [shape: f32[1,128], index: 7, kind: input, shape index: {}]   ;;  %s4435_s8 = inlined_call_operand.vmem [shape: bf16[128,32], index: 8, kind: input, shape index: {}]   ;;  %s4436_s9 = inlined_call_operand.vmem [shape: f32[1,32], index: 9, kind: input, shape index: {}]   ;;  %s4437_s10 = inlined_call_operand.vmem [shape: bf16[16,128], index: 10, kind: input, shape index: {}]   ;;  %s4438_s11 = inlined_call_operand.vmem [shape: f32[1,128], index: 11, kind: input, shape index: {}]   ;;  %s4439_s12 = inlined_call_operand.vmem [shape: bf16[128,256], index: 12, kind: input, shape index: {}]   ;;  %s4440_s13 = inlined_call_operand.vmem [shape: f32[1,256], index: 13, kind: input, shape index: {}]   ;;  %s4441_s14 = inlined_call_operand.vmem [shape: bf16[256,784], index: 14, kind: input, shape index: {}]   ;;  %s4442_s15 = inlined_call_operand.vmem [shape: f32[1,784], index: 15, kind: input, shape index: {}]   ;;  %s4443_s16 = inlined_call_operand.hbm [shape: f32[16,784], index: 16, kind: output, shape index: {0}]   ;;  %s4444_s17 = inlined_call_operand.hbm [shape: f32[16,32], index: 17, kind: output, shape index: {1}]  }
   0x1   :  { %4447 = sst [smem:[#allocation8_spill]] %s4427_s0 }
   0x2   :  { %4448 = sst [smem:[#allocation9_spill]] %s4428_s1 }
   0x3   :  { %23 = vsyncpa [#allocation3], 0  ;;  %v2923_v0 = vld [vmem:[%s4431_s4 + $0x4] ss:$12 sps:$4 sm:$0x1f]   ;;  %vm105_vm0 = vcmask 1044480  }
   0x4   :  { %v2925_v1 = vld [vmem:[%s4431_s4] ss:$12 sps:$4 sm:$0x1f]   ;;  %2549 = vmatprep.subr.msk.bf16.mxu0 %vm105_vm0, %v2923_v0  ;;  %v3391_v2 = vmov 0   ;;  %s4449_s18 = sld [smem:[#allocation9_spill]]  ;;  %vm101_vm1 = vcmask 80896  }
   0x5   :  { %147 = vmatprep.mubr.bf16.mxu0 %v3391_v2  ;;  %v2928_v3 = vld [vmem:[%s4430_s3 + $0x4] ss:$8 sps:$4 sm:$0xff]   ;;  %v107_v4 = vsel %vm105_vm0, %v2925_v1, 0  ;;  %v2926_v7 = vld [vmem:[%s4430_s3] ss:$8 sps:$4 sm:$0xff]   ;;  %s4450_s29 = sld [smem:[#allocation8_spill]] }
   0x6   :  { %116 = vmatpush1.bf16.msra.mxu0 %v107_v4  ;;  %v2931_v9 = vld [vmem:[%s4430_s3 + $0x14] ss:$8 sps:$4 sm:$0xff]   ;;  %v2929_v10 = vld [vmem:[%s4430_s3 + $0x10] ss:$8 sps:$4 sm:$0xff]   ;;  %v2934_v11 = vld [vmem:[%s4430_s3 + $0x24] ss:$8 sps:$4 sm:$0xff]  }
   0x7   :  { %791 = vmatprep.subr.bf16.mxu0 %v2928_v3  ;;  %v2932_v12 = vld [vmem:[%s4430_s3 + $0x20] ss:$8 sps:$4 sm:$0xff]   ;;  %v2937_v13 = vld [vmem:[%s4430_s3 + $0x34] ss:$8 sps:$4 sm:$0xff]   ;;  %v2935_v14 = vld [vmem:[%s4430_s3 + $0x30] ss:$8 sps:$4 sm:$0xff]  }
   0x8   :  { %v2940_v15 = vld [vmem:[%s4430_s3 + $0x44] ss:$8 sps:$4 sm:$0xff]   ;;  %v2938_v16 = vld [vmem:[%s4430_s3 + $0x40] ss:$8 sps:$4 sm:$0xff]   ;;  %v2943_v17 = vld [vmem:[%s4430_s3 + $0x54] ss:$8 sps:$4 sm:$0xff]  }
   0x9   :  { %v2941_v18 = vld [vmem:[%s4430_s3 + $0x50] ss:$8 sps:$4 sm:$0xff]   ;;  %v2946_v21 = vld [vmem:[%s4430_s3 + $0x64] ss:$8 sps:$4 sm:$0xff]   ;;  %v2944_v23 = vld [vmem:[%s4430_s3 + $0x60] ss:$8 sps:$4 sm:$0xff]  }
   0xa   :  { %v79_v5 = vld [vmem:[%s4449_s18] sm:$0xff]  ;;  %v80_v6 = vld [vmem:[%s4449_s18 + $0x8] sm:$0xff]  ;;  %v2949_v24 = vld [vmem:[%s4430_s3 + $0x74] ss:$8 sps:$4 sm:$0xff]   ;;  %v3392_v60 = vmov 0.0   ;;  %vm3393_vm2 = vmmov 0  }
   0xb   :  { %v3512_v8 = vpack.c.bf16 %v80_v6, %v79_v5  ;;  %v59_v19 = vld [vmem:[%s4450_s29 + $0x8] sm:$0xff]  ;;  %v66_v20 = vld [vmem:[%s4450_s29 + $0x40] sm:$0xff]  ;;  %v2947_v25 = vld [vmem:[%s4430_s3 + $0x70] ss:$8 sps:$4 sm:$0xff]   ;;  %2865 = vmatprep.subr.bf16.mxu1 %v3392_v60  ;;  %2867 = vmatprep.mubr.msk.bf16.mxu1 %vm3393_vm2, %v3392_v60 }
   0xc   :  { %v73_v22 = vpack.c.bf16 %v66_v20, %v59_v19  ;;  %v2952_v26 = vld [vmem:[%s4430_s3 + $0x84] ss:$8 sps:$4 sm:$0xff]   ;;  %v2950_v27 = vld [vmem:[%s4430_s3 + $0x80] ss:$8 sps:$4 sm:$0xff]   ;;  %v2955_v28 = vld [vmem:[%s4430_s3 + $0x94] ss:$8 sps:$4 sm:$0xff]  }
   0xd   :  { %2550 = vmatmul.mubr.msk.bf16.vlgmr.msra.gmra.mrb[0].mxu0 %vm101_vm1, %v3512_v8  ;;  %v2953_v29 = vld [vmem:[%s4430_s3 + $0x90] ss:$8 sps:$4 sm:$0xff]   ;;  %v2958_v30 = vld [vmem:[%s4430_s3 + $0xa4] ss:$8 sps:$4 sm:$0xff]   ;;  %v2956_v31 = vld [vmem:[%s4430_s3 + $0xa0] ss:$8 sps:$4 sm:$0xff]  }
   0xe   :  { %792 = vmatpush1.bf16.msra.mxu0 %v2926_v7  ;;  %823 = vmatprep.mubr.bf16.mxu0 %v73_v22  ;;  %v2961_v32 = vld [vmem:[%s4430_s3 + $0xb4] ss:$8 sps:$4 sm:$0xff]   ;;  %v2959_v33 = vld [vmem:[%s4430_s3 + $0xb0] ss:$8 sps:$4 sm:$0xff]   ;;  %v2964_v34 = vld [vmem:[%s4430_s3 + $0xc4] ss:$8 sps:$4 sm:$0xff]  }
   0xf   :  { %793 = vmatprep.subr.bf16.mxu0 %v2931_v9  ;;  %v2962_v35 = vld [vmem:[%s4430_s3 + $0xc0] ss:$8 sps:$4 sm:$0xff]   ;;  %v2967_v36 = vld [vmem:[%s4430_s3 + $0xd4] ss:$8 sps:$4 sm:$0xff]   ;;  %v2965_v37 = vld [vmem:[%s4430_s3 + $0xd0] ss:$8 sps:$4 sm:$0xff]  }
  0x10   :  { %v2970_v38 = vld [vmem:[%s4430_s3 + $0xe4] ss:$8 sps:$4 sm:$0xff]   ;;  %v2968_v39 = vld [vmem:[%s4430_s3 + $0xe0] ss:$8 sps:$4 sm:$0xff]   ;;  %v2973_v40 = vld [vmem:[%s4430_s3 + $0xf4] ss:$8 sps:$4 sm:$0xff]  }
  0x11   :  { %v2971_v41 = vld [vmem:[%s4430_s3 + $0xf0] ss:$8 sps:$4 sm:$0xff]   ;;  %v2976_v42 = vld [vmem:[%s4430_s3 + $0x104] ss:$8 sps:$4 sm:$0xff]   ;;  %v2974_v48 = vld [vmem:[%s4430_s3 + $0x100] ss:$8 sps:$4 sm:$0xff]  }
  0x12   :  { %794 = vmatpush1.bf16.msra.mxu0 %v2929_v10  ;;  %v58_v43 = vld [vmem:[%s4450_s29] sm:$0xff]  ;;  %v65_v44 = vld [vmem:[%s4450_s29 + $0x38] sm:$0xff]  ;;  %v68_v46 = vld [vmem:[%s4450_s29 + $0x50] sm:$0xff] }
  0x13   :  { %795 = vmatprep.subr.bf16.mxu0 %v2934_v11  ;;  %v61_v45 = vld [vmem:[%s4450_s29 + $0x18] sm:$0xff]  ;;  %v72_v47 = vpack.c.bf16 %v65_v44, %v58_v43  ;;  %v2982_v52 = vld [vmem:[%s4430_s3 + $0x124] ss:$8 sps:$4 sm:$0xff]   ;;  %v2980_v53 = vld [vmem:[%s4430_s3 + $0x120] ss:$8 sps:$4 sm:$0xff]  }
  0x14   :  { %v75_v49 = vpack.c.bf16 %v68_v46, %v61_v45  ;;  %v2979_v50 = vld [vmem:[%s4430_s3 + $0x114] ss:$8 sps:$4 sm:$0xff]   ;;  %v2977_v51 = vld [vmem:[%s4430_s3 + $0x110] ss:$8 sps:$4 sm:$0xff]   ;;  %v2988_v56 = vld [vmem:[%s4430_s3 + $0x144] ss:$8 sps:$4 sm:$0xff]  }
  0x15   :  { %v2985_v54 = vld [vmem:[%s4430_s3 + $0x134] ss:$8 sps:$4 sm:$0xff]   ;;  %v2983_v55 = vld [vmem:[%s4430_s3 + $0x130] ss:$8 sps:$4 sm:$0xff]   ;;  %v3074_v58 = vld [vmem:[%s4433_s6 + $0x40] sm:$0xff]  }
  0x16   :  { %796 = vmatpush1.bf16.msra.mxu0 %v2932_v12  ;;  %v3073_v57 = vld [vmem:[%s4431_s4 + $0x8] ss:$12 sps:$4 sm:$0x1f]   ;;  %v2989_v63 = vld [vmem:[%s4430_s3 + $0x150] ss:$8 sps:$4 sm:$0xff]   ;;  %v3075_v0 = vld [vmem:[%s4433_s6] sm:$0xff]  }
  0x17   :  { %797 = vmatprep.subr.bf16.mxu0 %v2937_v13  ;;  %v2986_v59 = vld [vmem:[%s4430_s3 + $0x140] ss:$8 sps:$4 sm:$0xff]   ;;  %v2991_v61 = vld [vmem:[%s4430_s3 + $0x154] ss:$8 sps:$4 sm:$0xff]   ;;  %v113_v62 = vsel %vm105_vm0, %v3073_v57, 0 }
  0x18   :  { %2866 = vmatpush3.bf16.msra.mxu1 %v113_v62  ;;  %v2994_v1 = vld [vmem:[%s4430_s3 + $0x164] ss:$8 sps:$4 sm:$0xff]   ;;  %v3078_v5 = vld [vmem:[%s4433_s6 + $0x50] sm:$0xff]   ;;  %v2992_v6 = vld [vmem:[%s4430_s3 + $0x160] ss:$8 sps:$4 sm:$0xff]  }
  0x19   :  { %2810 = vmatprep.subr.bf16.mxu1 %v3074_v58  ;;  %v3076_v3 = vld [vmem:[%s4433_s6 + $0x48] sm:$0xff]   ;;  %v2997_v7 = vld [vmem:[%s4430_s3 + $0x174] ss:$8 sps:$4 sm:$0xff]   ;;  %v2995_v10 = vld [vmem:[%s4430_s3 + $0x170] ss:$8 sps:$4 sm:$0xff]  }
  0x1a   :  { %798 = vmatpush1.bf16.msra.mxu0 %v2935_v14  ;;  %v3077_v4 = vld [vmem:[%s4433_s6 + $0x8] sm:$0xff]   ;;  %v3079_v9 = vld [vmem:[%s4433_s6 + $0x10] sm:$0xff]   ;;  %v3081_v12 = vld [vmem:[%s4433_s6 + $0x18] sm:$0xff]  }
  0x1b   :  { %799 = vmatprep.subr.bf16.mxu0 %v2940_v15  ;;  %2868 = vmatmul.mubr.msk.bf16.vlgmr.msra.gmra.mrb[0].mxu1 %vm101_vm1, %v3512_v8  ;;  %v3080_v8 = vld [vmem:[%s4433_s6 + $0x58] sm:$0xff]   ;;  %v3000_v11 = vld [vmem:[%s4430_s3 + $0x184] ss:$8 sps:$4 sm:$0xff]   ;;  %v2998_v14 = vld [vmem:[%s4430_s3 + $0x180] ss:$8 sps:$4 sm:$0xff]  }
  0x1c   :  { %2811 = vmatpush3.bf16.msra.mxu1 %v3075_v0  ;;  %v3082_v13 = vld [vmem:[%s4433_s6 + $0x60] sm:$0xff]   ;;  %v3003_v15 = vld [vmem:[%s4430_s3 + $0x194] ss:$8 sps:$4 sm:$0xff]   ;;  %v3007_v22 = vld [vmem:[%s4430_s3 + $0x1b0] ss:$8 sps:$4 sm:$0xff]  }
  0x1d   :  { %2812 = vmatprep.subr.bf16.mxu1 %v3076_v3  ;;  %v3006_v19 = vld [vmem:[%s4430_s3 + $0x1a4] ss:$8 sps:$4 sm:$0xff]   ;;  %v3004_v20 = vld [vmem:[%s4430_s3 + $0x1a0] ss:$8 sps:$4 sm:$0xff]   ;;  %v3033_v43 = vld [vmem:[%s4430_s3 + $0x234] ss:$8 sps:$4 sm:$0xff]  }
  0x1e   :  { %800 = vmatpush1.bf16.msra.mxu0 %v2938_v16  ;;  %v3083_v16 = vld [vmem:[%s4433_s6 + $0x20] sm:$0xff]  }
  0x1f   :  { %801 = vmatprep.subr.bf16.mxu0 %v2943_v17  ;;  %v3084_v17 = vld [vmem:[%s4433_s6 + $0x68] sm:$0xff]  }
  0x20   :  { %2813 = vmatpush3.bf16.msra.mxu1 %v3077_v4 }
  0x21   :  { %2814 = vmatprep.subr.bf16.mxu1 %v3078_v5 }
  0x22   :  { %802 = vmatpush1.bf16.msra.mxu0 %v2941_v18  ;;  %v3001_v18 = vld [vmem:[%s4430_s3 + $0x190] ss:$8 sps:$4 sm:$0xff]  }
  0x23   :  { %803 = vmatprep.subr.bf16.mxu0 %v2946_v21  ;;  %v3009_v21 = vld [vmem:[%s4430_s3 + $0x1b4] ss:$8 sps:$4 sm:$0xff]  }
  0x24   :  { %2815 = vmatpush3.bf16.msra.mxu1 %v3079_v9 }
  0x25   :  { %2816 = vmatprep.subr.bf16.mxu1 %v3080_v8 }
  0x26   :  { %804 = vmatpush1.bf16.msra.mxu0 %v2944_v23  ;;  %v3012_v23 = vld [vmem:[%s4430_s3 + $0x1c4] ss:$8 sps:$4 sm:$0xff]  }
  0x27   :  { %805 = vmatprep.subr.bf16.mxu0 %v2949_v24  ;;  %v3010_v24 = vld [vmem:[%s4430_s3 + $0x1c0] ss:$8 sps:$4 sm:$0xff]  }
  0x28   :  { %2817 = vmatpush3.bf16.msra.mxu1 %v3081_v12 }
  0x29   :  { %2818 = vmatprep.subr.bf16.mxu1 %v3082_v13 }
  0x2a   :  { %806 = vmatpush1.bf16.msra.mxu0 %v2947_v25  ;;  %v3015_v25 = vld [vmem:[%s4430_s3 + $0x1d4] ss:$8 sps:$4 sm:$0xff]  }
  0x2b   :  { %807 = vmatprep.subr.bf16.mxu0 %v2952_v26  ;;  %v3013_v26 = vld [vmem:[%s4430_s3 + $0x1d0] ss:$8 sps:$4 sm:$0xff]  }
  0x2c   :  { %2819 = vmatpush3.bf16.msra.mxu1 %v3083_v16 }
  0x2d   :  { %2820 = vmatprep.subr.bf16.mxu1 %v3084_v17 }
  0x2e   :  { %808 = vmatpush1.bf16.msra.mxu0 %v2950_v27  ;;  %v3018_v27 = vld [vmem:[%s4430_s3 + $0x1e4] ss:$8 sps:$4 sm:$0xff]  }
  0x2f   :  { %809 = vmatprep.subr.bf16.mxu0 %v2955_v28  ;;  %v3016_v28 = vld [vmem:[%s4430_s3 + $0x1e0] ss:$8 sps:$4 sm:$0xff]  }
  0x32   :  { %810 = vmatpush1.bf16.msra.mxu0 %v2953_v29  ;;  %v3021_v29 = vld [vmem:[%s4430_s3 + $0x1f4] ss:$8 sps:$4 sm:$0xff]  }
  0x33   :  { %811 = vmatprep.subr.bf16.mxu0 %v2958_v30  ;;  %v3019_v30 = vld [vmem:[%s4430_s3 + $0x1f0] ss:$8 sps:$4 sm:$0xff]  }
  0x36   :  { %812 = vmatpush1.bf16.msra.mxu0 %v2956_v31  ;;  %v60_v31 = vld [vmem:[%s4450_s29 + $0x10] sm:$0xff] }
  0x37   :  { %813 = vmatprep.subr.bf16.mxu0 %v2961_v32  ;;  %v67_v32 = vld [vmem:[%s4450_s29 + $0x48] sm:$0xff] }
  0x3a   :  { %814 = vmatpush1.bf16.msra.mxu0 %v2959_v33  ;;  %v3024_v33 = vld [vmem:[%s4430_s3 + $0x204] ss:$8 sps:$4 sm:$0xff]  }
  0x3b   :  { %815 = vmatprep.subr.bf16.mxu0 %v2964_v34  ;;  %v63_v34 = vld [vmem:[%s4450_s29 + $0x28] sm:$0xff] }
  0x3e   :  { %816 = vmatpush1.bf16.msra.mxu0 %v2962_v35  ;;  %v70_v35 = vld [vmem:[%s4450_s29 + $0x60] sm:$0xff] }
  0x3f   :  { %817 = vmatprep.subr.bf16.mxu0 %v2967_v36  ;;  %v3022_v36 = vld [vmem:[%s4430_s3 + $0x200] ss:$8 sps:$4 sm:$0xff]  }
  0x42   :  { %818 = vmatpush1.bf16.msra.mxu0 %v2965_v37  ;;  %v74_v37 = vpack.c.bf16 %v67_v32, %v60_v31 }
  0x43   :  { %819 = vmatprep.subr.bf16.mxu0 %v2970_v38  ;;  %v3027_v38 = vld [vmem:[%s4430_s3 + $0x214] ss:$8 sps:$4 sm:$0xff]  }
  0x46   :  { %820 = vmatpush1.bf16.msra.mxu0 %v2968_v39  ;;  %v77_v39 = vpack.c.bf16 %v70_v35, %v63_v34 }
  0x47   :  { %821 = vmatprep.subr.bf16.mxu0 %v2973_v40  ;;  %v3025_v40 = vld [vmem:[%s4430_s3 + $0x210] ss:$8 sps:$4 sm:$0xff]  }
  0x4a   :  { %822 = vmatpush1.bf16.msra.mxu0 %v2971_v41  ;;  %v3030_v41 = vld [vmem:[%s4430_s3 + $0x224] ss:$8 sps:$4 sm:$0xff]  }
  0x4b   :  { %834 = vmatprep.subr.bf16.mxu0 %v2976_v42  ;;  %v3028_v42 = vld [vmem:[%s4430_s3 + $0x220] ss:$8 sps:$4 sm:$0xff]  }
  0x4d   :  { %824 = vmatmul.mubr.bf16.vlgmr.msra.gmra.mrb[0].mxu0 %v72_v47 }
  0x4e   :  { %835 = vmatpush1.bf16.msra.mxu0 %v2974_v48  ;;  %866 = vmatprep.mubr.bf16.mxu0 %v75_v49 }
  0x4f   :  { %836 = vmatprep.subr.bf16.mxu0 %v2979_v50 }
  0x52   :  { %837 = vmatpush1.bf16.msra.mxu0 %v2977_v51 }
  0x53   :  { %838 = vmatprep.subr.bf16.mxu0 %v2982_v52 }
  0x56   :  { %839 = vmatpush1.bf16.msra.mxu0 %v2980_v53 }
  0x57   :  { %840 = vmatprep.subr.bf16.mxu0 %v2985_v54 }
  0x5a   :  { %841 = vmatpush1.bf16.msra.mxu0 %v2983_v55 }
  0x5b   :  { %842 = vmatprep.subr.bf16.mxu0 %v2988_v56 }
  0x5e   :  { %843 = vmatpush1.bf16.msra.mxu0 %v2986_v59 }
  0x5f   :  { %844 = vmatprep.subr.bf16.mxu0 %v2991_v61 }
  0x62   :  { %845 = vmatpush1.bf16.msra.mxu0 %v2989_v63 }
  0x63   :  { %846 = vmatprep.subr.bf16.mxu0 %v2994_v1 }
  0x66   :  { %847 = vmatpush1.bf16.msra.mxu0 %v2992_v6 }
  0x67   :  { %848 = vmatprep.subr.bf16.mxu0 %v2997_v7 }
  0x6a   :  { %849 = vmatpush1.bf16.msra.mxu0 %v2995_v10 }
  0x6b   :  { %850 = vmatprep.subr.bf16.mxu0 %v3000_v11 }
  0x6e   :  { %851 = vmatpush1.bf16.msra.mxu0 %v2998_v14 }
  0x6f   :  { %852 = vmatprep.subr.bf16.mxu0 %v3003_v15 }
  0x72   :  { %853 = vmatpush1.bf16.msra.mxu0 %v3001_v18 }
  0x73   :  { %854 = vmatprep.subr.bf16.mxu0 %v3006_v19 }
  0x76   :  { %855 = vmatpush1.bf16.msra.mxu0 %v3004_v20 }
  0x77   :  { %856 = vmatprep.subr.bf16.mxu0 %v3009_v21 }
  0x7a   :  { %857 = vmatpush1.bf16.msra.mxu0 %v3007_v22 }
  0x7b   :  { %858 = vmatprep.subr.bf16.mxu0 %v3012_v23 }
  0x7e   :  { %859 = vmatpush1.bf16.msra.mxu0 %v3010_v24 }
  0x7f   :  { %860 = vmatprep.subr.bf16.mxu0 %v3015_v25 }
  0x82   :  { %861 = vmatpush1.bf16.msra.mxu0 %v3013_v26 }
  0x83   :  { %862 = vmatprep.subr.bf16.mxu0 %v3018_v27 }
  0x86   :  { %863 = vmatpush1.bf16.msra.mxu0 %v3016_v28 }
  0x87   :  { %864 = vmatprep.subr.bf16.mxu0 %v3021_v29 }
  0x8a   :  { %865 = vmatpush1.bf16.msra.mxu0 %v3019_v30 }
  0x8b   :  { %877 = vmatprep.subr.bf16.mxu0 %v3024_v33 }
  0x8d   :  { %867 = vmatmul.mubr.bf16.vlgmr.msra.gmra.mrb[0].mxu0 %v74_v37 }
  0x8e   :  { %878 = vmatpush1.bf16.msra.mxu0 %v3022_v36  ;;  %909 = vmatprep.mubr.bf16.mxu0 %v77_v39 }
  0x8f   :  { %879 = vmatprep.subr.bf16.mxu0 %v3027_v38 }
  0x92   :  { %880 = vmatpush1.bf16.msra.mxu0 %v3025_v40 }
  0x93   :  { %881 = vmatprep.subr.bf16.mxu0 %v3030_v41 }
  0x94   :  { %24 = vsyncpa [#allocation5], 0  ;;  %v3031_v44 = vld [vmem:[%s4430_s3 + $0x230] ss:$8 sps:$4 sm:$0xff]   ;;  %v3036_v45 = vld [vmem:[%s4430_s3 + $0x244] ss:$8 sps:$4 sm:$0xff]   ;;  %v965_v24 = vlaneseq }
  0x95   :  { %v3034_v46 = vld [vmem:[%s4430_s3 + $0x240] ss:$8 sps:$4 sm:$0xff]   ;;  %v3039_v47 = vld [vmem:[%s4430_s3 + $0x254] ss:$8 sps:$4 sm:$0xff]   ;;  %v3037_v48 = vld [vmem:[%s4430_s3 + $0x250] ss:$8 sps:$4 sm:$0xff]  }
  0x96   :  { %882 = vmatpush1.bf16.msra.mxu0 %v3028_v42  ;;  %v3042_v49 = vld [vmem:[%s4430_s3 + $0x264] ss:$8 sps:$4 sm:$0xff]   ;;  %v3040_v50 = vld [vmem:[%s4430_s3 + $0x260] ss:$8 sps:$4 sm:$0xff]   ;;  %v3045_v51 = vld [vmem:[%s4430_s3 + $0x274] ss:$8 sps:$4 sm:$0xff]  }
  0x97   :  { %883 = vmatprep.subr.bf16.mxu0 %v3033_v43  ;;  %v3043_v52 = vld [vmem:[%s4430_s3 + $0x270] ss:$8 sps:$4 sm:$0xff]   ;;  %v3048_v53 = vld [vmem:[%s4430_s3 + $0x284] ss:$8 sps:$4 sm:$0xff]   ;;  %v3046_v54 = vld [vmem:[%s4430_s3 + $0x280] ss:$8 sps:$4 sm:$0xff]  }
  0x98   :  { %v3051_v55 = vld [vmem:[%s4430_s3 + $0x294] ss:$8 sps:$4 sm:$0xff]   ;;  %v3049_v56 = vld [vmem:[%s4430_s3 + $0x290] ss:$8 sps:$4 sm:$0xff]   ;;  %v3054_v57 = vld [vmem:[%s4430_s3 + $0x2a4] ss:$8 sps:$4 sm:$0xff]  }
  0x99   :  { %v3052_v58 = vld [vmem:[%s4430_s3 + $0x2a0] ss:$8 sps:$4 sm:$0xff]   ;;  %v3057_v59 = vld [vmem:[%s4430_s3 + $0x2b4] ss:$8 sps:$4 sm:$0xff]   ;;  %v3055_v61 = vld [vmem:[%s4430_s3 + $0x2b0] ss:$8 sps:$4 sm:$0xff]  }
  0x9a   :  { %884 = vmatpush1.bf16.msra.mxu0 %v3031_v44  ;;  %v3060_v62 = vld [vmem:[%s4430_s3 + $0x2c4] ss:$8 sps:$4 sm:$0xff]   ;;  %v3058_v63 = vld [vmem:[%s4430_s3 + $0x2c0] ss:$8 sps:$4 sm:$0xff]   ;;  %v3063_v0 = vld [vmem:[%s4430_s3 + $0x2d4] ss:$8 sps:$4 sm:$0xff]  }
  0x9b   :  { %885 = vmatprep.subr.bf16.mxu0 %v3036_v45  ;;  %v3061_v1 = vld [vmem:[%s4430_s3 + $0x2d0] ss:$8 sps:$4 sm:$0xff]   ;;  %v3066_v3 = vld [vmem:[%s4430_s3 + $0x2e4] ss:$8 sps:$4 sm:$0xff]   ;;  %v3064_v4 = vld [vmem:[%s4430_s3 + $0x2e0] ss:$8 sps:$4 sm:$0xff]  }
  0x9c   :  { %v3069_v5 = vld [vmem:[%s4430_s3 + $0x2f4] ss:$8 sps:$4 sm:$0xff]   ;;  %v3067_v6 = vld [vmem:[%s4430_s3 + $0x2f0] ss:$8 sps:$4 sm:$0xff]   ;;  %v62_v7 = vld [vmem:[%s4450_s29 + $0x20] sm:$0xff]  ;;  %vm787_vm3 = vcmask 130048  }
  0x9d   :  { %v69_v9 = vld [vmem:[%s4450_s29 + $0x58] sm:$0xff]  ;;  %v3072_v8 = vld [vmem:[%s4430_s3 + $0x304] ss:$8 sps:$4 sm:$0xff]   ;;  %v3070_v11 = vld [vmem:[%s4430_s3 + $0x300] ss:$8 sps:$4 sm:$0xff]   ;;  %v3910_v25 = vshrl.u32 %v965_v24, 7 }
  0x9e   :  { %886 = vmatpush1.bf16.msra.mxu0 %v3034_v46  ;;  %v76_v10 = vpack.c.bf16 %v69_v9, %v62_v7  ;;  %v64_v12 = vld [vmem:[%s4450_s29 + $0x30] sm:$0xff]  ;;  %v71_v13 = vld [vmem:[%s4450_s29 + $0x68] sm:$0xff]  ;;  %v3088_v18 = vld [vmem:[%s4433_s6 + $0x78] sm:$0xff]   ;;  %vm2511_vm4 = vcmask 261120   ;;  %s3394_s26 = smov 112  }
  0x9f   :  { %887 = vmatprep.subr.bf16.mxu0 %v3039_v47  ;;  %v78_v14 = vpack.c.bf16 %v71_v13, %v64_v12  ;;  %v3085_v15 = vld [vmem:[%s4433_s6 + $0x28] sm:$0xff]   ;;  %v3086_v16 = vld [vmem:[%s4433_s6 + $0x70] sm:$0xff]   ;;  %v3089_v19 = vld [vmem:[%s4433_s6 + $0x38] sm:$0xff]   ;;  %v3913_v26 = vsub.s32 0, %v3910_v25  ;;  %v3919_v28 = vsub.s32 1, %v3910_v25 }
  0xa0   :  { %2821 = vmatpush3.bf16.msra.mxu1 %v3085_v15  ;;  %v3087_v17 = vld [vmem:[%s4433_s6 + $0x30] sm:$0xff]   ;;  %v963_v27 = vld [vmem:[%s4432_s5] sm:$0x3]  ;;  %v3091_v46 = vld [vmem:[%s4435_s8 + $0x8] sm:$0xff]  }
  0xa1   :  { %2822 = vmatprep.subr.bf16.mxu1 %v3086_v16  ;;  %v968_v29 = vrot.slane %v963_v27, %v3913_v26  ;;  %v972_v30 = vrot.slane %v963_v27, %v3919_v28  ;;  %v3090_v45 = vld [vmem:[%s4435_s8] sm:$0xff]   ;;  %v3092_v47 = vld [vmem:[%s4435_s8 + $0x10] sm:$0xff]  }
  0xa2   :  { %888 = vmatpush1.bf16.msra.mxu0 %v3037_v48  ;;  %v3093_v48 = vld [vmem:[%s4435_s8 + $0x18] sm:$0xff]  }
  0xa3   :  { %889 = vmatprep.subr.bf16.mxu0 %v3042_v49  ;;  %v3094_v49 = vld [vmem:[%s4435_s8 + $0x20] sm:$0xff]  }
  0xa4   :  { %2823 = vmatpush3.bf16.msra.mxu1 %v3087_v17  ;;  %v82_v17 = vld [vmem:[%s4429_s2] sm:$0xff] }
  0xa5   :  { %2824 = vmatprep.subr.bf16.mxu1 %v3088_v18 }
  0xa6   :  { %890 = vmatpush1.bf16.msra.mxu0 %v3040_v50  ;;  %v3095_v50 = vld [vmem:[%s4435_s8 + $0x28] sm:$0xff]  }
  0xa7   :  { %891 = vmatprep.subr.bf16.mxu0 %v3045_v51  ;;  %v3096_v51 = vld [vmem:[%s4435_s8 + $0x30] sm:$0xff]  }
  0xa8   :  { %2825 = vmatpush3.bf16.msra.mxu1 %v3089_v19  ;;  %v83_v19 = vld [vmem:[%s4429_s2 + $0x8] sm:$0xff] }
  0xa9   :  { %2871 = vmatprep.subr.bf16.mxu1 %v3392_v60 }
  0xaa   :  { %892 = vmatpush1.bf16.msra.mxu0 %v3043_v52  ;;  %v3097_v52 = vld [vmem:[%s4435_s8 + $0x38] sm:$0xff]  }
  0xab   :  { %893 = vmatprep.subr.bf16.mxu0 %v3048_v53 }
  0xae   :  { %894 = vmatpush1.bf16.msra.mxu0 %v3046_v54  ;;  %v2651_v54 = vld [vmem:[%s4434_s7] ss:$0 sm:$0xff] }
  0xaf   :  { %895 = vmatprep.subr.bf16.mxu0 %v3051_v55 }
  0xb2   :  { %896 = vmatpush1.bf16.msra.mxu0 %v3049_v56 }
  0xb3   :  { %897 = vmatprep.subr.bf16.mxu0 %v3054_v57 }
  0xb6   :  { %898 = vmatpush1.bf16.msra.mxu0 %v3052_v58 }
  0xb7   :  { %899 = vmatprep.subr.bf16.mxu0 %v3057_v59 }
  0xba   :  { %900 = vmatpush1.bf16.msra.mxu0 %v3055_v61 }
  0xbb   :  { %901 = vmatprep.subr.bf16.mxu0 %v3060_v62 }
  0xbe   :  { %902 = vmatpush1.bf16.msra.mxu0 %v3058_v63 }
  0xbf   :  { %903 = vmatprep.subr.bf16.mxu0 %v3063_v0 }
  0xc2   :  { %904 = vmatpush1.bf16.msra.mxu0 %v3061_v1 }
  0xc3   :  { %905 = vmatprep.subr.bf16.mxu0 %v3066_v3  ;;  %v2668_v3 = vld [vmem:[%s4436_s9] ss:$0 sm:$0xff] }
  0xc6   :  { %906 = vmatpush1.bf16.msra.mxu0 %v3064_v4 }
  0xc7   :  { %907 = vmatprep.subr.bf16.mxu0 %v3069_v5 }
  0xca   :  { %908 = vmatpush1.bf16.msra.mxu0 %v3067_v6 }
  0xcb   :  { %920 = vmatprep.subr.bf16.mxu0 %v3072_v8 }
  0xcd   :  { %910 = vmatmul.mubr.bf16.vlgmr.msra.gmra.mrb[0].mxu0 %v76_v10 }
  0xce   :  { %921 = vmatpush1.bf16.msra.mxu0 %v3070_v11  ;;  %952 = vmatprep.mubr.bf16.mxu0 %v3391_v2 }
  0xd9   :  { %2650 = vmatmul.mubr.msk.bf16.vlgmr.msra.gmra.mrb[0].mxu0 %vm787_vm3, %v78_v14  ;;  %v3101_v14 = vld [vmem:[%s4439_s12 + $0x4] ss:$8 sps:$4 sm:$0xff]  }
  0xee   :  { %v3906_v20 = vpop.f32.mrb[0].mxu1 }
  0xef   :  { %v2869_v21 = vpop.f32.mrb[1].mxu1 }
  0xf0   :  { %v3908_v22 = vpop.f32.mrb[2].mxu1 }
  0xf1   :  { %v2870_v23 = vpop.f32.mrb[3].mxu1 }
 0x1ac   :  { %v954_v31 = vpop.f32.mrb[0].mxu0 }
 0x1ad   :  { %v975_v32 = vadd.f32 %v968_v29, %v954_v31  ;;  %v956_v33 = vpop.f32.mrb[1].mxu0 }
 0x1ae   :  { %v976_v34 = vadd.f32 %v972_v30, %v956_v33  ;;  %v958_v35 = vpop.f32.mrb[2].mxu0  ;;  %v3102_v33 = vld [vmem:[%s4439_s12 + $0x10] ss:$8 sps:$4 sm:$0xff]  }
 0x1af   :  { %v977_v36 = vadd.f32 %v968_v29, %v958_v35  ;;  %v960_v37 = vpop.f32.mrb[3].mxu0  ;;  %v979_v39 = vmax.f32 %v975_v32, 0.0  ;;  %v3104_v32 = vld [vmem:[%s4439_s12 + $0x14] ss:$8 sps:$4 sm:$0xff]   ;;  %v3105_v35 = vld [vmem:[%s4439_s12 + $0x20] ss:$8 sps:$4 sm:$0xff]  }
 0x1b0   :  { %v978_v38 = vadd.f32 %v972_v30, %v960_v37  ;;  %v980_v41 = vmax.f32 %v976_v34, 0.0  ;;  %v3099_v30 = vld [vmem:[%s4439_s12] ss:$8 sps:$4 sm:$0xff]   ;;  %v3107_v34 = vld [vmem:[%s4439_s12 + $0x24] ss:$8 sps:$4 sm:$0xff]  }
 0x1b1   :  { %v981_v40 = vmax.f32 %v977_v36, 0.0  ;;  %v3110_v36 = vld [vmem:[%s4439_s12 + $0x34] ss:$8 sps:$4 sm:$0xff]   ;;  %v3113_v37 = vld [vmem:[%s4439_s12 + $0x44] ss:$8 sps:$4 sm:$0xff]  }
 0x1b2   :  { %v982_v42 = vmax.f32 %v978_v38, 0.0  ;;  %v3111_v38 = vld [vmem:[%s4439_s12 + $0x40] ss:$8 sps:$4 sm:$0xff]  }
 0x1b3   :  { %v983_v43 = vpack.c.bf16 %v981_v40, %v979_v39  ;;  %v3116_v39 = vld [vmem:[%s4439_s12 + $0x54] ss:$8 sps:$4 sm:$0xff]   ;;  %v3114_v40 = vld [vmem:[%s4439_s12 + $0x50] ss:$8 sps:$4 sm:$0xff]  }
 0x1b4   :  { %v984_v44 = vpack.c.bf16 %v982_v42, %v980_v41  ;;  %v3119_v41 = vld [vmem:[%s4439_s12 + $0x64] ss:$8 sps:$4 sm:$0xff]   ;;  %v3117_v42 = vld [vmem:[%s4439_s12 + $0x60] ss:$8 sps:$4 sm:$0xff]  }
 0x1b6   :  { %1152 = vmatprep.mubr.bf16.mxu1 %v984_v44  ;;  %v3120_v44 = vld [vmem:[%s4439_s12 + $0x70] ss:$8 sps:$4 sm:$0xff]  }
 0x1b7   :  { %1153 = vmatmul.mubr.bf16.vlgmr.msra.gmra.mrb[4].mxu1 %v983_v43  ;;  %v3122_v43 = vld [vmem:[%s4439_s12 + $0x74] ss:$8 sps:$4 sm:$0xff]  }
 0x1b8   :  { %2872 = vmatpush3.bf16.msra.mxu1 %v3090_v45  ;;  %2887 = vmatprep.mubr.msk.bf16.mxu1 %vm3393_vm2, %v3392_v60  ;;  %v3125_v45 = vld [vmem:[%s4441_s14 + $0x4] ss:$28 sps:$4 sm:$0xff]  }
 0x1b9   :  { %2873 = vmatprep.subr.bf16.mxu1 %v3392_v60 }
 0x1bc   :  { %2874 = vmatpush3.bf16.msra.mxu1 %v3091_v46  ;;  %v3126_v46 = vld [vmem:[%s4441_s14 + $0x10] ss:$28 sps:$4 sm:$0xff]  }
 0x1bd   :  { %2875 = vmatprep.subr.bf16.mxu1 %v3392_v60 }
 0x1c0   :  { %2876 = vmatpush3.bf16.msra.mxu1 %v3092_v47  ;;  %v3128_v47 = vld [vmem:[%s4441_s14 + $0x14] ss:$28 sps:$4 sm:$0xff]  }
 0x1c1   :  { %2877 = vmatprep.subr.bf16.mxu1 %v3392_v60  ;;  %2343 = vmatprep.subr.bf16.mxu0 %v3128_v47  ;;  %v3189_v47 = vld [vmem:[%s4441_s14 + $0x268] ss:$28 sps:$4 sm:$0xff]  }
 0x1c2   :  { %2344 = vmatpush1.bf16.msra.mxu0 %v3126_v46  ;;  %v3191_v46 = vld [vmem:[%s4441_s14 + $0x26c] ss:$28 sps:$4 sm:$0xff]  }
 0x1c4   :  { %2878 = vmatpush3.bf16.msra.mxu1 %v3093_v48  ;;  %v3132_v48 = vld [vmem:[%s4441_s14 + $0x48] ss:$28 sps:$4 sm:$0xff]  }
 0x1c5   :  { %2879 = vmatprep.subr.bf16.mxu1 %v3392_v60 }
 0x1c8   :  { %2880 = vmatpush3.bf16.msra.mxu1 %v3094_v49  ;;  %v3134_v49 = vld [vmem:[%s4441_s14 + $0x4c] ss:$28 sps:$4 sm:$0xff]  }
 0x1c9   :  { %2881 = vmatprep.subr.bf16.mxu1 %v3392_v60  ;;  %2345 = vmatprep.subr.bf16.mxu0 %v3134_v49  ;;  %v3195_v49 = vld [vmem:[%s4441_s14 + $0x2a0] ss:$28 sps:$4 sm:$0xff]  }
 0x1ca   :  { %2346 = vmatpush1.bf16.msra.mxu0 %v3132_v48  ;;  %v3197_v48 = vld [vmem:[%s4441_s14 + $0x2a4] ss:$28 sps:$4 sm:$0xff]  }
 0x1cc   :  { %2882 = vmatpush3.bf16.msra.mxu1 %v3095_v50  ;;  %v3138_v50 = vld [vmem:[%s4441_s14 + $0x80] ss:$28 sps:$4 sm:$0xff]  }
 0x1cd   :  { %2883 = vmatprep.subr.bf16.mxu1 %v3392_v60 }
 0x1d0   :  { %2884 = vmatpush3.bf16.msra.mxu1 %v3096_v51  ;;  %v3140_v51 = vld [vmem:[%s4441_s14 + $0x84] ss:$28 sps:$4 sm:$0xff]  }
 0x1d1   :  { %2885 = vmatprep.subr.bf16.mxu1 %v3392_v60  ;;  %2347 = vmatprep.subr.bf16.mxu0 %v3140_v51  ;;  %v3201_v51 = vld [vmem:[%s4441_s14 + $0x2d8] ss:$28 sps:$4 sm:$0xff]  }
 0x1d2   :  { %2348 = vmatpush1.bf16.msra.mxu0 %v3138_v50  ;;  %v3203_v50 = vld [vmem:[%s4441_s14 + $0x2dc] ss:$28 sps:$4 sm:$0xff]  }
 0x1d4   :  { %2886 = vmatpush3.bf16.msra.mxu1 %v3097_v52  ;;  %v3144_v52 = vld [vmem:[%s4441_s14 + $0xb8] ss:$28 sps:$4 sm:$0xff]  }
 0x1d5   :  { %2891 = vmatprep.subr.bf16.mxu1 %v3392_v60 }
 0x28a   :  { %v2826_v53 = vpop.f32.mrb[4].mxu1 }
 0x28b   :  { %v2827_v55 = vpop.f32.mrb[5].mxu1 }
 0x28c   :  { %v2828_v56 = vadd.f32 %v2827_v55, %v2826_v53  ;;  %v2829_v57 = vpop.f32.mrb[6].mxu1  ;;  %v3146_v53 = vld [vmem:[%s4441_s14 + $0xbc] ss:$28 sps:$4 sm:$0xff]   ;;  %v3152_v55 = vld [vmem:[%s4441_s14 + $0xf4] ss:$28 sps:$4 sm:$0xff]  }
 0x28d   :  { %v2830_v58 = vpop.f32.mrb[7].mxu1  ;;  %2349 = vmatprep.subr.bf16.mxu0 %v3146_v53  ;;  %v3207_v53 = vld [vmem:[%s4441_s14 + $0x310] ss:$28 sps:$4 sm:$0xff]  }
 0x28e   :  { %v1155_v59 = vadd.f32 %v2828_v56, %v2651_v54  ;;  %v2831_v61 = vadd.f32 %v2830_v58, %v2829_v57  ;;  %2350 = vmatpush1.bf16.msra.mxu0 %v3144_v52  ;;  %v3156_v56 = vld [vmem:[%s4441_s14 + $0x128] ss:$28 sps:$4 sm:$0xff]   ;;  %v3162_v58 = vld [vmem:[%s4441_s14 + $0x160] ss:$28 sps:$4 sm:$0xff]   ;;  %v3209_v52 = vld [vmem:[%s4441_s14 + $0x314] ss:$28 sps:$4 sm:$0xff]  }
 0x28f   :  { %2351 = vmatprep.subr.bf16.mxu0 %v3152_v55  ;;  %v3158_v57 = vld [vmem:[%s4441_s14 + $0x12c] ss:$28 sps:$4 sm:$0xff]   ;;  %v3210_v55 = vld [vmem:[%s4441_s14 + $0x320] ss:$28 sps:$4 sm:$0xff]  }
 0x290   :  { %v1158_v62 = vadd.f32 %v2831_v61, %v2651_v54  ;;  %v1161_v63 = vmax.f32 %v1155_v59, 0.0  ;;  %v3150_v54 = vld [vmem:[%s4441_s14 + $0xf0] ss:$28 sps:$4 sm:$0xff]   ;;  %v3164_v59 = vld [vmem:[%s4441_s14 + $0x164] ss:$28 sps:$4 sm:$0xff]  }
 0x291   :  { %v3168_v61 = vld [vmem:[%s4441_s14 + $0x198] ss:$28 sps:$4 sm:$0xff]  }
 0x292   :  { %v1162_v0 = vmax.f32 %v1158_v62, 0.0  ;;  %2352 = vmatpush1.bf16.msra.mxu0 %v3150_v54  ;;  %v3170_v62 = vld [vmem:[%s4441_s14 + $0x19c] ss:$28 sps:$4 sm:$0xff]   ;;  %v3212_v54 = vld [vmem:[%s4441_s14 + $0x324] ss:$28 sps:$4 sm:$0xff]  }
 0x293   :  { %2353 = vmatprep.subr.bf16.mxu0 %v3158_v57  ;;  %v3213_v57 = vld [vmem:[%s4441_s14 + $0x348] ss:$28 sps:$4 sm:$0xff]  }
 0x294   :  { %v1163_v1 = vpack.c.bf16 %v1162_v0, %v1161_v63  ;;  %v3174_v63 = vld [vmem:[%s4441_s14 + $0x1d0] ss:$28 sps:$4 sm:$0xff]  }
 0x295   :  { %v3176_v0 = vld [vmem:[%s4441_s14 + $0x1d4] ss:$28 sps:$4 sm:$0xff]  }
 0x296   :  { %2888 = vmatmul.mubr.bf16.vlgmr.msra.gmra.mrb[8].mxu1 %v1163_v1  ;;  %2354 = vmatpush1.bf16.msra.mxu0 %v3156_v56  ;;  %v3180_v1 = vld [vmem:[%s4441_s14 + $0x208] ss:$28 sps:$4 sm:$0xff]  }
 0x297   :  { %2893 = vmatprep.mubr.msk.bf16.mxu1 %vm3393_vm2, %v3392_v60  ;;  %v3098_v60 = vld [vmem:[%s4437_s10] sm:$0xff]   ;;  %2355 = vmatprep.subr.bf16.mxu0 %v3164_v59  ;;  %v3215_v56 = vld [vmem:[%s4441_s14 + $0x34c] ss:$28 sps:$4 sm:$0xff]   ;;  %v3216_v59 = vld [vmem:[%s4441_s14 + $0x358] ss:$28 sps:$4 sm:$0xff]  }
 0x298   :  { %2892 = vmatpush3.bf16.msra.mxu1 %v3098_v60 }
 0x299   :  { %1467 = vmatprep.subr.bf16.mxu1 %v3101_v14 }
 0x29a   :  { %2356 = vmatpush1.bf16.msra.mxu0 %v3162_v58  ;;  %v3218_v58 = vld [vmem:[%s4441_s14 + $0x35c] ss:$28 sps:$4 sm:$0xff]  }
 0x29b   :  { %2357 = vmatprep.subr.bf16.mxu0 %v3170_v62  ;;  %v1375_v62 = vld [vmem:[%s4440_s13] sm:$0x3] }
 0x29e   :  { %2358 = vmatpush1.bf16.msra.mxu0 %v3168_v61  ;;  %v3221_v61 = vld [vmem:[%s4441_s14 + $0xc] ss:$28 sps:$4 sm:$0xff]  }
 0x29f   :  { %2359 = vmatprep.subr.bf16.mxu0 %v3176_v0  ;;  %v1384_v0 = vrot.slane %v1375_v62, %v3919_v28 }
 0x2a2   :  { %2360 = vmatpush1.bf16.msra.mxu0 %v3174_v63  ;;  %v1380_v63 = vrot.slane %v1375_v62, %v3913_v26  ;;  %v3280_v62 = vld [vmem:[%s4441_s14 + $0x168] ss:$28 sps:$4 sm:$0xff]  }
 0x369   :  { %v1269_v4 = vpop.f32.mrb[8].mxu1 }
 0x36a   :  { %v1270_v5 = vadd.f32 %v2668_v3, %v1269_v4  ;;  %v2889_v6 = vpop.f32.mrb[9].mxu1  ;;  %v3186_v4 = vld [vmem:[%s4441_s14 + $0x240] ss:$28 sps:$4 sm:$0xff]  }
 0x36b   :  { %v1272_v7 = vpop.f32.mrb[10].mxu1  ;;  %v3192_v6 = vld [vmem:[%s4441_s14 + $0x278] ss:$28 sps:$4 sm:$0xff]  }
 0x36c   :  { %v1276_v9 = vmul.f32 0.5, %v1270_v5  ;;  %2512 = vst.msk [vmem:[#allocation4] sm:$0xff] %vm2511_vm4, %v1270_v5  ;;  %v1273_v8 = vadd.f32 %v2668_v3, %v1272_v7  ;;  %v2890_v10 = vpop.f32.mrb[11].mxu1  ;;  %v3182_v3 = vld [vmem:[%s4441_s14 + $0x20c] ss:$28 sps:$4 sm:$0xff]  }
 0x36d   :  { %2361 = vmatprep.subr.bf16.mxu0 %v3182_v3  ;;  %v3194_v7 = vld [vmem:[%s4441_s14 + $0x27c] ss:$28 sps:$4 sm:$0xff]   ;;  %v3204_v10 = vld [vmem:[%s4441_s14 + $0x2e8] ss:$28 sps:$4 sm:$0xff]  }
 0x36e   :  { %v1278_v11 = vmul.f32 1.442695, %v1276_v9  ;;  %v1277_v12 = vmul.f32 0.5, %v1273_v8  ;;  %2513 = vst.msk [vmem:[#allocation4 + $0x8] sm:$0xff] %vm2511_vm4, %v1273_v8  ;;  %2362 = vmatpush1.bf16.msra.mxu0 %v3180_v1  ;;  %v3198_v9 = vld [vmem:[%s4441_s14 + $0x2b0] ss:$28 sps:$4 sm:$0xff]  }
 0x370   :  { %3283 = vpow2.f32 %v1278_v11  ;;  %v1280_v13 = vmul.f32 1.442695, %v1277_v12  ;;  %v3206_v11 = vld [vmem:[%s4441_s14 + $0x2ec] ss:$28 sps:$4 sm:$0xff]  }
 0x372   :  { %3285 = vpow2.f32 %v1280_v13  ;;  %v2679_v13 = vld [vmem:[%s4438_s11] ss:$0 sm:$0xff] }
 0x37a   :  { %v3284_v15 = vpop.eup %3283 }
 0x37b   :  { %1284 = vrot.lane.b32.xlu0 %v3284_v15, %s3394_s26 }
 0x37c   :  { %v3286_v16 = vpop.eup %3285 }
 0x37f   :  { %1286 = vrot.lane.b32.xlu0 %v3286_v16, %s3394_s26 }
 0x3ed   :  { %v1285_v18 = vpop.permute.xlu0 %1284 }
 0x3ee   :  { %v1290_v21 = vmul.f32 %v1285_v18, %v82_v17 }
 0x3f0   :  { %v1292_v27 = vadd.f32 %v1290_v21, %v1270_v5  ;;  %v3188_v5 = vld [vmem:[%s4441_s14 + $0x244] ss:$28 sps:$4 sm:$0xff]  }
 0x3f1   :  { %v1287_v23 = vpop.permute.xlu0 %1286  ;;  %2363 = vmatprep.subr.bf16.mxu0 %v3188_v5 }
 0x3f2   :  { %v1291_v24 = vmul.f32 %v1287_v23, %v83_v19  ;;  %2364 = vmatpush1.bf16.msra.mxu0 %v3186_v4 }
 0x3f3   :  { %2365 = vmatprep.subr.bf16.mxu0 %v3194_v7 }
 0x3f4   :  { %v1293_v29 = vadd.f32 %v1291_v24, %v1273_v8  ;;  %v3200_v8 = vld [vmem:[%s4441_s14 + $0x2b4] ss:$28 sps:$4 sm:$0xff]   ;;  %v3123_v24 = vld [vmem:[%s4441_s14] ss:$28 sps:$4 sm:$0xff]  }
 0x3f6   :  { %v1294_v31 = vpack.c.bf16 %v1293_v29, %v1292_v27  ;;  %2366 = vmatpush1.bf16.msra.mxu0 %v3192_v6  ;;  %v3131_v29 = vld [vmem:[%s4441_s14 + $0x3c] ss:$28 sps:$4 sm:$0xff]  }
 0x3f7   :  { %2367 = vmatprep.subr.bf16.mxu0 %v3200_v8 }
 0x3f8   :  { %2894 = vmatmul.mubr.msk.bf16.vlgmr.msra.gmra.mrb[12].mxu1 %vm787_vm3, %v1294_v31  ;;  %v3143_v31 = vld [vmem:[%s4441_s14 + $0xac] ss:$28 sps:$4 sm:$0xff]  }
 0x3f9   :  { %1468 = vmatpush1.bf16.msra.mxu1 %v3099_v30  ;;  %1499 = vmatprep.mubr.bf16.mxu1 %v3391_v2  ;;  %v3108_v2 = vld [vmem:[%s4439_s12 + $0x30] ss:$8 sps:$4 sm:$0xff]  }
 0x3fa   :  { %1469 = vmatprep.subr.bf16.mxu1 %v3104_v32  ;;  %2368 = vmatpush1.bf16.msra.mxu0 %v3198_v9  ;;  %v3135_v30 = vld [vmem:[%s4441_s14 + $0x70] ss:$28 sps:$4 sm:$0xff]   ;;  %v3141_v32 = vld [vmem:[%s4441_s14 + $0xa8] ss:$28 sps:$4 sm:$0xff]  }
 0x3fb   :  { %2369 = vmatprep.subr.bf16.mxu0 %v3206_v11 }
 0x3fd   :  { %1470 = vmatpush1.bf16.msra.mxu1 %v3102_v33  ;;  %v3149_v33 = vld [vmem:[%s4441_s14 + $0xe4] ss:$28 sps:$4 sm:$0xff]  }
 0x3fe   :  { %1471 = vmatprep.subr.bf16.mxu1 %v3107_v34  ;;  %2370 = vmatpush1.bf16.msra.mxu0 %v3204_v10  ;;  %v3147_v34 = vld [vmem:[%s4441_s14 + $0xe0] ss:$28 sps:$4 sm:$0xff]  }
 0x3ff   :  { %2371 = vmatprep.subr.bf16.mxu0 %v3212_v54  ;;  %v3273_v54 = vld [vmem:[%s4441_s14 + $0x280] ss:$28 sps:$4 sm:$0xff]  }
 0x401   :  { %1472 = vmatpush1.bf16.msra.mxu1 %v3105_v35  ;;  %v3155_v35 = vld [vmem:[%s4441_s14 + $0x11c] ss:$28 sps:$4 sm:$0xff]  }
 0x402   :  { %1473 = vmatprep.subr.bf16.mxu1 %v3110_v36  ;;  %v3153_v36 = vld [vmem:[%s4441_s14 + $0x118] ss:$28 sps:$4 sm:$0xff]   ;;  %2372 = vmatpush1.bf16.msra.mxu0 %v3210_v55  ;;  %v3274_v55 = vld [vmem:[%s4441_s14 + $0xc0] ss:$28 sps:$4 sm:$0xff]  }
 0x403   :  { %2373 = vmatprep.subr.bf16.mxu0 %v3218_v58  ;;  %v3277_v58 = vld [vmem:[%s4441_s14 + $0x2f0] ss:$28 sps:$4 sm:$0xff]  }
 0x405   :  { %1474 = vmatpush1.bf16.msra.mxu1 %v3108_v2  ;;  %v3161_v2 = vld [vmem:[%s4441_s14 + $0x154] ss:$28 sps:$4 sm:$0xff]  }
 0x406   :  { %1475 = vmatprep.subr.bf16.mxu1 %v3113_v37  ;;  %v3159_v37 = vld [vmem:[%s4441_s14 + $0x150] ss:$28 sps:$4 sm:$0xff]   ;;  %2374 = vmatpush1.bf16.msra.mxu0 %v3216_v59 }
 0x407   :  { %v3278_v59 = vld [vmem:[%s4441_s14 + $0x130] ss:$28 sps:$4 sm:$0xff]  }
 0x409   :  { %1476 = vmatpush1.bf16.msra.mxu1 %v3111_v38  ;;  %v3167_v38 = vld [vmem:[%s4441_s14 + $0x18c] ss:$28 sps:$4 sm:$0xff]  }
 0x40a   :  { %1477 = vmatprep.subr.bf16.mxu1 %v3116_v39  ;;  %v3165_v39 = vld [vmem:[%s4441_s14 + $0x188] ss:$28 sps:$4 sm:$0xff]  }
 0x40d   :  { %1478 = vmatpush1.bf16.msra.mxu1 %v3114_v40  ;;  %v3173_v40 = vld [vmem:[%s4441_s14 + $0x1c4] ss:$28 sps:$4 sm:$0xff]  }
 0x40e   :  { %1479 = vmatprep.subr.bf16.mxu1 %v3119_v41  ;;  %v3171_v41 = vld [vmem:[%s4441_s14 + $0x1c0] ss:$28 sps:$4 sm:$0xff]  }
 0x411   :  { %1480 = vmatpush1.bf16.msra.mxu1 %v3117_v42  ;;  %v3179_v42 = vld [vmem:[%s4441_s14 + $0x1fc] ss:$28 sps:$4 sm:$0xff]  }
 0x412   :  { %1481 = vmatprep.subr.bf16.mxu1 %v3122_v43  ;;  %v3177_v43 = vld [vmem:[%s4441_s14 + $0x1f8] ss:$28 sps:$4 sm:$0xff]  }
 0x415   :  { %1482 = vmatpush1.bf16.msra.mxu1 %v3120_v44  ;;  %v3185_v44 = vld [vmem:[%s4441_s14 + $0x234] ss:$28 sps:$4 sm:$0xff]  }
 0x416   :  { %2257 = vmatprep.subr.bf16.mxu1 %v3125_v45  ;;  %v3183_v45 = vld [vmem:[%s4441_s14 + $0x230] ss:$28 sps:$4 sm:$0xff]  }
 0x4cb   :  { %v1340_v12 = vpop.f32.mrb[12].mxu1 }
 0x4cc   :  { %v1341_v60 = vadd.f32 %v1340_v12, %v3906_v20  ;;  %v2895_v14 = vpop.f32.mrb[13].mxu1  ;;  %v3129_v20 = vld [vmem:[%s4441_s14 + $0x38] ss:$28 sps:$4 sm:$0xff]  }
 0x4cd   :  { %v1343_v15 = vpop.f32.mrb[14].mxu1 }
 0x4ce   :  { %v1354_v16 = vadd.f32 %v2679_v13, %v1341_v60  ;;  %v1344_v17 = vadd.f32 %v1343_v15, %v3908_v22  ;;  %v2896_v18 = vpop.f32.mrb[15].mxu1  ;;  %v3137_v22 = vld [vmem:[%s4441_s14 + $0x74] ss:$28 sps:$4 sm:$0xff]   ;;  %v3219_v15 = vld [vmem:[%s4441_s14 + $0x8] ss:$28 sps:$4 sm:$0xff]  }
 0x4cf   :  { %v3227_v18 = vld [vmem:[%s4441_s14 + $0x7c] ss:$28 sps:$4 sm:$0xff]  }
 0x4d0   :  { %v1355_v19 = vadd.f32 %v2679_v13, %v1344_v17  ;;  %v1356_v21 = vmax.f32 %v1354_v16, 0.0  ;;  %v3224_v16 = vld [vmem:[%s4441_s14 + $0x44] ss:$28 sps:$4 sm:$0xff]  }
 0x4d1   :  { %v3222_v17 = vld [vmem:[%s4441_s14 + $0x40] ss:$28 sps:$4 sm:$0xff]  }
 0x4d2   :  { %v1357_v23 = vmax.f32 %v1355_v19, 0.0  ;;  %v3225_v19 = vld [vmem:[%s4441_s14 + $0x78] ss:$28 sps:$4 sm:$0xff]  }
 0x4d4   :  { %v1358_v27 = vpack.c.bf16 %v1357_v23, %v1356_v21  ;;  %v3230_v21 = vld [vmem:[%s4441_s14 + $0xb4] ss:$28 sps:$4 sm:$0xff]  }
 0x4d5   :  { %v3228_v23 = vld [vmem:[%s4441_s14 + $0xb0] ss:$28 sps:$4 sm:$0xff]  }
 0x4d6   :  { %1500 = vmatmul.mubr.bf16.vlgmr.msra.gmra.mrb[16].mxu1 %v1358_v27  ;;  %v3231_v27 = vld [vmem:[%s4441_s14 + $0xe8] ss:$28 sps:$4 sm:$0xff]  }
 0x4d7   :  { %2258 = vmatpush1.bf16.msra.mxu1 %v3123_v24  ;;  %v3233_v24 = vld [vmem:[%s4441_s14 + $0xec] ss:$28 sps:$4 sm:$0xff]  }
 0x4d8   :  { %2259 = vmatprep.subr.bf16.mxu1 %v3131_v29  ;;  %v3236_v29 = vld [vmem:[%s4441_s14 + $0x124] ss:$28 sps:$4 sm:$0xff]  }
 0x4db   :  { %2260 = vmatpush1.bf16.msra.mxu1 %v3129_v20  ;;  %v3234_v20 = vld [vmem:[%s4441_s14 + $0x120] ss:$28 sps:$4 sm:$0xff]  }
 0x4dc   :  { %2261 = vmatprep.subr.bf16.mxu1 %v3137_v22  ;;  %v3239_v22 = vld [vmem:[%s4441_s14 + $0x15c] ss:$28 sps:$4 sm:$0xff]  }
 0x4df   :  { %2262 = vmatpush1.bf16.msra.mxu1 %v3135_v30  ;;  %v3237_v30 = vld [vmem:[%s4441_s14 + $0x158] ss:$28 sps:$4 sm:$0xff]  }
 0x4e0   :  { %2263 = vmatprep.subr.bf16.mxu1 %v3143_v31  ;;  %v3242_v31 = vld [vmem:[%s4441_s14 + $0x194] ss:$28 sps:$4 sm:$0xff]  }
 0x4e3   :  { %2264 = vmatpush1.bf16.msra.mxu1 %v3141_v32  ;;  %v3240_v32 = vld [vmem:[%s4441_s14 + $0x190] ss:$28 sps:$4 sm:$0xff]  }
 0x4e4   :  { %2265 = vmatprep.subr.bf16.mxu1 %v3149_v33  ;;  %v3245_v33 = vld [vmem:[%s4441_s14 + $0x1cc] ss:$28 sps:$4 sm:$0xff]  }
 0x4e7   :  { %2266 = vmatpush1.bf16.msra.mxu1 %v3147_v34  ;;  %v3243_v34 = vld [vmem:[%s4441_s14 + $0x1c8] ss:$28 sps:$4 sm:$0xff]  }
 0x4e8   :  { %2267 = vmatprep.subr.bf16.mxu1 %v3155_v35  ;;  %v3248_v35 = vld [vmem:[%s4441_s14 + $0x204] ss:$28 sps:$4 sm:$0xff]  }
 0x4eb   :  { %2268 = vmatpush1.bf16.msra.mxu1 %v3153_v36  ;;  %v3246_v36 = vld [vmem:[%s4441_s14 + $0x200] ss:$28 sps:$4 sm:$0xff]  }
 0x4ec   :  { %2269 = vmatprep.subr.bf16.mxu1 %v3161_v2  ;;  %v3251_v2 = vld [vmem:[%s4441_s14 + $0x23c] ss:$28 sps:$4 sm:$0xff]  }
 0x4ef   :  { %2270 = vmatpush1.bf16.msra.mxu1 %v3159_v37  ;;  %v3249_v37 = vld [vmem:[%s4441_s14 + $0x238] ss:$28 sps:$4 sm:$0xff]  }
 0x4f0   :  { %2271 = vmatprep.subr.bf16.mxu1 %v3167_v38  ;;  %v3254_v38 = vld [vmem:[%s4441_s14 + $0x274] ss:$28 sps:$4 sm:$0xff]  }
 0x4f3   :  { %2272 = vmatpush1.bf16.msra.mxu1 %v3165_v39  ;;  %v3252_v39 = vld [vmem:[%s4441_s14 + $0x270] ss:$28 sps:$4 sm:$0xff]  }
 0x4f4   :  { %2273 = vmatprep.subr.bf16.mxu1 %v3173_v40  ;;  %v3257_v40 = vld [vmem:[%s4441_s14 + $0x2ac] ss:$28 sps:$4 sm:$0xff]  }
 0x4f7   :  { %2274 = vmatpush1.bf16.msra.mxu1 %v3171_v41  ;;  %v3255_v41 = vld [vmem:[%s4441_s14 + $0x2a8] ss:$28 sps:$4 sm:$0xff]  }
 0x4f8   :  { %2275 = vmatprep.subr.bf16.mxu1 %v3179_v42  ;;  %v3260_v42 = vld [vmem:[%s4441_s14 + $0x2e4] ss:$28 sps:$4 sm:$0xff]  }
 0x4fb   :  { %2276 = vmatpush1.bf16.msra.mxu1 %v3177_v43  ;;  %v3258_v43 = vld [vmem:[%s4441_s14 + $0x2e0] ss:$28 sps:$4 sm:$0xff]  }
 0x4fc   :  { %2277 = vmatprep.subr.bf16.mxu1 %v3185_v44  ;;  %v3263_v44 = vld [vmem:[%s4441_s14 + $0x31c] ss:$28 sps:$4 sm:$0xff]  }
 0x4ff   :  { %2278 = vmatpush1.bf16.msra.mxu1 %v3183_v45  ;;  %v3261_v45 = vld [vmem:[%s4441_s14 + $0x318] ss:$28 sps:$4 sm:$0xff]  }
 0x500   :  { %2279 = vmatprep.subr.bf16.mxu1 %v3191_v46  ;;  %v3266_v46 = vld [vmem:[%s4441_s14 + $0x354] ss:$28 sps:$4 sm:$0xff]  }
 0x503   :  { %2280 = vmatpush1.bf16.msra.mxu1 %v3189_v47  ;;  %v3264_v47 = vld [vmem:[%s4441_s14 + $0x350] ss:$28 sps:$4 sm:$0xff]  }
 0x504   :  { %2281 = vmatprep.subr.bf16.mxu1 %v3197_v48  ;;  %v3267_v48 = vld [vmem:[%s4441_s14 + $0x1d8] ss:$28 sps:$4 sm:$0xff]  }
 0x507   :  { %2282 = vmatpush1.bf16.msra.mxu1 %v3195_v49  ;;  %v3268_v49 = vld [vmem:[%s4441_s14 + $0x18] ss:$28 sps:$4 sm:$0xff]  }
 0x508   :  { %2283 = vmatprep.subr.bf16.mxu1 %v3203_v50  ;;  %v3269_v50 = vld [vmem:[%s4441_s14 + $0x210] ss:$28 sps:$4 sm:$0xff]  }
 0x50b   :  { %2284 = vmatpush1.bf16.msra.mxu1 %v3201_v51  ;;  %v3270_v51 = vld [vmem:[%s4441_s14 + $0x50] ss:$28 sps:$4 sm:$0xff]  }
 0x50c   :  { %2285 = vmatprep.subr.bf16.mxu1 %v3209_v52  ;;  %v3271_v52 = vld [vmem:[%s4441_s14 + $0x248] ss:$28 sps:$4 sm:$0xff]  }
 0x50f   :  { %2286 = vmatpush1.bf16.msra.mxu1 %v3207_v53  ;;  %v3272_v53 = vld [vmem:[%s4441_s14 + $0x88] ss:$28 sps:$4 sm:$0xff]  }
 0x510   :  { %2287 = vmatprep.subr.bf16.mxu1 %v3215_v56  ;;  %v3275_v56 = vld [vmem:[%s4441_s14 + $0x2b8] ss:$28 sps:$4 sm:$0xff]  }
 0x513   :  { %2288 = vmatpush1.bf16.msra.mxu1 %v3213_v57  ;;  %v3276_v57 = vld [vmem:[%s4441_s14 + $0xf8] ss:$28 sps:$4 sm:$0xff]  }
 0x514   :  { %2300 = vmatprep.subr.bf16.mxu1 %v3221_v61  ;;  %v3279_v61 = vld [vmem:[%s4441_s14 + $0x328] ss:$28 sps:$4 sm:$0xff]  }
 0x5a9   :  { %v1501_v1 = vpop.f32.mrb[16].mxu1 }
 0x5aa   :  { %v1502_v3 = vadd.f32 %v1501_v1, %v1380_v63  ;;  %v1503_v4 = vpop.f32.mrb[17].mxu1  ;;  %v1664_v1 = vsub.s32 4, %v3910_v25 }
 0x5ab   :  { %v1504_v5 = vadd.f32 %v1503_v4, %v1384_v0  ;;  %v1505_v6 = vpop.f32.mrb[18].mxu1  ;;  %v1668_v4 = vsub.s32 5, %v3910_v25 }
 0x5ac   :  { %v1506_v7 = vadd.f32 %v1505_v6, %v1380_v63  ;;  %v1507_v9 = vpop.f32.mrb[19].mxu1  ;;  %v1510_v10 = vmax.f32 %v1502_v3, 0.0  ;;  %v3281_v63 = vld [vmem:[%s4441_s14 + $0x360] ss:$28 sps:$4 sm:$0xff]  }
 0x5ad   :  { %v1508_v8 = vadd.f32 %v1507_v9, %v1384_v0  ;;  %v1511_v12 = vmax.f32 %v1504_v5, 0.0  ;;  %v3282_v0 = vld [vmem:[%s4441_s14 + $0x1a0] ss:$28 sps:$4 sm:$0xff]   ;;  %s3395_s14 = smov [#allocation4]  }
 0x5ae   :  { %v1512_v11 = vmax.f32 %v1506_v7, 0.0  ;;  %v4386_v3 = vld [vmem:[%s4442_s15] sm:$0x7f]  ;;  %s2531_s15 = sshll.u32 %s3395_s14, 4  ;;  %s2532_s15 = int_to_ptr.vmem [resolvable:$true] %s2531_s15 }
 0x5af   :  { %v1513_v13 = vmax.f32 %v1508_v8, 0.0  ;;  %v1649_v5 = vrot.slane %v4386_v3, %v3913_v26  ;;  %v1665_v6 = vrot.slane %v4386_v3, %v1664_v1  ;;  %v1653_v7 = vrot.slane %v4386_v3, %v3919_v28  ;;  %s3343_s10 = scalar_lea.vmem %s2532_s15, 256  ;;  %p3348_p1 = scmp.lt.s32.totalorder %s2532_s15, %s2532_s15 }
 0x5b0   :  { %v4229_v60 = vpack.c.bf16 %v1512_v11, %v1510_v10  ;;  %v1669_v9 = vrot.slane %v4386_v3, %v1668_v4  ;;  %p3344_p0 = scmp.ne.s32.totalorder %s2532_s15, %s3343_s10  ;;  %p3349_p2 = scmp.lt.s32.totalorder %s3343_s10, %s3343_s10 }
 0x5b1   :  { %v4231_v14 = vpack.c.bf16 %v1513_v13, %v1511_v12 }
 0x5b2   :  { %p3350_p3 = por %p3349_p2, %p3348_p1 }
 0x5b3   :  { %2289 = vmatprep.mubr.bf16.mxu1 %v4231_v14  ;;  %2375 = vmatprep.mubr.bf16.mxu0 %v4231_v14 }
 0x5b4   :  { %2290 = vmatmul.mubr.bf16.vlgmr.msra.gmra.mrb[20].mxu1 %v4229_v60  ;;  %2376 = vmatmul.mubr.bf16.vlgmr.msra.gmra.mrb[4].mxu0 %v4229_v60  ;;  %p3351_p4 = pnand %p3350_p3, %p3344_p0 }
 0x5b5   :  { %2301 = vmatpush1.bf16.msra.mxu1 %v3219_v15  ;;  %2332 = vmatprep.mubr.bf16.mxu1 %v4231_v14 }
 0x5b6   :  { %2302 = vmatprep.subr.bf16.mxu1 %v3224_v16 }
 0x5b9   :  { %2303 = vmatpush1.bf16.msra.mxu1 %v3222_v17 }
 0x5ba   :  { %2304 = vmatprep.subr.bf16.mxu1 %v3227_v18 }
 0x5bd   :  { %2305 = vmatpush1.bf16.msra.mxu1 %v3225_v19 }
 0x5be   :  { %2306 = vmatprep.subr.bf16.mxu1 %v3230_v21 }
 0x5c1   :  { %2307 = vmatpush1.bf16.msra.mxu1 %v3228_v23 }
 0x5c2   :  { %2308 = vmatprep.subr.bf16.mxu1 %v3233_v24 }
 0x5c5   :  { %2309 = vmatpush1.bf16.msra.mxu1 %v3231_v27 }
 0x5c6   :  { %2310 = vmatprep.subr.bf16.mxu1 %v3236_v29 }
 0x5c9   :  { %2311 = vmatpush1.bf16.msra.mxu1 %v3234_v20 }
 0x5ca   :  { %2312 = vmatprep.subr.bf16.mxu1 %v3239_v22 }
 0x5cd   :  { %2313 = vmatpush1.bf16.msra.mxu1 %v3237_v30 }
 0x5ce   :  { %2314 = vmatprep.subr.bf16.mxu1 %v3242_v31 }
 0x5d1   :  { %2315 = vmatpush1.bf16.msra.mxu1 %v3240_v32 }
 0x5d2   :  { %2316 = vmatprep.subr.bf16.mxu1 %v3245_v33 }
 0x5d5   :  { %2317 = vmatpush1.bf16.msra.mxu1 %v3243_v34 }
 0x5d6   :  { %2318 = vmatprep.subr.bf16.mxu1 %v3248_v35 }
 0x5d9   :  { %2319 = vmatpush1.bf16.msra.mxu1 %v3246_v36 }
 0x5da   :  { %2320 = vmatprep.subr.bf16.mxu1 %v3251_v2 }
 0x5dd   :  { %2321 = vmatpush1.bf16.msra.mxu1 %v3249_v37 }
 0x5de   :  { %2322 = vmatprep.subr.bf16.mxu1 %v3254_v38 }
 0x5e1   :  { %2323 = vmatpush1.bf16.msra.mxu1 %v3252_v39 }
 0x5e2   :  { %2324 = vmatprep.subr.bf16.mxu1 %v3257_v40 }
 0x5e5   :  { %2325 = vmatpush1.bf16.msra.mxu1 %v3255_v41 }
 0x5e6   :  { %2326 = vmatprep.subr.bf16.mxu1 %v3260_v42 }
 0x5e9   :  { %2327 = vmatpush1.bf16.msra.mxu1 %v3258_v43 }
 0x5ea   :  { %2328 = vmatprep.subr.bf16.mxu1 %v3263_v44 }
 0x5ed   :  { %2329 = vmatpush1.bf16.msra.mxu1 %v3261_v45 }
 0x5ee   :  { %2330 = vmatprep.subr.bf16.mxu1 %v3266_v46 }
 0x5f1   :  { %2331 = vmatpush1.bf16.msra.mxu1 %v3264_v47 }
 0x5f2   :  { %2843 = vmatprep.subr.bf16.mxu1 %v3267_v48 }
 0x5f4   :  { %2333 = vmatmul.mubr.bf16.vlgmr.msra.gmra.mrb[24].mxu1 %v4229_v60 }
 0x5f5   :  { %2844 = vmatpush3.bf16.msra.mxu1 %v3268_v49  ;;  %2418 = vmatprep.mubr.bf16.mxu1 %v4231_v14 }
 0x5f6   :  { %2845 = vmatprep.subr.bf16.mxu1 %v3269_v50 }
 0x5f9   :  { %2846 = vmatpush3.bf16.msra.mxu1 %v3270_v51 }
 0x5fa   :  { %2847 = vmatprep.subr.bf16.mxu1 %v3271_v52 }
 0x5fd   :  { %2848 = vmatpush3.bf16.msra.mxu1 %v3272_v53 }
 0x5fe   :  { %2849 = vmatprep.subr.bf16.mxu1 %v3273_v54 }
 0x601   :  { %2850 = vmatpush3.bf16.msra.mxu1 %v3274_v55 }
 0x602   :  { %2851 = vmatprep.subr.bf16.mxu1 %v3275_v56 }
 0x605   :  { %2852 = vmatpush3.bf16.msra.mxu1 %v3276_v57 }
 0x606   :  { %2853 = vmatprep.subr.bf16.mxu1 %v3277_v58 }
 0x609   :  { %2854 = vmatpush3.bf16.msra.mxu1 %v3278_v59 }
 0x60a   :  { %2855 = vmatprep.subr.bf16.mxu1 %v3279_v61 }
 0x60d   :  { %2856 = vmatpush3.bf16.msra.mxu1 %v3280_v62 }
 0x60e   :  { %2857 = vmatprep.subr.bf16.mxu1 %v3281_v63 }
 0x611   :  { %2858 = vmatpush3.bf16.msra.mxu1 %v3282_v0 }
 0x614   :  { %2419 = vmatmul.mubr.bf16.vlgmr.msra.gmra.mrb[28].mxu1 %v4229_v60 }
 0x687   :  { %v2291_v8 = vpop.f32.mrb[20].mxu1  ;;  %v2377_v10 = vpop.f32.mrb[4].mxu0 }
 0x688   :  { %v2292_v11 = vadd.f32 %v2291_v8, %v1649_v5  ;;  %v2378_v12 = vadd.f32 %v2377_v10, %v1665_v6  ;;  %v2293_v13 = vpop.f32.mrb[21].mxu1  ;;  %v2379_v60 = vpop.f32.mrb[5].mxu0 }
 0x689   :  { %v2294_v14 = vadd.f32 %v2293_v13, %v1653_v7  ;;  %v2380_v15 = vadd.f32 %v2379_v60, %v1669_v9  ;;  %v2295_v16 = vpop.f32.mrb[22].mxu1  ;;  %v2381_v17 = vpop.f32.mrb[6].mxu0 }
 0x68a   :  { %v2427_v18 = vsub.f32 0.0, %v2292_v11  ;;  %v2431_v19 = vsub.f32 0.0, %v2378_v12  ;;  %v2296_v26 = vadd.f32 %v2295_v16, %v1649_v5  ;;  %v2382_v21 = vadd.f32 %v2381_v17, %v1665_v6  ;;  %v2297_v23 = vpop.f32.mrb[23].mxu1  ;;  %v2383_v24 = vpop.f32.mrb[7].mxu0 }
 0x68b   :  { %v2428_v27 = vsub.f32 0.0, %v2294_v14  ;;  %v2432_v28 = vsub.f32 0.0, %v2380_v15  ;;  %v2298_v29 = vadd.f32 %v2297_v23, %v1653_v7  ;;  %v2384_v20 = vadd.f32 %v2383_v24, %v1669_v9 }
 0x68c   :  { %v2441_v22 = vmul.f32 1.442695, %v2427_v18  ;;  %v2449_v30 = vmul.f32 1.442695, %v2431_v19  ;;  %v2434_v31 = vsub.f32 0.0, %v2296_v26  ;;  %v2438_v32 = vsub.f32 0.0, %v2382_v21 }
 0x68d   :  { %v2443_v33 = vmul.f32 1.442695, %v2428_v27  ;;  %v2451_v34 = vmul.f32 1.442695, %v2432_v28  ;;  %v2435_v35 = vsub.f32 0.0, %v2298_v29  ;;  %v2439_v36 = vsub.f32 0.0, %v2384_v20 }
 0x68e   :  { %3287 = vpow2.f32 %v2441_v22  ;;  %v2455_v2 = vmul.f32 1.442695, %v2434_v31  ;;  %v2463_v37 = vmul.f32 1.442695, %v2438_v32 }
 0x68f   :  { %3289 = vpow2.f32 %v2449_v30  ;;  %v2457_v38 = vmul.f32 1.442695, %v2435_v35  ;;  %v2465_v39 = vmul.f32 1.442695, %v2439_v36 }
 0x690   :  { %3291 = vpow2.f32 %v2443_v33 }
 0x691   :  { %3293 = vpow2.f32 %v2451_v34 }
 0x692   :  { %3295 = vpow2.f32 %v2455_v2 }
 0x693   :  { %3354 = shalt.err (!%p3351_p4)
}
 0x694   :  { %s3355_s3 = scalar_lea.hbm %s4444_s17, 256 }
 0x695   :  { %p3356_p5 = scmp.ne.s32.totalorder %s4444_s17, %s3355_s3  ;;  %p3359_p6 = scmp.lt.u32.totalorder %s3355_s3, %s4444_s17 }
 0x697   :  { %p3361_p7 = pnand %p3359_p6, %p3356_p5 }
 0x699   :  { %3364 = shalt.err (!%p3361_p7)
}
 0x69a   :  { %s3396_s29 = smov 128   ;;  %s3397_s21 = smov 8   ;;  %3297 = vpow2.f32 %v2463_v37  ;;  %v3288_v40 = vpop.eup %3287  ;;  %v1656_v1 = vsub.s32 2, %v3910_v25  ;;  %v1660_v4 = vsub.s32 3, %v3910_v25  ;;  %v1672_v31 = vsub.s32 6, %v3910_v25 }
 0x69b   :  { %2537 = dma.vmem_to_hbm [thread:$0]  %s2532_s15, 256, %s4444_s17, [#allocation5], %s3396_s29, %s3396_s29, %s3397_s21   ;;  %3299 = vpow2.f32 %v2457_v38  ;;  %v3290_v41 = vpop.eup %3289  ;;  %v2469_v42 = vadd.f32 1.0, %v3288_v40 }
 0x69c   :  { %3301 = vpow2.f32 %v2465_v39  ;;  %v3292_v43 = vpop.eup %3291  ;;  %v2473_v44 = vadd.f32 1.0, %v3290_v41  ;;  %v1657_v5 = vrot.slane %v4386_v3, %v1656_v1  ;;  %v1661_v6 = vrot.slane %v4386_v3, %v1660_v4  ;;  %s3398_s17 = smov [#allocation2]  }
 0x69d   :  { %v3294_v45 = vpop.eup %3293  ;;  %3303 = vrcp.f32 %v2469_v42  ;;  %v2470_v46 = vadd.f32 1.0, %v3292_v43  ;;  %v1673_v36 = vrot.slane %v4386_v3, %v1672_v31  ;;  %s2519_s13 = sshll.u32 %s3398_s17, 4  ;;  %s2520_s13 = int_to_ptr.vmem [resolvable:$true] %s2519_s13 }
 0x69e   :  { %v3296_v47 = vpop.eup %3295  ;;  %3305 = vrcp.f32 %v2473_v44  ;;  %v2474_v48 = vadd.f32 1.0, %v3294_v45  ;;  %s3365_s24 = scalar_lea.vmem %s2520_s13, 1792  ;;  %p3370_p9 = scmp.lt.s32.totalorder %s2520_s13, %s2520_s13 }
 0x69f   :  { %3307 = vrcp.f32 %v2470_v46  ;;  %v2476_v50 = vadd.f32 1.0, %v3296_v47  ;;  %p3366_p8 = scmp.ne.s32.totalorder %s2520_s13, %s3365_s24  ;;  %p3371_p10 = scmp.lt.s32.totalorder %s3365_s24, %s3365_s24 }
 0x6a0   :  { %3309 = vrcp.f32 %v2474_v48 }
 0x6a1   :  { %3311 = vrcp.f32 %v2476_v50  ;;  %p3372_p11 = por %p3371_p10, %p3370_p9 }
 0x6a3   :  { %p3373_p12 = pnand %p3372_p11, %p3366_p8 }
 0x6a4   :  { %v3298_v49 = vpop.eup %3297 }
 0x6a5   :  { %v3300_v51 = vpop.eup %3299  ;;  %v2480_v52 = vadd.f32 1.0, %v3298_v49 }
 0x6a6   :  { %v3302_v53 = vpop.eup %3301  ;;  %v2477_v54 = vadd.f32 1.0, %v3300_v51 }
 0x6a7   :  { %3313 = vrcp.f32 %v2480_v52  ;;  %v2481_v55 = vadd.f32 1.0, %v3302_v53  ;;  %v3304_v56 = vpop.eup %3303 }
 0x6a8   :  { %3315 = vrcp.f32 %v2477_v54  ;;  %v3306_v57 = vpop.eup %3305  ;;  %2497 = vst [vmem:[#allocation2] sm:$0xff] %v3304_v56 }
 0x6a9   :  { %3317 = vrcp.f32 %v2481_v55  ;;  %v3308_v58 = vpop.eup %3307  ;;  %2501 = vst [vmem:[#allocation2 + $0x20] sm:$0xff] %v3306_v57 }
 0x6aa   :  { %v3310_v59 = vpop.eup %3309  ;;  %2498 = vst [vmem:[#allocation2 + $0x8] sm:$0xff] %v3308_v58 }
 0x6ab   :  { %v3312_v61 = vpop.eup %3311  ;;  %2502 = vst [vmem:[#allocation2 + $0x28] sm:$0xff] %v3310_v59 }
 0x6ac   :  { %2504 = vst [vmem:[#allocation2 + $0x38] sm:$0xff] %v3312_v61 }
 0x6b1   :  { %v3314_v62 = vpop.eup %3313 }
 0x6b2   :  { %v3316_v63 = vpop.eup %3315  ;;  %2508 = vst [vmem:[#allocation2 + $0x58] sm:$0xff] %v3314_v62 }
 0x6b3   :  { %v3318_v0 = vpop.eup %3317  ;;  %2505 = vst [vmem:[#allocation2 + $0x40] sm:$0xff] %v3316_v63 }
 0x6b4   :  { %2509 = vst [vmem:[#allocation2 + $0x60] sm:$0xff] %v3318_v0 }
 0x6c7   :  { %v2334_v7 = vpop.f32.mrb[24].mxu1 }
 0x6c8   :  { %v2335_v9 = vadd.f32 %v2334_v7, %v1657_v5  ;;  %v2336_v8 = vpop.f32.mrb[25].mxu1 }
 0x6c9   :  { %v2337_v10 = vadd.f32 %v2336_v8, %v1661_v6  ;;  %v2338_v11 = vpop.f32.mrb[26].mxu1 }
 0x6ca   :  { %v2429_v12 = vsub.f32 0.0, %v2335_v9  ;;  %v2339_v13 = vadd.f32 %v2338_v11, %v1657_v5  ;;  %v2340_v60 = vpop.f32.mrb[27].mxu1 }
 0x6cb   :  { %v2430_v14 = vsub.f32 0.0, %v2337_v10  ;;  %v2341_v15 = vadd.f32 %v2340_v60, %v1661_v6 }
 0x6cc   :  { %v2445_v16 = vmul.f32 1.442695, %v2429_v12  ;;  %v2436_v17 = vsub.f32 0.0, %v2339_v13 }
 0x6cd   :  { %v2447_v18 = vmul.f32 1.442695, %v2430_v14  ;;  %v2437_v19 = vsub.f32 0.0, %v2341_v15 }
 0x6ce   :  { %3319 = vpow2.f32 %v2445_v16  ;;  %v2459_v26 = vmul.f32 1.442695, %v2436_v17 }
 0x6cf   :  { %3321 = vpow2.f32 %v2447_v18  ;;  %v2461_v21 = vmul.f32 1.442695, %v2437_v19 }
 0x6d0   :  { %3323 = vpow2.f32 %v2459_v26 }
 0x6d1   :  { %3325 = vpow2.f32 %v2461_v21 }
 0x6d8   :  { %v3320_v23 = vpop.eup %3319 }
 0x6d9   :  { %v3322_v24 = vpop.eup %3321  ;;  %v2471_v27 = vadd.f32 1.0, %v3320_v23 }
 0x6da   :  { %v3324_v28 = vpop.eup %3323  ;;  %v2472_v29 = vadd.f32 1.0, %v3322_v24 }
 0x6db   :  { %v3326_v20 = vpop.eup %3325  ;;  %3327 = vrcp.f32 %v2471_v27  ;;  %v2478_v22 = vadd.f32 1.0, %v3324_v28 }
 0x6dc   :  { %3329 = vrcp.f32 %v2472_v29  ;;  %v2479_v30 = vadd.f32 1.0, %v3326_v20 }
 0x6dd   :  { %3331 = vrcp.f32 %v2478_v22 }
 0x6de   :  { %3333 = vrcp.f32 %v2479_v30 }
 0x6e5   :  { %v3328_v32 = vpop.eup %3327 }
 0x6e6   :  { %v3330_v33 = vpop.eup %3329  ;;  %2499 = vst [vmem:[#allocation2 + $0x10] sm:$0xff] %v3328_v32 }
 0x6e7   :  { %v3332_v34 = vpop.eup %3331  ;;  %2500 = vst [vmem:[#allocation2 + $0x18] sm:$0xff] %v3330_v33  ;;  %v2859_v35 = vpop.f32.mrb[28].mxu1 }
 0x6e8   :  { %v3334_v2 = vpop.eup %3333  ;;  %2506 = vst [vmem:[#allocation2 + $0x48] sm:$0xff] %v3332_v34  ;;  %v2860_v37 = vpop.f32.mrb[29].mxu1 }
 0x6e9   :  { %2507 = vst [vmem:[#allocation2 + $0x50] sm:$0xff] %v3334_v2  ;;  %v2861_v38 = vadd.f32 %v2860_v37, %v2859_v35  ;;  %v2862_v39 = vpop.f32.mrb[30].mxu1 }
 0x6ea   :  { %v2863_v40 = vpop.f32.mrb[31].mxu1 }
 0x6eb   :  { %v2421_v41 = vadd.f32 %v2861_v38, %v1673_v36  ;;  %v2864_v42 = vadd.f32 %v2863_v40, %v2862_v39 }
 0x6ed   :  { %v2433_v43 = vsub.f32 0.0, %v2421_v41  ;;  %v2424_v44 = vadd.f32 %v2864_v42, %v1673_v36 }
 0x6ef   :  { %v2453_v25 = vmul.f32 1.442695, %v2433_v43  ;;  %v2440_v45 = vsub.f32 0.0, %v2424_v44 }
 0x6f1   :  { %3335 = vpow2.f32 %v2453_v25  ;;  %v2467_v46 = vmul.f32 1.442695, %v2440_v45 }
 0x6f3   :  { %3337 = vpow2.f32 %v2467_v46 }
 0x6fb   :  { %v3336_v47 = vpop.eup %3335 }
 0x6fc   :  { %v2475_v48 = vadd.f32 1.0, %v3336_v47 }
 0x6fd   :  { %v3338_v49 = vpop.eup %3337 }
 0x6fe   :  { %3339 = vrcp.f32 %v2475_v48  ;;  %v2482_v3 = vadd.f32 1.0, %v3338_v49 }
 0x700   :  { %3341 = vrcp.f32 %v2482_v3 }
 0x708   :  { %v3340_v50 = vpop.eup %3339 }
 0x709   :  { %2503 = vst.msk [vmem:[#allocation2 + $0x30] sm:$0xff] %vm787_vm3, %v3340_v50 }
 0x70a   :  { %v3342_v51 = vpop.eup %3341 }
 0x70b   :  { %2510 = vst.msk [vmem:[#allocation2 + $0x68] sm:$0xff] %vm787_vm3, %v3342_v51 }
 0x70c   :  { %3376 = shalt.err (!%p3373_p12)
}
 0x70d   :  { %s3377_s25 = scalar_lea.hbm %s4443_s16, 1792 }
 0x70e   :  { %p3378_p13 = scmp.ne.s32.totalorder %s4443_s16, %s3377_s25  ;;  %p3381_p0 = scmp.lt.u32.totalorder %s3377_s25, %s4443_s16 }
 0x710   :  { %p3383_p1 = pnand %p3381_p0, %p3378_p13 }
 0x712   :  { %3386 = shalt.err (!%p3383_p1)
}
 0x713   :  { %s3399_s11 = smov 896   ;;  %s3400_s26 = smov 56  }
 0x714   :  { %2525 = dma.vmem_to_hbm [thread:$0]  %s2520_s13, 1792, %s4443_s16, [#allocation3], %s3399_s11, %s3399_s11, %s3400_s26  }
 0x715   :  { %3387 = dma.done.wait [#allocation3], 1792  }
 0x716   :  { %3388 = vsyncadd [#allocation3], 4294965504 }
 0x717   :  { %3389 = dma.done.wait [#allocation5], 256  }
 0x718   :  { %3390 = vsyncadd [#allocation5], 4294967040 }
 0x719   :  { %2544 = vsyncpa [#allocation3], 1 }
 0x71a   :  { %2545 = vsyncpa [#allocation5], 1 }

</bundles_post_ra>
